<compile_context>
chip_gen: v7x
topology: tpu7x:2x2x1
jax: 0.10.0
libtpu: 0.0.40
codegen_flags: <defaults>
</compile_context>

<pallas_src>
import functools
import math

import jax
import jax.numpy as jnp
from jax.experimental import pallas as pl
from jax.experimental.pallas import tpu as pltpu

# ----- small synthetic "BERT" config -----
VOCAB = 50
HIDDEN = 32
N_HEADS = 4
HEAD_DIM = HIDDEN // N_HEADS
FFN = 64
N_LAYERS = 2
MAX_POS = 16
SCALE = 20.0
LN_EPS = 1e-12
NEG_INF = -1e9


# --------------------------------------------------------------------------
# In-kernel helpers (operate on f32 values)
# --------------------------------------------------------------------------
def _layer_norm(x, g, b):
    mu = jnp.mean(x, axis=-1, keepdims=True)
    var = jnp.mean((x - mu) ** 2, axis=-1, keepdims=True)
    return (x - mu) * jax.lax.rsqrt(var + LN_EPS) * g + b


def _l2_normalize(x):
    # torch.nn.functional.normalize(p=2, dim=1, eps=1e-12)
    n = jnp.sqrt(jnp.sum(x * x, axis=-1, keepdims=True))
    return x / jnp.maximum(n, 1e-12)


# --------------------------------------------------------------------------
# Fused kernel: grid=(N_LAYERS,).  Step 0: in-kernel embedding + emb-LN.
# Every step: one transformer layer (weights streamed per layer).
# Last step: CLS select -> pooler(tanh) -> L2-normalize -> cos_sim * scale.
# --------------------------------------------------------------------------
def _simcse_kernel(tok_col_ref, tok_row_ref, gvec_ref, wemb_ref, pemb_ref,
                   poolw_ref, lvec_ref, wqkv_ref, wo_ref, w1_ref, w2_ref,
                   out_ref, h_scr, *, n_a, n_b, seq_len):
    f32 = jnp.float32
    bf16 = jnp.bfloat16
    l = pl.program_id(0)
    T = h_scr.shape[0]
    NB = n_a + n_b

    # ---------------- step 0: fused embedding (one-hot MXU gathers) ----------------
    @pl.when(l == 0)
    def _embed():
        tok = tok_col_ref[...]                                            # [T,1] i32
        voc_i = jax.lax.broadcasted_iota(jnp.int32, (T, VOCAB), 1)
        word_oh = (voc_i == tok).astype(bf16)                             # [T,VOCAB]
        x = jnp.dot(word_oh, wemb_ref[...], preferred_element_type=f32)   # [T,H]

        row_i = jax.lax.broadcasted_iota(jnp.int32, (T, 1), 0)
        if (seq_len & (seq_len - 1)) == 0:                                # static branch
            pos_id = row_i & (seq_len - 1)
        else:
            pos_id = row_i % seq_len
        pos_i = jax.lax.broadcasted_iota(jnp.int32, (T, MAX_POS), 1)
        pos_oh = (pos_i == pos_id).astype(bf16)                           # [T,MAX_POS]
        x = x + jnp.dot(pos_oh, pemb_ref[...], preferred_element_type=f32)

        gv = gvec_ref[...]                                                # [8,128] f32
        x = x + gv[3:4, :HIDDEN]                                          # token-type-0 emb
        h_scr[...] = _layer_norm(x, gv[0:1, :HIDDEN], gv[1:2, :HIDDEN])
        out_ref[...] = jnp.zeros_like(out_ref)

    # ---------------- layer l (weights streamed by BlockSpec) ----------------
    # TODO(synk): hidden_dropout_prob=0.3 dropout omitted (eval-mode semantics).
    lv = lvec_ref[0]                                                      # [8,128] f32
    h = h_scr[...]                                                        # [T,H]  f32
    hb = h.astype(bf16)

    # fused QKV projection (one matmul); 1/sqrt(head_dim) folded into Wq/bq.
    qkv = jnp.dot(hb, wqkv_ref[0], preferred_element_type=f32) + lv[0:1, :3 * HIDDEN]

    # key-padding additive bias, built in-kernel from raw token ids
    key_bias = jnp.where(tok_row_ref[...] > 0, 0.0, NEG_INF).astype(f32)  # [NB,S]

    # block-diagonal attention: static loop over per-example [S,S] blocks
    ctx_blocks = []
    for b in range(NB):
        qkv_b = qkv[b * seq_len:(b + 1) * seq_len, :]                     # [S,3H] sublane slice
        bias_b = key_bias[b:b + 1, :]                                     # [1,S]
        heads = []
        for hd in range(N_HEADS):
            q = qkv_b[:, hd * HEAD_DIM:(hd + 1) * HEAD_DIM].astype(bf16)
            k = qkv_b[:, HIDDEN + hd * HEAD_DIM:
                         HIDDEN + (hd + 1) * HEAD_DIM].astype(bf16)
            v = qkv_b[:, 2 * HIDDEN + hd * HEAD_DIM:
                         2 * HIDDEN + (hd + 1) * HEAD_DIM].astype(bf16)
            s = jax.lax.dot_general(q, k, (((1,), (1,)), ((), ())),
                                    preferred_element_type=f32)           # [S,S]
            s = s + bias_b
            m = jnp.max(s, axis=-1, keepdims=True)
            e = jnp.exp(s - m)
            p = e * pl.reciprocal(jnp.sum(e, axis=-1, keepdims=True), approx=True)
            heads.append(jnp.dot(p.astype(bf16), v,
                                 preferred_element_type=f32))             # [S,dH]
        ctx_blocks.append(jnp.concatenate(heads, axis=1))                 # [S,H]
    ctx = jnp.concatenate(ctx_blocks, axis=0)                             # [T,H]

    # single Wo matmul per layer
    attn = jnp.dot(ctx.astype(bf16), wo_ref[0],
                   preferred_element_type=f32) + lv[1:2, :HIDDEN]
    h = _layer_norm(h + attn, lv[2:3, :HIDDEN], lv[3:4, :HIDDEN])

    ff = jnp.dot(h.astype(bf16), w1_ref[0],
                 preferred_element_type=f32) + lv[4:5, :FFN]
    # TODO(synk): BERT uses exact erf-GELU; tanh-approximate GELU used for lowering safety.
    ff = jax.nn.gelu(ff, approximate=True)
    ff = jnp.dot(ff.astype(bf16), w2_ref[0],
                 preferred_element_type=f32) + lv[5:6, :HIDDEN]
    h = _layer_norm(h + ff, lv[6:7, :HIDDEN], lv[7:8, :HIDDEN])
    h_scr[...] = h

    # ---------------- last step: pooler + cosine similarity ----------------
    @pl.when(l == pl.num_programs(0) - 1)
    def _finalize():
        gv = gvec_ref[...]
        out_rows, out_cols = out_ref.shape
        hb2 = h.astype(bf16)

        # single one-hot selection matmul extracts all CLS rows at once
        row_i = jax.lax.broadcasted_iota(jnp.int32, (out_rows, T), 0)
        col_i = jax.lax.broadcasted_iota(jnp.int32, (out_rows, T), 1)
        sel = ((col_i == row_i * seq_len) & (row_i < NB)).astype(bf16)    # [out_rows,T]
        cls = jnp.dot(sel, hb2, preferred_element_type=f32)               # [out_rows,H]

        # single pooler matmul for anchor + candidate halves
        pooled = jnp.tanh(jnp.dot(cls.astype(bf16), poolw_ref[...],
                                  preferred_element_type=f32) + gv[2:3, :HIDDEN])
        pn = _l2_normalize(pooled)                                        # f32
        a_n = pn[0:n_a]
        b_n = pn[n_a:NB]
        sim = jax.lax.dot_general(a_n, b_n, (((1,), (1,)), ((), ())),
                                  preferred_element_type=f32) * SCALE     # [n_a,n_b]

        # lane-dense padded output tile
        pad = sim
        if out_cols > n_b:
            pad = jnp.concatenate(
                [pad, jnp.zeros((n_a, out_cols - n_b), f32)], axis=1)
        if out_rows > n_a:
            pad = jnp.concatenate(
                [pad, jnp.zeros((out_rows - n_a, out_cols), f32)], axis=0)
        out_ref[...] = pad


# --------------------------------------------------------------------------
# BlockSpec helpers
# --------------------------------------------------------------------------
def _const_spec(shape):
    nd = len(shape)
    return pl.BlockSpec(tuple(shape), lambda l, nd=nd: (0,) * nd)


def _layer_spec(shape):
    rest = len(shape) - 1
    return pl.BlockSpec((1,) + tuple(shape[1:]),
                        lambda l, rest=rest: (l,) + (0,) * rest)


# --------------------------------------------------------------------------
# Wrapper
# --------------------------------------------------------------------------
def simcse_scores(packed, tokens, n_a):
    """tokens: [NB, S] int32 (all examples stacked); n_a = rows of the anchor tensor."""
    NB, S = tokens.shape
    T = NB * S
    n_b = NB - n_a
    out_rows = ((max(NB, n_a) + 7) // 8) * 8
    out_cols = ((n_b + 127) // 128) * 128

    # Only per-call wrapper work: trivial int reshapes into consumption layouts.
    tok_col = tokens.reshape(T, 1).astype(jnp.int32)    # for embedding one-hot
    tok_row = tokens.astype(jnp.int32)                  # for key-padding bias

    operands = [tok_col, tok_row, packed["gvec"], packed["word_emb"],
                packed["pos_emb"], packed["pool_w"], packed["lvec"],
                packed["wqkv"], packed["wo"], packed["w1"], packed["w2"]]
    in_specs = [_const_spec(tok_col.shape), _const_spec(tok_row.shape),
                _const_spec(packed["gvec"].shape), _const_spec(packed["word_emb"].shape),
                _const_spec(packed["pos_emb"].shape), _const_spec(packed["pool_w"].shape),
                _layer_spec(packed["lvec"].shape), _layer_spec(packed["wqkv"].shape),
                _layer_spec(packed["wo"].shape), _layer_spec(packed["w1"].shape),
                _layer_spec(packed["w2"].shape)]

    kernel = functools.partial(_simcse_kernel, n_a=n_a, n_b=n_b, seq_len=S)
    out_pad = pl.pallas_call(
        kernel,
        grid=(N_LAYERS,),
        in_specs=in_specs,
        out_specs=_const_spec((out_rows, out_cols)),
        out_shape=jax.ShapeDtypeStruct((out_rows, out_cols), jnp.float32),
        scratch_shapes=[pltpu.VMEM((T, HIDDEN), jnp.float32)],
        compiler_params=pltpu.CompilerParams(dimension_semantics=("arbitrary",)),
    )(*operands)
    return out_pad[:n_a, :n_b]


def model_forward(packed, *token_ids_list):
    # Batch all encodes into one stacked token tensor (single encoder pass).
    n_a = token_ids_list[0].shape[0]
    tokens = jnp.concatenate(token_ids_list, axis=0)
    return simcse_scores(packed, tokens, n_a)


# --------------------------------------------------------------------------
# Synthetic BERT parameters + one-time packing into kernel operands
# --------------------------------------------------------------------------
def init_params(key):
    def norm(k, shape):
        return (0.02 * jax.random.normal(k, shape)).astype(jnp.float32)

    ki = iter(jax.random.split(key, 16))
    return {
        "word_emb": norm(next(ki), (VOCAB, HIDDEN)),
        "pos_emb": norm(next(ki), (MAX_POS, HIDDEN)),
        "type_emb": norm(next(ki), (2, HIDDEN)),
        "emb_ln_g": jnp.ones((HIDDEN,), jnp.float32),
        "emb_ln_b": jnp.zeros((HIDDEN,), jnp.float32),
        "wqkv": norm(next(ki), (N_LAYERS, HIDDEN, 3 * HIDDEN)),   # wq|wk|wv fused
        "bqkv": jnp.zeros((N_LAYERS, 3 * HIDDEN), jnp.float32),
        "wo": norm(next(ki), (N_LAYERS, HIDDEN, HIDDEN)),
        "bo": jnp.zeros((N_LAYERS, HIDDEN), jnp.float32),
        "ln1_g": jnp.ones((N_LAYERS, HIDDEN), jnp.float32),
        "ln1_b": jnp.zeros((N_LAYERS, HIDDEN), jnp.float32),
        "w1": norm(next(ki), (N_LAYERS, HIDDEN, FFN)),
        "b1": jnp.zeros((N_LAYERS, FFN), jnp.float32),
        "w2": norm(next(ki), (N_LAYERS, FFN, HIDDEN)),
        "b2": jnp.zeros((N_LAYERS, HIDDEN), jnp.float32),
        "ln2_g": jnp.ones((N_LAYERS, HIDDEN), jnp.float32),
        "ln2_b": jnp.zeros((N_LAYERS, HIDDEN), jnp.float32),
        "pool_w": norm(next(ki), (HIDDEN, HIDDEN)),
        "pool_b": jnp.zeros((HIDDEN,), jnp.float32),
    }


def pack_params(p):
    """One-time conversion of canonical f32 params into kernel operands:
    bf16 matmul weights, 1/sqrt(head_dim) folded into Wq/bq, tiny per-layer
    vectors packed into one lane-dense [N_LAYERS,8,128] tensor and the global
    vectors into one [8,128] tensor (operand count 19 -> 11)."""
    inv = 1.0 / math.sqrt(HEAD_DIM)
    wqkv = p["wqkv"].at[:, :, :HIDDEN].multiply(inv)
    bqkv = p["bqkv"].at[:, :HIDDEN].multiply(inv)

    lvec = jnp.zeros((N_LAYERS, 8, 128), jnp.float32)
    lvec = lvec.at[:, 0, :3 * HIDDEN].set(bqkv)
    lvec = lvec.at[:, 1, :HIDDEN].set(p["bo"])
    lvec = lvec.at[:, 2, :HIDDEN].set(p["ln1_g"])
    lvec = lvec.at[:, 3, :HIDDEN].set(p["ln1_b"])
    lvec = lvec.at[:, 4, :FFN].set(p["b1"])
    lvec = lvec.at[:, 5, :HIDDEN].set(p["b2"])
    lvec = lvec.at[:, 6, :HIDDEN].set(p["ln2_g"])
    lvec = lvec.at[:, 7, :HIDDEN].set(p["ln2_b"])

    gvec = jnp.zeros((8, 128), jnp.float32)
    gvec = gvec.at[0, :HIDDEN].set(p["emb_ln_g"])
    gvec = gvec.at[1, :HIDDEN].set(p["emb_ln_b"])
    gvec = gvec.at[2, :HIDDEN].set(p["pool_b"])
    gvec = gvec.at[3, :HIDDEN].set(p["type_emb"][0])

    bf16 = jnp.bfloat16
    return {
        "gvec": gvec,
        "lvec": lvec,
        "word_emb": p["word_emb"].astype(bf16),
        "pos_emb": p["pos_emb"].astype(bf16),
        "wqkv": wqkv.astype(bf16),
        "wo": p["wo"].astype(bf16),
        "w1": p["w1"].astype(bf16),
        "w2": p["w2"].astype(bf16),
        "pool_w": p["pool_w"].astype(bf16),
    }


# --------------------------------------------------------------------------
if __name__ == "__main__":
    key = jax.random.PRNGKey(0)
    k_params, k_a, k_b, k_c = jax.random.split(key, 4)
    packed = pack_params(init_params(k_params))   # one-time, outside the per-call path

    B, S = 2, 8

    def make_tokens(k):
        ids = jax.random.randint(k, (B, S), 1, VOCAB, dtype=jnp.int32)
        return ids.at[:, -2:].set(0)   # trailing padding exercises the key-padding mask

    tok_a = make_tokens(k_a)   # anchor
    tok_b = make_tokens(k_b)   # positive
    tok_c = make_tokens(k_c)   # in-batch negative

    fwd = jax.jit(model_forward)
    scores = jax.block_until_ready(fwd(packed, tok_a, tok_b, tok_c))   # (B, 2*B) = (2, 4)
    assert scores.shape == (B, 2 * B) and scores.dtype == jnp.float32
    assert bool(jnp.all(jnp.isfinite(scores)))
    print("KERNEL_OK")
</pallas_src>

<mosaic_0001>
module attributes {stable_mosaic.version = 11 : i64} {
  func.func @_simcse_kernel(%arg0: i32, %arg1: memref<48x1xi32, #tpu.memory_space<vmem>>, %arg2: memref<6x8xi32, #tpu.memory_space<vmem>>, %arg3: memref<8x128xf32, #tpu.memory_space<vmem>>, %arg4: memref<50x32xbf16, #tpu.memory_space<vmem>>, %arg5: memref<16x32xbf16, #tpu.memory_space<vmem>>, %arg6: memref<32x32xbf16, #tpu.memory_space<vmem>>, %arg7: memref<1x8x128xf32, #tpu.memory_space<vmem>>, %arg8: memref<1x32x96xbf16, #tpu.memory_space<vmem>>, %arg9: memref<1x32x32xbf16, #tpu.memory_space<vmem>>, %arg10: memref<1x32x64xbf16, #tpu.memory_space<vmem>>, %arg11: memref<1x64x32xbf16, #tpu.memory_space<vmem>>, %arg12: memref<8x128xf32, #tpu.memory_space<vmem>>, %arg13: memref<48x32xf32, #tpu.memory_space<vmem>>) attributes {dimension_semantics = [#tpu.dimension_semantics<arbitrary>], iteration_bounds = array<i64: 2>, scalar_prefetch = 0 : i64, scratch_operands = 1 : i64, tpu.core_type = #tpu.core_type<tc>, window_params = [{pipeline_mode = #tpu.pipeline_mode<synchronous>, transform_indices = @transform_0, window_bounds = array<i64: 48, 1>}, {pipeline_mode = #tpu.pipeline_mode<synchronous>, transform_indices = @transform_1, window_bounds = array<i64: 6, 8>}, {pipeline_mode = #tpu.pipeline_mode<synchronous>, transform_indices = @transform_2, window_bounds = array<i64: 8, 128>}, {pipeline_mode = #tpu.pipeline_mode<synchronous>, transform_indices = @transform_3, window_bounds = array<i64: 50, 32>}, {pipeline_mode = #tpu.pipeline_mode<synchronous>, transform_indices = @transform_4, window_bounds = array<i64: 16, 32>}, {pipeline_mode = #tpu.pipeline_mode<synchronous>, transform_indices = @transform_5, window_bounds = array<i64: 32, 32>}, {transform_indices = @transform_6, window_bounds = array<i64: 1, 8, 128>}, {transform_indices = @transform_7, window_bounds = array<i64: 1, 32, 96>}, {transform_indices = @transform_8, window_bounds = array<i64: 1, 32, 32>}, {transform_indices = @transform_9, window_bounds = array<i64: 1, 32, 64>}, {transform_indices = @transform_10, window_bounds = array<i64: 1, 64, 32>}, {pipeline_mode = #tpu.pipeline_mode<synchronous>, transform_indices = @transform_11, window_bounds = array<i64: 8, 128>}]} {
    %c0_i32 = arith.constant 0 : i32
    %0 = arith.cmpi eq, %arg0, %c0_i32 : i32
    %1 = arith.extui %0 : i1 to i32
    %c0_i32_0 = arith.constant 0 : i32
    %2 = arith.cmpi ne, %1, %c0_i32_0 : i32
    scf.if %2 {
      %c0_138 = arith.constant 0 : index
      %c0_139 = arith.constant 0 : index
      %630 = vector.load %arg1[%c0_138, %c0_139] : memref<48x1xi32, #tpu.memory_space<vmem>>, vector<48x1xi32>
      %631 = tpu.iota {dimensions = array<i32: 1>} : vector<48x50xi32>
      %632 = vector.broadcast %630 : vector<48x1xi32> to vector<48x50xi32>
      %633 = arith.cmpi eq, %631, %632 : vector<48x50xi32>
      %634 = arith.extui %633 : vector<48x50xi1> to vector<48x50xi32>
      %635 = arith.sitofp %634 : vector<48x50xi32> to vector<48x50xf32>
      %636 = arith.truncf %635 : vector<48x50xf32> to vector<48x50xbf16>
      %c0_140 = arith.constant 0 : index
      %c0_141 = arith.constant 0 : index
      %637 = vector.load %arg4[%c0_140, %c0_141] : memref<50x32xbf16, #tpu.memory_space<vmem>>, vector<50x32xbf16>
      %cst_142 = arith.constant dense<0.000000e+00> : vector<48x32xf32>
      %638 = tpu.matmul %636, %637, %cst_142 {dimension_numbers = #tpu.dot_dimension_numbers<[1], [0], [0], [1], [0, 0, 1, 1], [], []>} : vector<48x50xbf16>, vector<50x32xbf16>, vector<48x32xf32> -> vector<48x32xf32>
      %639 = tpu.iota {dimensions = array<i32: 0>} : vector<48x1xi32>
      %c7_i32 = arith.constant 7 : i32
      %640 = vector.broadcast %c7_i32 : i32 to vector<48x1xi32>
      %641 = arith.andi %639, %640 : vector<48x1xi32>
      %642 = tpu.iota {dimensions = array<i32: 1>} : vector<48x16xi32>
      %643 = vector.broadcast %641 : vector<48x1xi32> to vector<48x16xi32>
      %644 = arith.cmpi eq, %642, %643 : vector<48x16xi32>
      %645 = arith.extui %644 : vector<48x16xi1> to vector<48x16xi32>
      %646 = arith.sitofp %645 : vector<48x16xi32> to vector<48x16xf32>
      %647 = arith.truncf %646 : vector<48x16xf32> to vector<48x16xbf16>
      %c0_143 = arith.constant 0 : index
      %c0_144 = arith.constant 0 : index
      %648 = vector.load %arg5[%c0_143, %c0_144] : memref<16x32xbf16, #tpu.memory_space<vmem>>, vector<16x32xbf16>
      %cst_145 = arith.constant dense<0.000000e+00> : vector<48x32xf32>
      %649 = tpu.matmul %647, %648, %cst_145 {dimension_numbers = #tpu.dot_dimension_numbers<[1], [0], [0], [1], [0, 0, 1, 1], [], []>} : vector<48x16xbf16>, vector<16x32xbf16>, vector<48x32xf32> -> vector<48x32xf32>
      %650 = arith.addf %638, %649 : vector<48x32xf32>
      %c0_146 = arith.constant 0 : index
      %c0_147 = arith.constant 0 : index
      %651 = vector.load %arg3[%c0_146, %c0_147] : memref<8x128xf32, #tpu.memory_space<vmem>>, vector<8x128xf32>
      %652 = vector.extract_strided_slice %651 {offsets = [3, 0], sizes = [1, 32], strides = [1, 1]} : vector<8x128xf32> to vector<1x32xf32>
      %653 = vector.broadcast %652 : vector<1x32xf32> to vector<48x32xf32>
      %654 = arith.addf %650, %653 : vector<48x32xf32>
      %655 = vector.extract_strided_slice %651 {offsets = [0, 0], sizes = [1, 32], strides = [1, 1]} : vector<8x128xf32> to vector<1x32xf32>
      %656 = vector.extract_strided_slice %651 {offsets = [1, 0], sizes = [1, 32], strides = [1, 1]} : vector<8x128xf32> to vector<1x32xf32>
      %cst_148 = arith.constant dense<0.000000e+00> : vector<48xf32>
      %657 = vector.multi_reduction <add>, %654, %cst_148 [1] : vector<48x32xf32> to vector<48xf32>
      %658 = vector.shape_cast %657 : vector<48xf32> to vector<48x1xf32>
      %cst_149 = arith.constant 3.200000e+01 : f32
      %659 = vector.broadcast %cst_149 : f32 to vector<48x1xf32>
      %660 = arith.divf %658, %659 : vector<48x1xf32>
      %661 = vector.broadcast %660 : vector<48x1xf32> to vector<48x32xf32>
      %662 = arith.subf %654, %661 : vector<48x32xf32>
      %663 = arith.mulf %662, %662 : vector<48x32xf32>
      %cst_150 = arith.constant dense<0.000000e+00> : vector<48xf32>
      %664 = vector.multi_reduction <add>, %663, %cst_150 [1] : vector<48x32xf32> to vector<48xf32>
      %665 = vector.shape_cast %664 : vector<48xf32> to vector<48x1xf32>
      %cst_151 = arith.constant 3.200000e+01 : f32
      %666 = vector.broadcast %cst_151 : f32 to vector<48x1xf32>
      %667 = arith.divf %665, %666 : vector<48x1xf32>
      %668 = vector.broadcast %660 : vector<48x1xf32> to vector<48x32xf32>
      %669 = arith.subf %654, %668 : vector<48x32xf32>
      %cst_152 = arith.constant 9.99999996E-13 : f32
      %670 = vector.broadcast %cst_152 : f32 to vector<48x1xf32>
      %671 = arith.addf %667, %670 : vector<48x1xf32>
      %672 = math.rsqrt %671 : vector<48x1xf32>
      %673 = vector.broadcast %672 : vector<48x1xf32> to vector<48x32xf32>
      %674 = arith.mulf %669, %673 : vector<48x32xf32>
      %675 = vector.broadcast %655 : vector<1x32xf32> to vector<48x32xf32>
      %676 = arith.mulf %674, %675 : vector<48x32xf32>
      %677 = vector.broadcast %656 : vector<1x32xf32> to vector<48x32xf32>
      %678 = arith.addf %676, %677 : vector<48x32xf32>
      %c0_153 = arith.constant 0 : index
      %c0_154 = arith.constant 0 : index
      %679 = vector.load %arg13[%c0_153, %c0_154] : memref<48x32xf32, #tpu.memory_space<vmem>>, vector<48x32xf32>
      tpu.vector_store %arg13[%c0_153, %c0_154], %678 {strides = array<i32>} : memref<48x32xf32, #tpu.memory_space<vmem>>, vector<48x32xf32>,
      %cst_155 = arith.constant 0.000000e+00 : f32
      %680 = vector.broadcast %cst_155 : f32 to vector<8x128xf32>
      %c0_156 = arith.constant 0 : index
      %c0_157 = arith.constant 0 : index
      %681 = vector.load %arg12[%c0_156, %c0_157] : memref<8x128xf32, #tpu.memory_space<vmem>>, vector<8x128xf32>
      tpu.vector_store %arg12[%c0_156, %c0_157], %680 {strides = array<i32>} : memref<8x128xf32, #tpu.memory_space<vmem>>, vector<8x128xf32>,
    } else {
    }
    %c0 = arith.constant 0 : index
    %c0_1 = arith.constant 0 : index
    %c0_2 = arith.constant 0 : index
    %3 = vector.load %arg7[%c0, %c0_1, %c0_2] : memref<1x8x128xf32, #tpu.memory_space<vmem>>, vector<1x8x128xf32>
    %4 = vector.shape_cast %3 : vector<1x8x128xf32> to vector<8x128xf32>
    %c0_3 = arith.constant 0 : index
    %c0_4 = arith.constant 0 : index
    %5 = vector.load %arg13[%c0_3, %c0_4] : memref<48x32xf32, #tpu.memory_space<vmem>>, vector<48x32xf32>
    %6 = arith.truncf %5 : vector<48x32xf32> to vector<48x32xbf16>
    %c0_5 = arith.constant 0 : index
    %c0_6 = arith.constant 0 : index
    %c0_7 = arith.constant 0 : index
    %7 = vector.load %arg8[%c0_5, %c0_6, %c0_7] : memref<1x32x96xbf16, #tpu.memory_space<vmem>>, vector<1x32x96xbf16>
    %8 = vector.shape_cast %7 : vector<1x32x96xbf16> to vector<32x96xbf16>
    %cst = arith.constant dense<0.000000e+00> : vector<48x96xf32>
    %9 = tpu.matmul %6, %8, %cst {dimension_numbers = #tpu.dot_dimension_numbers<[1], [0], [0], [1], [0, 0, 1, 1], [], []>} : vector<48x32xbf16>, vector<32x96xbf16>, vector<48x96xf32> -> vector<48x96xf32>
    %10 = vector.extract_strided_slice %4 {offsets = [0, 0], sizes = [1, 96], strides = [1, 1]} : vector<8x128xf32> to vector<1x96xf32>
    %11 = vector.broadcast %10 : vector<1x96xf32> to vector<48x96xf32>
    %12 = arith.addf %9, %11 : vector<48x96xf32>
    %c0_8 = arith.constant 0 : index
    %c0_9 = arith.constant 0 : index
    %13 = vector.load %arg2[%c0_8, %c0_9] : memref<6x8xi32, #tpu.memory_space<vmem>>, vector<6x8xi32>
    %c0_i32_10 = arith.constant 0 : i32
    %14 = vector.broadcast %c0_i32_10 : i32 to vector<6x8xi32>
    %15 = arith.cmpi sgt, %13, %14 : vector<6x8xi32>
    %cst_11 = arith.constant 0.000000e+00 : f32
    %cst_12 = arith.constant -1.000000e+09 : f32
    %16 = vector.broadcast %cst_11 : f32 to vector<6x8xf32>
    %17 = vector.broadcast %cst_12 : f32 to vector<6x8xf32>
    %18 = arith.select %15, %16, %17 : vector<6x8xi1>, vector<6x8xf32>
    %19 = vector.extract_strided_slice %12 {offsets = [0, 0], sizes = [8, 96], strides = [1, 1]} : vector<48x96xf32> to vector<8x96xf32>
    %20 = vector.extract_strided_slice %18 {offsets = [0, 0], sizes = [1, 8], strides = [1, 1]} : vector<6x8xf32> to vector<1x8xf32>
    %21 = vector.extract_strided_slice %19 {offsets = [0, 0], sizes = [8, 8], strides = [1, 1]} : vector<8x96xf32> to vector<8x8xf32>
    %22 = arith.truncf %21 : vector<8x8xf32> to vector<8x8xbf16>
    %23 = vector.extract_strided_slice %19 {offsets = [0, 32], sizes = [8, 8], strides = [1, 1]} : vector<8x96xf32> to vector<8x8xf32>
    %24 = arith.truncf %23 : vector<8x8xf32> to vector<8x8xbf16>
    %25 = vector.extract_strided_slice %19 {offsets = [0, 64], sizes = [8, 8], strides = [1, 1]} : vector<8x96xf32> to vector<8x8xf32>
    %26 = arith.truncf %25 : vector<8x8xf32> to vector<8x8xbf16>
    %cst_13 = arith.constant dense<0.000000e+00> : vector<8x8xf32>
    %27 = tpu.matmul %22, %24, %cst_13 {dimension_numbers = #tpu.dot_dimension_numbers<[1], [1], [0], [0], [0, 0, 1, 0], [], []>} : vector<8x8xbf16>, vector<8x8xbf16>, vector<8x8xf32> -> vector<8x8xf32>
    %28 = vector.broadcast %20 : vector<1x8xf32> to vector<8x8xf32>
    %29 = arith.addf %27, %28 : vector<8x8xf32>
    %cst_14 = arith.constant dense<0xFF800000> : vector<8xf32>
    %30 = vector.multi_reduction <maximumf>, %29, %cst_14 [1] : vector<8x8xf32> to vector<8xf32>
    %31 = vector.shape_cast %30 : vector<8xf32> to vector<8x1xf32>
    %32 = vector.broadcast %31 : vector<8x1xf32> to vector<8x8xf32>
    %33 = arith.subf %29, %32 : vector<8x8xf32>
    %34 = math.exp %33 : vector<8x8xf32>
    %cst_15 = arith.constant dense<0.000000e+00> : vector<8xf32>
    %35 = vector.multi_reduction <add>, %34, %cst_15 [1] : vector<8x8xf32> to vector<8xf32>
    %36 = vector.shape_cast %35 : vector<8xf32> to vector<8x1xf32>
    %37 = tpu.reciprocal %36 {approx = true} : vector<8x1xf32> -> vector<8x1xf32>
    %38 = vector.broadcast %37 : vector<8x1xf32> to vector<8x8xf32>
    %39 = arith.mulf %34, %38 : vector<8x8xf32>
    %40 = arith.truncf %39 : vector<8x8xf32> to vector<8x8xbf16>
    %cst_16 = arith.constant dense<0.000000e+00> : vector<8x8xf32>
    %41 = tpu.matmul %40, %26, %cst_16 {dimension_numbers = #tpu.dot_dimension_numbers<[1], [0], [0], [1], [0, 0, 1, 1], [], []>} : vector<8x8xbf16>, vector<8x8xbf16>, vector<8x8xf32> -> vector<8x8xf32>
    %42 = vector.extract_strided_slice %19 {offsets = [0, 8], sizes = [8, 8], strides = [1, 1]} : vector<8x96xf32> to vector<8x8xf32>
    %43 = arith.truncf %42 : vector<8x8xf32> to vector<8x8xbf16>
    %44 = vector.extract_strided_slice %19 {offsets = [0, 40], sizes = [8, 8], strides = [1, 1]} : vector<8x96xf32> to vector<8x8xf32>
    %45 = arith.truncf %44 : vector<8x8xf32> to vector<8x8xbf16>
    %46 = vector.extract_strided_slice %19 {offsets = [0, 72], sizes = [8, 8], strides = [1, 1]} : vector<8x96xf32> to vector<8x8xf32>
    %47 = arith.truncf %46 : vector<8x8xf32> to vector<8x8xbf16>
    %cst_17 = arith.constant dense<0.000000e+00> : vector<8x8xf32>
    %48 = tpu.matmul %43, %45, %cst_17 {dimension_numbers = #tpu.dot_dimension_numbers<[1], [1], [0], [0], [0, 0, 1, 0], [], []>} : vector<8x8xbf16>, vector<8x8xbf16>, vector<8x8xf32> -> vector<8x8xf32>
    %49 = vector.broadcast %20 : vector<1x8xf32> to vector<8x8xf32>
    %50 = arith.addf %48, %49 : vector<8x8xf32>
    %cst_18 = arith.constant dense<0xFF800000> : vector<8xf32>
    %51 = vector.multi_reduction <maximumf>, %50, %cst_18 [1] : vector<8x8xf32> to vector<8xf32>
    %52 = vector.shape_cast %51 : vector<8xf32> to vector<8x1xf32>
    %53 = vector.broadcast %52 : vector<8x1xf32> to vector<8x8xf32>
    %54 = arith.subf %50, %53 : vector<8x8xf32>
    %55 = math.exp %54 : vector<8x8xf32>
    %cst_19 = arith.constant dense<0.000000e+00> : vector<8xf32>
    %56 = vector.multi_reduction <add>, %55, %cst_19 [1] : vector<8x8xf32> to vector<8xf32>
    %57 = vector.shape_cast %56 : vector<8xf32> to vector<8x1xf32>
    %58 = tpu.reciprocal %57 {approx = true} : vector<8x1xf32> -> vector<8x1xf32>
    %59 = vector.broadcast %58 : vector<8x1xf32> to vector<8x8xf32>
    %60 = arith.mulf %55, %59 : vector<8x8xf32>
    %61 = arith.truncf %60 : vector<8x8xf32> to vector<8x8xbf16>
    %cst_20 = arith.constant dense<0.000000e+00> : vector<8x8xf32>
    %62 = tpu.matmul %61, %47, %cst_20 {dimension_numbers = #tpu.dot_dimension_numbers<[1], [0], [0], [1], [0, 0, 1, 1], [], []>} : vector<8x8xbf16>, vector<8x8xbf16>, vector<8x8xf32> -> vector<8x8xf32>
    %63 = vector.extract_strided_slice %19 {offsets = [0, 16], sizes = [8, 8], strides = [1, 1]} : vector<8x96xf32> to vector<8x8xf32>
    %64 = arith.truncf %63 : vector<8x8xf32> to vector<8x8xbf16>
    %65 = vector.extract_strided_slice %19 {offsets = [0, 48], sizes = [8, 8], strides = [1, 1]} : vector<8x96xf32> to vector<8x8xf32>
    %66 = arith.truncf %65 : vector<8x8xf32> to vector<8x8xbf16>
    %67 = vector.extract_strided_slice %19 {offsets = [0, 80], sizes = [8, 8], strides = [1, 1]} : vector<8x96xf32> to vector<8x8xf32>
    %68 = arith.truncf %67 : vector<8x8xf32> to vector<8x8xbf16>
    %cst_21 = arith.constant dense<0.000000e+00> : vector<8x8xf32>
    %69 = tpu.matmul %64, %66, %cst_21 {dimension_numbers = #tpu.dot_dimension_numbers<[1], [1], [0], [0], [0, 0, 1, 0], [], []>} : vector<8x8xbf16>, vector<8x8xbf16>, vector<8x8xf32> -> vector<8x8xf32>
    %70 = vector.broadcast %20 : vector<1x8xf32> to vector<8x8xf32>
    %71 = arith.addf %69, %70 : vector<8x8xf32>
    %cst_22 = arith.constant dense<0xFF800000> : vector<8xf32>
    %72 = vector.multi_reduction <maximumf>, %71, %cst_22 [1] : vector<8x8xf32> to vector<8xf32>
    %73 = vector.shape_cast %72 : vector<8xf32> to vector<8x1xf32>
    %74 = vector.broadcast %73 : vector<8x1xf32> to vector<8x8xf32>
    %75 = arith.subf %71, %74 : vector<8x8xf32>
    %76 = math.exp %75 : vector<8x8xf32>
    %cst_23 = arith.constant dense<0.000000e+00> : vector<8xf32>
    %77 = vector.multi_reduction <add>, %76, %cst_23 [1] : vector<8x8xf32> to vector<8xf32>
    %78 = vector.shape_cast %77 : vector<8xf32> to vector<8x1xf32>
    %79 = tpu.reciprocal %78 {approx = true} : vector<8x1xf32> -> vector<8x1xf32>
    %80 = vector.broadcast %79 : vector<8x1xf32> to vector<8x8xf32>
    %81 = arith.mulf %76, %80 : vector<8x8xf32>
    %82 = arith.truncf %81 : vector<8x8xf32> to vector<8x8xbf16>
    %cst_24 = arith.constant dense<0.000000e+00> : vector<8x8xf32>
    %83 = tpu.matmul %82, %68, %cst_24 {dimension_numbers = #tpu.dot_dimension_numbers<[1], [0], [0], [1], [0, 0, 1, 1], [], []>} : vector<8x8xbf16>, vector<8x8xbf16>, vector<8x8xf32> -> vector<8x8xf32>
    %84 = vector.extract_strided_slice %19 {offsets = [0, 24], sizes = [8, 8], strides = [1, 1]} : vector<8x96xf32> to vector<8x8xf32>
    %85 = arith.truncf %84 : vector<8x8xf32> to vector<8x8xbf16>
    %86 = vector.extract_strided_slice %19 {offsets = [0, 56], sizes = [8, 8], strides = [1, 1]} : vector<8x96xf32> to vector<8x8xf32>
    %87 = arith.truncf %86 : vector<8x8xf32> to vector<8x8xbf16>
    %88 = vector.extract_strided_slice %19 {offsets = [0, 88], sizes = [8, 8], strides = [1, 1]} : vector<8x96xf32> to vector<8x8xf32>
    %89 = arith.truncf %88 : vector<8x8xf32> to vector<8x8xbf16>
    %cst_25 = arith.constant dense<0.000000e+00> : vector<8x8xf32>
    %90 = tpu.matmul %85, %87, %cst_25 {dimension_numbers = #tpu.dot_dimension_numbers<[1], [1], [0], [0], [0, 0, 1, 0], [], []>} : vector<8x8xbf16>, vector<8x8xbf16>, vector<8x8xf32> -> vector<8x8xf32>
    %91 = vector.broadcast %20 : vector<1x8xf32> to vector<8x8xf32>
    %92 = arith.addf %90, %91 : vector<8x8xf32>
    %cst_26 = arith.constant dense<0xFF800000> : vector<8xf32>
    %93 = vector.multi_reduction <maximumf>, %92, %cst_26 [1] : vector<8x8xf32> to vector<8xf32>
    %94 = vector.shape_cast %93 : vector<8xf32> to vector<8x1xf32>
    %95 = vector.broadcast %94 : vector<8x1xf32> to vector<8x8xf32>
    %96 = arith.subf %92, %95 : vector<8x8xf32>
    %97 = math.exp %96 : vector<8x8xf32>
    %cst_27 = arith.constant dense<0.000000e+00> : vector<8xf32>
    %98 = vector.multi_reduction <add>, %97, %cst_27 [1] : vector<8x8xf32> to vector<8xf32>
    %99 = vector.shape_cast %98 : vector<8xf32> to vector<8x1xf32>
    %100 = tpu.reciprocal %99 {approx = true} : vector<8x1xf32> -> vector<8x1xf32>
    %101 = vector.broadcast %100 : vector<8x1xf32> to vector<8x8xf32>
    %102 = arith.mulf %97, %101 : vector<8x8xf32>
    %103 = arith.truncf %102 : vector<8x8xf32> to vector<8x8xbf16>
    %cst_28 = arith.constant dense<0.000000e+00> : vector<8x8xf32>
    %104 = tpu.matmul %103, %89, %cst_28 {dimension_numbers = #tpu.dot_dimension_numbers<[1], [0], [0], [1], [0, 0, 1, 1], [], []>} : vector<8x8xbf16>, vector<8x8xbf16>, vector<8x8xf32> -> vector<8x8xf32>
    %105 = tpu.concatenate %41, %62, %83, %104 in 1 : vector<8x8xf32>, vector<8x8xf32>, vector<8x8xf32>, vector<8x8xf32> -> vector<8x32xf32>
    %106 = vector.extract_strided_slice %12 {offsets = [8, 0], sizes = [8, 96], strides = [1, 1]} : vector<48x96xf32> to vector<8x96xf32>
    %107 = vector.extract_strided_slice %18 {offsets = [1, 0], sizes = [1, 8], strides = [1, 1]} : vector<6x8xf32> to vector<1x8xf32>
    %108 = vector.extract_strided_slice %106 {offsets = [0, 0], sizes = [8, 8], strides = [1, 1]} : vector<8x96xf32> to vector<8x8xf32>
    %109 = arith.truncf %108 : vector<8x8xf32> to vector<8x8xbf16>
    %110 = vector.extract_strided_slice %106 {offsets = [0, 32], sizes = [8, 8], strides = [1, 1]} : vector<8x96xf32> to vector<8x8xf32>
    %111 = arith.truncf %110 : vector<8x8xf32> to vector<8x8xbf16>
    %112 = vector.extract_strided_slice %106 {offsets = [0, 64], sizes = [8, 8], strides = [1, 1]} : vector<8x96xf32> to vector<8x8xf32>
    %113 = arith.truncf %112 : vector<8x8xf32> to vector<8x8xbf16>
    %cst_29 = arith.constant dense<0.000000e+00> : vector<8x8xf32>
    %114 = tpu.matmul %109, %111, %cst_29 {dimension_numbers = #tpu.dot_dimension_numbers<[1], [1], [0], [0], [0, 0, 1, 0], [], []>} : vector<8x8xbf16>, vector<8x8xbf16>, vector<8x8xf32> -> vector<8x8xf32>
    %115 = vector.broadcast %107 : vector<1x8xf32> to vector<8x8xf32>
    %116 = arith.addf %114, %115 : vector<8x8xf32>
    %cst_30 = arith.constant dense<0xFF800000> : vector<8xf32>
    %117 = vector.multi_reduction <maximumf>, %116, %cst_30 [1] : vector<8x8xf32> to vector<8xf32>
    %118 = vector.shape_cast %117 : vector<8xf32> to vector<8x1xf32>
    %119 = vector.broadcast %118 : vector<8x1xf32> to vector<8x8xf32>
    %120 = arith.subf %116, %119 : vector<8x8xf32>
    %121 = math.exp %120 : vector<8x8xf32>
    %cst_31 = arith.constant dense<0.000000e+00> : vector<8xf32>
    %122 = vector.multi_reduction <add>, %121, %cst_31 [1] : vector<8x8xf32> to vector<8xf32>
    %123 = vector.shape_cast %122 : vector<8xf32> to vector<8x1xf32>
    %124 = tpu.reciprocal %123 {approx = true} : vector<8x1xf32> -> vector<8x1xf32>
    %125 = vector.broadcast %124 : vector<8x1xf32> to vector<8x8xf32>
    %126 = arith.mulf %121, %125 : vector<8x8xf32>
    %127 = arith.truncf %126 : vector<8x8xf32> to vector<8x8xbf16>
    %cst_32 = arith.constant dense<0.000000e+00> : vector<8x8xf32>
    %128 = tpu.matmul %127, %113, %cst_32 {dimension_numbers = #tpu.dot_dimension_numbers<[1], [0], [0], [1], [0, 0, 1, 1], [], []>} : vector<8x8xbf16>, vector<8x8xbf16>, vector<8x8xf32> -> vector<8x8xf32>
    %129 = vector.extract_strided_slice %106 {offsets = [0, 8], sizes = [8, 8], strides = [1, 1]} : vector<8x96xf32> to vector<8x8xf32>
    %130 = arith.truncf %129 : vector<8x8xf32> to vector<8x8xbf16>
    %131 = vector.extract_strided_slice %106 {offsets = [0, 40], sizes = [8, 8], strides = [1, 1]} : vector<8x96xf32> to vector<8x8xf32>
    %132 = arith.truncf %131 : vector<8x8xf32> to vector<8x8xbf16>
    %133 = vector.extract_strided_slice %106 {offsets = [0, 72], sizes = [8, 8], strides = [1, 1]} : vector<8x96xf32> to vector<8x8xf32>
    %134 = arith.truncf %133 : vector<8x8xf32> to vector<8x8xbf16>
    %cst_33 = arith.constant dense<0.000000e+00> : vector<8x8xf32>
    %135 = tpu.matmul %130, %132, %cst_33 {dimension_numbers = #tpu.dot_dimension_numbers<[1], [1], [0], [0], [0, 0, 1, 0], [], []>} : vector<8x8xbf16>, vector<8x8xbf16>, vector<8x8xf32> -> vector<8x8xf32>
    %136 = vector.broadcast %107 : vector<1x8xf32> to vector<8x8xf32>
    %137 = arith.addf %135, %136 : vector<8x8xf32>
    %cst_34 = arith.constant dense<0xFF800000> : vector<8xf32>
    %138 = vector.multi_reduction <maximumf>, %137, %cst_34 [1] : vector<8x8xf32> to vector<8xf32>
    %139 = vector.shape_cast %138 : vector<8xf32> to vector<8x1xf32>
    %140 = vector.broadcast %139 : vector<8x1xf32> to vector<8x8xf32>
    %141 = arith.subf %137, %140 : vector<8x8xf32>
    %142 = math.exp %141 : vector<8x8xf32>
    %cst_35 = arith.constant dense<0.000000e+00> : vector<8xf32>
    %143 = vector.multi_reduction <add>, %142, %cst_35 [1] : vector<8x8xf32> to vector<8xf32>
    %144 = vector.shape_cast %143 : vector<8xf32> to vector<8x1xf32>
    %145 = tpu.reciprocal %144 {approx = true} : vector<8x1xf32> -> vector<8x1xf32>
    %146 = vector.broadcast %145 : vector<8x1xf32> to vector<8x8xf32>
    %147 = arith.mulf %142, %146 : vector<8x8xf32>
    %148 = arith.truncf %147 : vector<8x8xf32> to vector<8x8xbf16>
    %cst_36 = arith.constant dense<0.000000e+00> : vector<8x8xf32>
    %149 = tpu.matmul %148, %134, %cst_36 {dimension_numbers = #tpu.dot_dimension_numbers<[1], [0], [0], [1], [0, 0, 1, 1], [], []>} : vector<8x8xbf16>, vector<8x8xbf16>, vector<8x8xf32> -> vector<8x8xf32>
    %150 = vector.extract_strided_slice %106 {offsets = [0, 16], sizes = [8, 8], strides = [1, 1]} : vector<8x96xf32> to vector<8x8xf32>
    %151 = arith.truncf %150 : vector<8x8xf32> to vector<8x8xbf16>
    %152 = vector.extract_strided_slice %106 {offsets = [0, 48], sizes = [8, 8], strides = [1, 1]} : vector<8x96xf32> to vector<8x8xf32>
    %153 = arith.truncf %152 : vector<8x8xf32> to vector<8x8xbf16>
    %154 = vector.extract_strided_slice %106 {offsets = [0, 80], sizes = [8, 8], strides = [1, 1]} : vector<8x96xf32> to vector<8x8xf32>
    %155 = arith.truncf %154 : vector<8x8xf32> to vector<8x8xbf16>
    %cst_37 = arith.constant dense<0.000000e+00> : vector<8x8xf32>
    %156 = tpu.matmul %151, %153, %cst_37 {dimension_numbers = #tpu.dot_dimension_numbers<[1], [1], [0], [0], [0, 0, 1, 0], [], []>} : vector<8x8xbf16>, vector<8x8xbf16>, vector<8x8xf32> -> vector<8x8xf32>
    %157 = vector.broadcast %107 : vector<1x8xf32> to vector<8x8xf32>
    %158 = arith.addf %156, %157 : vector<8x8xf32>
    %cst_38 = arith.constant dense<0xFF800000> : vector<8xf32>
    %159 = vector.multi_reduction <maximumf>, %158, %cst_38 [1] : vector<8x8xf32> to vector<8xf32>
    %160 = vector.shape_cast %159 : vector<8xf32> to vector<8x1xf32>
    %161 = vector.broadcast %160 : vector<8x1xf32> to vector<8x8xf32>
    %162 = arith.subf %158, %161 : vector<8x8xf32>
    %163 = math.exp %162 : vector<8x8xf32>
    %cst_39 = arith.constant dense<0.000000e+00> : vector<8xf32>
    %164 = vector.multi_reduction <add>, %163, %cst_39 [1] : vector<8x8xf32> to vector<8xf32>
    %165 = vector.shape_cast %164 : vector<8xf32> to vector<8x1xf32>
    %166 = tpu.reciprocal %165 {approx = true} : vector<8x1xf32> -> vector<8x1xf32>
    %167 = vector.broadcast %166 : vector<8x1xf32> to vector<8x8xf32>
    %168 = arith.mulf %163, %167 : vector<8x8xf32>
    %169 = arith.truncf %168 : vector<8x8xf32> to vector<8x8xbf16>
    %cst_40 = arith.constant dense<0.000000e+00> : vector<8x8xf32>
    %170 = tpu.matmul %169, %155, %cst_40 {dimension_numbers = #tpu.dot_dimension_numbers<[1], [0], [0], [1], [0, 0, 1, 1], [], []>} : vector<8x8xbf16>, vector<8x8xbf16>, vector<8x8xf32> -> vector<8x8xf32>
    %171 = vector.extract_strided_slice %106 {offsets = [0, 24], sizes = [8, 8], strides = [1, 1]} : vector<8x96xf32> to vector<8x8xf32>
    %172 = arith.truncf %171 : vector<8x8xf32> to vector<8x8xbf16>
    %173 = vector.extract_strided_slice %106 {offsets = [0, 56], sizes = [8, 8], strides = [1, 1]} : vector<8x96xf32> to vector<8x8xf32>
    %174 = arith.truncf %173 : vector<8x8xf32> to vector<8x8xbf16>
    %175 = vector.extract_strided_slice %106 {offsets = [0, 88], sizes = [8, 8], strides = [1, 1]} : vector<8x96xf32> to vector<8x8xf32>
    %176 = arith.truncf %175 : vector<8x8xf32> to vector<8x8xbf16>
    %cst_41 = arith.constant dense<0.000000e+00> : vector<8x8xf32>
    %177 = tpu.matmul %172, %174, %cst_41 {dimension_numbers = #tpu.dot_dimension_numbers<[1], [1], [0], [0], [0, 0, 1, 0], [], []>} : vector<8x8xbf16>, vector<8x8xbf16>, vector<8x8xf32> -> vector<8x8xf32>
    %178 = vector.broadcast %107 : vector<1x8xf32> to vector<8x8xf32>
    %179 = arith.addf %177, %178 : vector<8x8xf32>
    %cst_42 = arith.constant dense<0xFF800000> : vector<8xf32>
    %180 = vector.multi_reduction <maximumf>, %179, %cst_42 [1] : vector<8x8xf32> to vector<8xf32>
    %181 = vector.shape_cast %180 : vector<8xf32> to vector<8x1xf32>
    %182 = vector.broadcast %181 : vector<8x1xf32> to vector<8x8xf32>
    %183 = arith.subf %179, %182 : vector<8x8xf32>
    %184 = math.exp %183 : vector<8x8xf32>
    %cst_43 = arith.constant dense<0.000000e+00> : vector<8xf32>
    %185 = vector.multi_reduction <add>, %184, %cst_43 [1] : vector<8x8xf32> to vector<8xf32>
    %186 = vector.shape_cast %185 : vector<8xf32> to vector<8x1xf32>
    %187 = tpu.reciprocal %186 {approx = true} : vector<8x1xf32> -> vector<8x1xf32>
    %188 = vector.broadcast %187 : vector<8x1xf32> to vector<8x8xf32>
    %189 = arith.mulf %184, %188 : vector<8x8xf32>
    %190 = arith.truncf %189 : vector<8x8xf32> to vector<8x8xbf16>
    %cst_44 = arith.constant dense<0.000000e+00> : vector<8x8xf32>
    %191 = tpu.matmul %190, %176, %cst_44 {dimension_numbers = #tpu.dot_dimension_numbers<[1], [0], [0], [1], [0, 0, 1, 1], [], []>} : vector<8x8xbf16>, vector<8x8xbf16>, vector<8x8xf32> -> vector<8x8xf32>
    %192 = tpu.concatenate %128, %149, %170, %191 in 1 : vector<8x8xf32>, vector<8x8xf32>, vector<8x8xf32>, vector<8x8xf32> -> vector<8x32xf32>
    %193 = vector.extract_strided_slice %12 {offsets = [16, 0], sizes = [8, 96], strides = [1, 1]} : vector<48x96xf32> to vector<8x96xf32>
    %194 = vector.extract_strided_slice %18 {offsets = [2, 0], sizes = [1, 8], strides = [1, 1]} : vector<6x8xf32> to vector<1x8xf32>
    %195 = vector.extract_strided_slice %193 {offsets = [0, 0], sizes = [8, 8], strides = [1, 1]} : vector<8x96xf32> to vector<8x8xf32>
    %196 = arith.truncf %195 : vector<8x8xf32> to vector<8x8xbf16>
    %197 = vector.extract_strided_slice %193 {offsets = [0, 32], sizes = [8, 8], strides = [1, 1]} : vector<8x96xf32> to vector<8x8xf32>
    %198 = arith.truncf %197 : vector<8x8xf32> to vector<8x8xbf16>
    %199 = vector.extract_strided_slice %193 {offsets = [0, 64], sizes = [8, 8], strides = [1, 1]} : vector<8x96xf32> to vector<8x8xf32>
    %200 = arith.truncf %199 : vector<8x8xf32> to vector<8x8xbf16>
    %cst_45 = arith.constant dense<0.000000e+00> : vector<8x8xf32>
    %201 = tpu.matmul %196, %198, %cst_45 {dimension_numbers = #tpu.dot_dimension_numbers<[1], [1], [0], [0], [0, 0, 1, 0], [], []>} : vector<8x8xbf16>, vector<8x8xbf16>, vector<8x8xf32> -> vector<8x8xf32>
    %202 = vector.broadcast %194 : vector<1x8xf32> to vector<8x8xf32>
    %203 = arith.addf %201, %202 : vector<8x8xf32>
    %cst_46 = arith.constant dense<0xFF800000> : vector<8xf32>
    %204 = vector.multi_reduction <maximumf>, %203, %cst_46 [1] : vector<8x8xf32> to vector<8xf32>
    %205 = vector.shape_cast %204 : vector<8xf32> to vector<8x1xf32>
    %206 = vector.broadcast %205 : vector<8x1xf32> to vector<8x8xf32>
    %207 = arith.subf %203, %206 : vector<8x8xf32>
    %208 = math.exp %207 : vector<8x8xf32>
    %cst_47 = arith.constant dense<0.000000e+00> : vector<8xf32>
    %209 = vector.multi_reduction <add>, %208, %cst_47 [1] : vector<8x8xf32> to vector<8xf32>
    %210 = vector.shape_cast %209 : vector<8xf32> to vector<8x1xf32>
    %211 = tpu.reciprocal %210 {approx = true} : vector<8x1xf32> -> vector<8x1xf32>
    %212 = vector.broadcast %211 : vector<8x1xf32> to vector<8x8xf32>
    %213 = arith.mulf %208, %212 : vector<8x8xf32>
    %214 = arith.truncf %213 : vector<8x8xf32> to vector<8x8xbf16>
    %cst_48 = arith.constant dense<0.000000e+00> : vector<8x8xf32>
    %215 = tpu.matmul %214, %200, %cst_48 {dimension_numbers = #tpu.dot_dimension_numbers<[1], [0], [0], [1], [0, 0, 1, 1], [], []>} : vector<8x8xbf16>, vector<8x8xbf16>, vector<8x8xf32> -> vector<8x8xf32>
    %216 = vector.extract_strided_slice %193 {offsets = [0, 8], sizes = [8, 8], strides = [1, 1]} : vector<8x96xf32> to vector<8x8xf32>
    %217 = arith.truncf %216 : vector<8x8xf32> to vector<8x8xbf16>
    %218 = vector.extract_strided_slice %193 {offsets = [0, 40], sizes = [8, 8], strides = [1, 1]} : vector<8x96xf32> to vector<8x8xf32>
    %219 = arith.truncf %218 : vector<8x8xf32> to vector<8x8xbf16>
    %220 = vector.extract_strided_slice %193 {offsets = [0, 72], sizes = [8, 8], strides = [1, 1]} : vector<8x96xf32> to vector<8x8xf32>
    %221 = arith.truncf %220 : vector<8x8xf32> to vector<8x8xbf16>
    %cst_49 = arith.constant dense<0.000000e+00> : vector<8x8xf32>
    %222 = tpu.matmul %217, %219, %cst_49 {dimension_numbers = #tpu.dot_dimension_numbers<[1], [1], [0], [0], [0, 0, 1, 0], [], []>} : vector<8x8xbf16>, vector<8x8xbf16>, vector<8x8xf32> -> vector<8x8xf32>
    %223 = vector.broadcast %194 : vector<1x8xf32> to vector<8x8xf32>
    %224 = arith.addf %222, %223 : vector<8x8xf32>
    %cst_50 = arith.constant dense<0xFF800000> : vector<8xf32>
    %225 = vector.multi_reduction <maximumf>, %224, %cst_50 [1] : vector<8x8xf32> to vector<8xf32>
    %226 = vector.shape_cast %225 : vector<8xf32> to vector<8x1xf32>
    %227 = vector.broadcast %226 : vector<8x1xf32> to vector<8x8xf32>
    %228 = arith.subf %224, %227 : vector<8x8xf32>
    %229 = math.exp %228 : vector<8x8xf32>
    %cst_51 = arith.constant dense<0.000000e+00> : vector<8xf32>
    %230 = vector.multi_reduction <add>, %229, %cst_51 [1] : vector<8x8xf32> to vector<8xf32>
    %231 = vector.shape_cast %230 : vector<8xf32> to vector<8x1xf32>
    %232 = tpu.reciprocal %231 {approx = true} : vector<8x1xf32> -> vector<8x1xf32>
    %233 = vector.broadcast %232 : vector<8x1xf32> to vector<8x8xf32>
    %234 = arith.mulf %229, %233 : vector<8x8xf32>
    %235 = arith.truncf %234 : vector<8x8xf32> to vector<8x8xbf16>
    %cst_52 = arith.constant dense<0.000000e+00> : vector<8x8xf32>
    %236 = tpu.matmul %235, %221, %cst_52 {dimension_numbers = #tpu.dot_dimension_numbers<[1], [0], [0], [1], [0, 0, 1, 1], [], []>} : vector<8x8xbf16>, vector<8x8xbf16>, vector<8x8xf32> -> vector<8x8xf32>
    %237 = vector.extract_strided_slice %193 {offsets = [0, 16], sizes = [8, 8], strides = [1, 1]} : vector<8x96xf32> to vector<8x8xf32>
    %238 = arith.truncf %237 : vector<8x8xf32> to vector<8x8xbf16>
    %239 = vector.extract_strided_slice %193 {offsets = [0, 48], sizes = [8, 8], strides = [1, 1]} : vector<8x96xf32> to vector<8x8xf32>
    %240 = arith.truncf %239 : vector<8x8xf32> to vector<8x8xbf16>
    %241 = vector.extract_strided_slice %193 {offsets = [0, 80], sizes = [8, 8], strides = [1, 1]} : vector<8x96xf32> to vector<8x8xf32>
    %242 = arith.truncf %241 : vector<8x8xf32> to vector<8x8xbf16>
    %cst_53 = arith.constant dense<0.000000e+00> : vector<8x8xf32>
    %243 = tpu.matmul %238, %240, %cst_53 {dimension_numbers = #tpu.dot_dimension_numbers<[1], [1], [0], [0], [0, 0, 1, 0], [], []>} : vector<8x8xbf16>, vector<8x8xbf16>, vector<8x8xf32> -> vector<8x8xf32>
    %244 = vector.broadcast %194 : vector<1x8xf32> to vector<8x8xf32>
    %245 = arith.addf %243, %244 : vector<8x8xf32>
    %cst_54 = arith.constant dense<0xFF800000> : vector<8xf32>
    %246 = vector.multi_reduction <maximumf>, %245, %cst_54 [1] : vector<8x8xf32> to vector<8xf32>
    %247 = vector.shape_cast %246 : vector<8xf32> to vector<8x1xf32>
    %248 = vector.broadcast %247 : vector<8x1xf32> to vector<8x8xf32>
    %249 = arith.subf %245, %248 : vector<8x8xf32>
    %250 = math.exp %249 : vector<8x8xf32>
    %cst_55 = arith.constant dense<0.000000e+00> : vector<8xf32>
    %251 = vector.multi_reduction <add>, %250, %cst_55 [1] : vector<8x8xf32> to vector<8xf32>
    %252 = vector.shape_cast %251 : vector<8xf32> to vector<8x1xf32>
    %253 = tpu.reciprocal %252 {approx = true} : vector<8x1xf32> -> vector<8x1xf32>
    %254 = vector.broadcast %253 : vector<8x1xf32> to vector<8x8xf32>
    %255 = arith.mulf %250, %254 : vector<8x8xf32>
    %256 = arith.truncf %255 : vector<8x8xf32> to vector<8x8xbf16>
    %cst_56 = arith.constant dense<0.000000e+00> : vector<8x8xf32>
    %257 = tpu.matmul %256, %242, %cst_56 {dimension_numbers = #tpu.dot_dimension_numbers<[1], [0], [0], [1], [0, 0, 1, 1], [], []>} : vector<8x8xbf16>, vector<8x8xbf16>, vector<8x8xf32> -> vector<8x8xf32>
    %258 = vector.extract_strided_slice %193 {offsets = [0, 24], sizes = [8, 8], strides = [1, 1]} : vector<8x96xf32> to vector<8x8xf32>
    %259 = arith.truncf %258 : vector<8x8xf32> to vector<8x8xbf16>
    %260 = vector.extract_strided_slice %193 {offsets = [0, 56], sizes = [8, 8], strides = [1, 1]} : vector<8x96xf32> to vector<8x8xf32>
    %261 = arith.truncf %260 : vector<8x8xf32> to vector<8x8xbf16>
    %262 = vector.extract_strided_slice %193 {offsets = [0, 88], sizes = [8, 8], strides = [1, 1]} : vector<8x96xf32> to vector<8x8xf32>
    %263 = arith.truncf %262 : vector<8x8xf32> to vector<8x8xbf16>
    %cst_57 = arith.constant dense<0.000000e+00> : vector<8x8xf32>
    %264 = tpu.matmul %259, %261, %cst_57 {dimension_numbers = #tpu.dot_dimension_numbers<[1], [1], [0], [0], [0, 0, 1, 0], [], []>} : vector<8x8xbf16>, vector<8x8xbf16>, vector<8x8xf32> -> vector<8x8xf32>
    %265 = vector.broadcast %194 : vector<1x8xf32> to vector<8x8xf32>
    %266 = arith.addf %264, %265 : vector<8x8xf32>
    %cst_58 = arith.constant dense<0xFF800000> : vector<8xf32>
    %267 = vector.multi_reduction <maximumf>, %266, %cst_58 [1] : vector<8x8xf32> to vector<8xf32>
    %268 = vector.shape_cast %267 : vector<8xf32> to vector<8x1xf32>
    %269 = vector.broadcast %268 : vector<8x1xf32> to vector<8x8xf32>
    %270 = arith.subf %266, %269 : vector<8x8xf32>
    %271 = math.exp %270 : vector<8x8xf32>
    %cst_59 = arith.constant dense<0.000000e+00> : vector<8xf32>
    %272 = vector.multi_reduction <add>, %271, %cst_59 [1] : vector<8x8xf32> to vector<8xf32>
    %273 = vector.shape_cast %272 : vector<8xf32> to vector<8x1xf32>
    %274 = tpu.reciprocal %273 {approx = true} : vector<8x1xf32> -> vector<8x1xf32>
    %275 = vector.broadcast %274 : vector<8x1xf32> to vector<8x8xf32>
    %276 = arith.mulf %271, %275 : vector<8x8xf32>
    %277 = arith.truncf %276 : vector<8x8xf32> to vector<8x8xbf16>
    %cst_60 = arith.constant dense<0.000000e+00> : vector<8x8xf32>
    %278 = tpu.matmul %277, %263, %cst_60 {dimension_numbers = #tpu.dot_dimension_numbers<[1], [0], [0], [1], [0, 0, 1, 1], [], []>} : vector<8x8xbf16>, vector<8x8xbf16>, vector<8x8xf32> -> vector<8x8xf32>
    %279 = tpu.concatenate %215, %236, %257, %278 in 1 : vector<8x8xf32>, vector<8x8xf32>, vector<8x8xf32>, vector<8x8xf32> -> vector<8x32xf32>
    %280 = vector.extract_strided_slice %12 {offsets = [24, 0], sizes = [8, 96], strides = [1, 1]} : vector<48x96xf32> to vector<8x96xf32>
    %281 = vector.extract_strided_slice %18 {offsets = [3, 0], sizes = [1, 8], strides = [1, 1]} : vector<6x8xf32> to vector<1x8xf32>
    %282 = vector.extract_strided_slice %280 {offsets = [0, 0], sizes = [8, 8], strides = [1, 1]} : vector<8x96xf32> to vector<8x8xf32>
    %283 = arith.truncf %282 : vector<8x8xf32> to vector<8x8xbf16>
    %284 = vector.extract_strided_slice %280 {offsets = [0, 32], sizes = [8, 8], strides = [1, 1]} : vector<8x96xf32> to vector<8x8xf32>
    %285 = arith.truncf %284 : vector<8x8xf32> to vector<8x8xbf16>
    %286 = vector.extract_strided_slice %280 {offsets = [0, 64], sizes = [8, 8], strides = [1, 1]} : vector<8x96xf32> to vector<8x8xf32>
    %287 = arith.truncf %286 : vector<8x8xf32> to vector<8x8xbf16>
    %cst_61 = arith.constant dense<0.000000e+00> : vector<8x8xf32>
    %288 = tpu.matmul %283, %285, %cst_61 {dimension_numbers = #tpu.dot_dimension_numbers<[1], [1], [0], [0], [0, 0, 1, 0], [], []>} : vector<8x8xbf16>, vector<8x8xbf16>, vector<8x8xf32> -> vector<8x8xf32>
    %289 = vector.broadcast %281 : vector<1x8xf32> to vector<8x8xf32>
    %290 = arith.addf %288, %289 : vector<8x8xf32>
    %cst_62 = arith.constant dense<0xFF800000> : vector<8xf32>
    %291 = vector.multi_reduction <maximumf>, %290, %cst_62 [1] : vector<8x8xf32> to vector<8xf32>
    %292 = vector.shape_cast %291 : vector<8xf32> to vector<8x1xf32>
    %293 = vector.broadcast %292 : vector<8x1xf32> to vector<8x8xf32>
    %294 = arith.subf %290, %293 : vector<8x8xf32>
    %295 = math.exp %294 : vector<8x8xf32>
    %cst_63 = arith.constant dense<0.000000e+00> : vector<8xf32>
    %296 = vector.multi_reduction <add>, %295, %cst_63 [1] : vector<8x8xf32> to vector<8xf32>
    %297 = vector.shape_cast %296 : vector<8xf32> to vector<8x1xf32>
    %298 = tpu.reciprocal %297 {approx = true} : vector<8x1xf32> -> vector<8x1xf32>
    %299 = vector.broadcast %298 : vector<8x1xf32> to vector<8x8xf32>
    %300 = arith.mulf %295, %299 : vector<8x8xf32>
    %301 = arith.truncf %300 : vector<8x8xf32> to vector<8x8xbf16>
    %cst_64 = arith.constant dense<0.000000e+00> : vector<8x8xf32>
    %302 = tpu.matmul %301, %287, %cst_64 {dimension_numbers = #tpu.dot_dimension_numbers<[1], [0], [0], [1], [0, 0, 1, 1], [], []>} : vector<8x8xbf16>, vector<8x8xbf16>, vector<8x8xf32> -> vector<8x8xf32>
    %303 = vector.extract_strided_slice %280 {offsets = [0, 8], sizes = [8, 8], strides = [1, 1]} : vector<8x96xf32> to vector<8x8xf32>
    %304 = arith.truncf %303 : vector<8x8xf32> to vector<8x8xbf16>
    %305 = vector.extract_strided_slice %280 {offsets = [0, 40], sizes = [8, 8], strides = [1, 1]} : vector<8x96xf32> to vector<8x8xf32>
    %306 = arith.truncf %305 : vector<8x8xf32> to vector<8x8xbf16>
    %307 = vector.extract_strided_slice %280 {offsets = [0, 72], sizes = [8, 8], strides = [1, 1]} : vector<8x96xf32> to vector<8x8xf32>
    %308 = arith.truncf %307 : vector<8x8xf32> to vector<8x8xbf16>
    %cst_65 = arith.constant dense<0.000000e+00> : vector<8x8xf32>
    %309 = tpu.matmul %304, %306, %cst_65 {dimension_numbers = #tpu.dot_dimension_numbers<[1], [1], [0], [0], [0, 0, 1, 0], [], []>} : vector<8x8xbf16>, vector<8x8xbf16>, vector<8x8xf32> -> vector<8x8xf32>
    %310 = vector.broadcast %281 : vector<1x8xf32> to vector<8x8xf32>
    %311 = arith.addf %309, %310 : vector<8x8xf32>
    %cst_66 = arith.constant dense<0xFF800000> : vector<8xf32>
    %312 = vector.multi_reduction <maximumf>, %311, %cst_66 [1] : vector<8x8xf32> to vector<8xf32>
    %313 = vector.shape_cast %312 : vector<8xf32> to vector<8x1xf32>
    %314 = vector.broadcast %313 : vector<8x1xf32> to vector<8x8xf32>
    %315 = arith.subf %311, %314 : vector<8x8xf32>
    %316 = math.exp %315 : vector<8x8xf32>
    %cst_67 = arith.constant dense<0.000000e+00> : vector<8xf32>
    %317 = vector.multi_reduction <add>, %316, %cst_67 [1] : vector<8x8xf32> to vector<8xf32>
    %318 = vector.shape_cast %317 : vector<8xf32> to vector<8x1xf32>
    %319 = tpu.reciprocal %318 {approx = true} : vector<8x1xf32> -> vector<8x1xf32>
    %320 = vector.broadcast %319 : vector<8x1xf32> to vector<8x8xf32>
    %321 = arith.mulf %316, %320 : vector<8x8xf32>
    %322 = arith.truncf %321 : vector<8x8xf32> to vector<8x8xbf16>
    %cst_68 = arith.constant dense<0.000000e+00> : vector<8x8xf32>
    %323 = tpu.matmul %322, %308, %cst_68 {dimension_numbers = #tpu.dot_dimension_numbers<[1], [0], [0], [1], [0, 0, 1, 1], [], []>} : vector<8x8xbf16>, vector<8x8xbf16>, vector<8x8xf32> -> vector<8x8xf32>
    %324 = vector.extract_strided_slice %280 {offsets = [0, 16], sizes = [8, 8], strides = [1, 1]} : vector<8x96xf32> to vector<8x8xf32>
    %325 = arith.truncf %324 : vector<8x8xf32> to vector<8x8xbf16>
    %326 = vector.extract_strided_slice %280 {offsets = [0, 48], sizes = [8, 8], strides = [1, 1]} : vector<8x96xf32> to vector<8x8xf32>
    %327 = arith.truncf %326 : vector<8x8xf32> to vector<8x8xbf16>
    %328 = vector.extract_strided_slice %280 {offsets = [0, 80], sizes = [8, 8], strides = [1, 1]} : vector<8x96xf32> to vector<8x8xf32>
    %329 = arith.truncf %328 : vector<8x8xf32> to vector<8x8xbf16>
    %cst_69 = arith.constant dense<0.000000e+00> : vector<8x8xf32>
    %330 = tpu.matmul %325, %327, %cst_69 {dimension_numbers = #tpu.dot_dimension_numbers<[1], [1], [0], [0], [0, 0, 1, 0], [], []>} : vector<8x8xbf16>, vector<8x8xbf16>, vector<8x8xf32> -> vector<8x8xf32>
    %331 = vector.broadcast %281 : vector<1x8xf32> to vector<8x8xf32>
    %332 = arith.addf %330, %331 : vector<8x8xf32>
    %cst_70 = arith.constant dense<0xFF800000> : vector<8xf32>
    %333 = vector.multi_reduction <maximumf>, %332, %cst_70 [1] : vector<8x8xf32> to vector<8xf32>
    %334 = vector.shape_cast %333 : vector<8xf32> to vector<8x1xf32>
    %335 = vector.broadcast %334 : vector<8x1xf32> to vector<8x8xf32>
    %336 = arith.subf %332, %335 : vector<8x8xf32>
    %337 = math.exp %336 : vector<8x8xf32>
    %cst_71 = arith.constant dense<0.000000e+00> : vector<8xf32>
    %338 = vector.multi_reduction <add>, %337, %cst_71 [1] : vector<8x8xf32> to vector<8xf32>
    %339 = vector.shape_cast %338 : vector<8xf32> to vector<8x1xf32>
    %340 = tpu.reciprocal %339 {approx = true} : vector<8x1xf32> -> vector<8x1xf32>
    %341 = vector.broadcast %340 : vector<8x1xf32> to vector<8x8xf32>
    %342 = arith.mulf %337, %341 : vector<8x8xf32>
    %343 = arith.truncf %342 : vector<8x8xf32> to vector<8x8xbf16>
    %cst_72 = arith.constant dense<0.000000e+00> : vector<8x8xf32>
    %344 = tpu.matmul %343, %329, %cst_72 {dimension_numbers = #tpu.dot_dimension_numbers<[1], [0], [0], [1], [0, 0, 1, 1], [], []>} : vector<8x8xbf16>, vector<8x8xbf16>, vector<8x8xf32> -> vector<8x8xf32>
    %345 = vector.extract_strided_slice %280 {offsets = [0, 24], sizes = [8, 8], strides = [1, 1]} : vector<8x96xf32> to vector<8x8xf32>
    %346 = arith.truncf %345 : vector<8x8xf32> to vector<8x8xbf16>
    %347 = vector.extract_strided_slice %280 {offsets = [0, 56], sizes = [8, 8], strides = [1, 1]} : vector<8x96xf32> to vector<8x8xf32>
    %348 = arith.truncf %347 : vector<8x8xf32> to vector<8x8xbf16>
    %349 = vector.extract_strided_slice %280 {offsets = [0, 88], sizes = [8, 8], strides = [1, 1]} : vector<8x96xf32> to vector<8x8xf32>
    %350 = arith.truncf %349 : vector<8x8xf32> to vector<8x8xbf16>
    %cst_73 = arith.constant dense<0.000000e+00> : vector<8x8xf32>
    %351 = tpu.matmul %346, %348, %cst_73 {dimension_numbers = #tpu.dot_dimension_numbers<[1], [1], [0], [0], [0, 0, 1, 0], [], []>} : vector<8x8xbf16>, vector<8x8xbf16>, vector<8x8xf32> -> vector<8x8xf32>
    %352 = vector.broadcast %281 : vector<1x8xf32> to vector<8x8xf32>
    %353 = arith.addf %351, %352 : vector<8x8xf32>
    %cst_74 = arith.constant dense<0xFF800000> : vector<8xf32>
    %354 = vector.multi_reduction <maximumf>, %353, %cst_74 [1] : vector<8x8xf32> to vector<8xf32>
    %355 = vector.shape_cast %354 : vector<8xf32> to vector<8x1xf32>
    %356 = vector.broadcast %355 : vector<8x1xf32> to vector<8x8xf32>
    %357 = arith.subf %353, %356 : vector<8x8xf32>
    %358 = math.exp %357 : vector<8x8xf32>
    %cst_75 = arith.constant dense<0.000000e+00> : vector<8xf32>
    %359 = vector.multi_reduction <add>, %358, %cst_75 [1] : vector<8x8xf32> to vector<8xf32>
    %360 = vector.shape_cast %359 : vector<8xf32> to vector<8x1xf32>
    %361 = tpu.reciprocal %360 {approx = true} : vector<8x1xf32> -> vector<8x1xf32>
    %362 = vector.broadcast %361 : vector<8x1xf32> to vector<8x8xf32>
    %363 = arith.mulf %358, %362 : vector<8x8xf32>
    %364 = arith.truncf %363 : vector<8x8xf32> to vector<8x8xbf16>
    %cst_76 = arith.constant dense<0.000000e+00> : vector<8x8xf32>
    %365 = tpu.matmul %364, %350, %cst_76 {dimension_numbers = #tpu.dot_dimension_numbers<[1], [0], [0], [1], [0, 0, 1, 1], [], []>} : vector<8x8xbf16>, vector<8x8xbf16>, vector<8x8xf32> -> vector<8x8xf32>
    %366 = tpu.concatenate %302, %323, %344, %365 in 1 : vector<8x8xf32>, vector<8x8xf32>, vector<8x8xf32>, vector<8x8xf32> -> vector<8x32xf32>
    %367 = vector.extract_strided_slice %12 {offsets = [32, 0], sizes = [8, 96], strides = [1, 1]} : vector<48x96xf32> to vector<8x96xf32>
    %368 = vector.extract_strided_slice %18 {offsets = [4, 0], sizes = [1, 8], strides = [1, 1]} : vector<6x8xf32> to vector<1x8xf32>
    %369 = vector.extract_strided_slice %367 {offsets = [0, 0], sizes = [8, 8], strides = [1, 1]} : vector<8x96xf32> to vector<8x8xf32>
    %370 = arith.truncf %369 : vector<8x8xf32> to vector<8x8xbf16>
    %371 = vector.extract_strided_slice %367 {offsets = [0, 32], sizes = [8, 8], strides = [1, 1]} : vector<8x96xf32> to vector<8x8xf32>
    %372 = arith.truncf %371 : vector<8x8xf32> to vector<8x8xbf16>
    %373 = vector.extract_strided_slice %367 {offsets = [0, 64], sizes = [8, 8], strides = [1, 1]} : vector<8x96xf32> to vector<8x8xf32>
    %374 = arith.truncf %373 : vector<8x8xf32> to vector<8x8xbf16>
    %cst_77 = arith.constant dense<0.000000e+00> : vector<8x8xf32>
    %375 = tpu.matmul %370, %372, %cst_77 {dimension_numbers = #tpu.dot_dimension_numbers<[1], [1], [0], [0], [0, 0, 1, 0], [], []>} : vector<8x8xbf16>, vector<8x8xbf16>, vector<8x8xf32> -> vector<8x8xf32>
    %376 = vector.broadcast %368 : vector<1x8xf32> to vector<8x8xf32>
    %377 = arith.addf %375, %376 : vector<8x8xf32>
    %cst_78 = arith.constant dense<0xFF800000> : vector<8xf32>
    %378 = vector.multi_reduction <maximumf>, %377, %cst_78 [1] : vector<8x8xf32> to vector<8xf32>
    %379 = vector.shape_cast %378 : vector<8xf32> to vector<8x1xf32>
    %380 = vector.broadcast %379 : vector<8x1xf32> to vector<8x8xf32>
    %381 = arith.subf %377, %380 : vector<8x8xf32>
    %382 = math.exp %381 : vector<8x8xf32>
    %cst_79 = arith.constant dense<0.000000e+00> : vector<8xf32>
    %383 = vector.multi_reduction <add>, %382, %cst_79 [1] : vector<8x8xf32> to vector<8xf32>
    %384 = vector.shape_cast %383 : vector<8xf32> to vector<8x1xf32>
    %385 = tpu.reciprocal %384 {approx = true} : vector<8x1xf32> -> vector<8x1xf32>
    %386 = vector.broadcast %385 : vector<8x1xf32> to vector<8x8xf32>
    %387 = arith.mulf %382, %386 : vector<8x8xf32>
    %388 = arith.truncf %387 : vector<8x8xf32> to vector<8x8xbf16>
    %cst_80 = arith.constant dense<0.000000e+00> : vector<8x8xf32>
    %389 = tpu.matmul %388, %374, %cst_80 {dimension_numbers = #tpu.dot_dimension_numbers<[1], [0], [0], [1], [0, 0, 1, 1], [], []>} : vector<8x8xbf16>, vector<8x8xbf16>, vector<8x8xf32> -> vector<8x8xf32>
    %390 = vector.extract_strided_slice %367 {offsets = [0, 8], sizes = [8, 8], strides = [1, 1]} : vector<8x96xf32> to vector<8x8xf32>
    %391 = arith.truncf %390 : vector<8x8xf32> to vector<8x8xbf16>
    %392 = vector.extract_strided_slice %367 {offsets = [0, 40], sizes = [8, 8], strides = [1, 1]} : vector<8x96xf32> to vector<8x8xf32>
    %393 = arith.truncf %392 : vector<8x8xf32> to vector<8x8xbf16>
    %394 = vector.extract_strided_slice %367 {offsets = [0, 72], sizes = [8, 8], strides = [1, 1]} : vector<8x96xf32> to vector<8x8xf32>
    %395 = arith.truncf %394 : vector<8x8xf32> to vector<8x8xbf16>
    %cst_81 = arith.constant dense<0.000000e+00> : vector<8x8xf32>
    %396 = tpu.matmul %391, %393, %cst_81 {dimension_numbers = #tpu.dot_dimension_numbers<[1], [1], [0], [0], [0, 0, 1, 0], [], []>} : vector<8x8xbf16>, vector<8x8xbf16>, vector<8x8xf32> -> vector<8x8xf32>
    %397 = vector.broadcast %368 : vector<1x8xf32> to vector<8x8xf32>
    %398 = arith.addf %396, %397 : vector<8x8xf32>
    %cst_82 = arith.constant dense<0xFF800000> : vector<8xf32>
    %399 = vector.multi_reduction <maximumf>, %398, %cst_82 [1] : vector<8x8xf32> to vector<8xf32>
    %400 = vector.shape_cast %399 : vector<8xf32> to vector<8x1xf32>
    %401 = vector.broadcast %400 : vector<8x1xf32> to vector<8x8xf32>
    %402 = arith.subf %398, %401 : vector<8x8xf32>
    %403 = math.exp %402 : vector<8x8xf32>
    %cst_83 = arith.constant dense<0.000000e+00> : vector<8xf32>
    %404 = vector.multi_reduction <add>, %403, %cst_83 [1] : vector<8x8xf32> to vector<8xf32>
    %405 = vector.shape_cast %404 : vector<8xf32> to vector<8x1xf32>
    %406 = tpu.reciprocal %405 {approx = true} : vector<8x1xf32> -> vector<8x1xf32>
    %407 = vector.broadcast %406 : vector<8x1xf32> to vector<8x8xf32>
    %408 = arith.mulf %403, %407 : vector<8x8xf32>
    %409 = arith.truncf %408 : vector<8x8xf32> to vector<8x8xbf16>
    %cst_84 = arith.constant dense<0.000000e+00> : vector<8x8xf32>
    %410 = tpu.matmul %409, %395, %cst_84 {dimension_numbers = #tpu.dot_dimension_numbers<[1], [0], [0], [1], [0, 0, 1, 1], [], []>} : vector<8x8xbf16>, vector<8x8xbf16>, vector<8x8xf32> -> vector<8x8xf32>
    %411 = vector.extract_strided_slice %367 {offsets = [0, 16], sizes = [8, 8], strides = [1, 1]} : vector<8x96xf32> to vector<8x8xf32>
    %412 = arith.truncf %411 : vector<8x8xf32> to vector<8x8xbf16>
    %413 = vector.extract_strided_slice %367 {offsets = [0, 48], sizes = [8, 8], strides = [1, 1]} : vector<8x96xf32> to vector<8x8xf32>
    %414 = arith.truncf %413 : vector<8x8xf32> to vector<8x8xbf16>
    %415 = vector.extract_strided_slice %367 {offsets = [0, 80], sizes = [8, 8], strides = [1, 1]} : vector<8x96xf32> to vector<8x8xf32>
    %416 = arith.truncf %415 : vector<8x8xf32> to vector<8x8xbf16>
    %cst_85 = arith.constant dense<0.000000e+00> : vector<8x8xf32>
    %417 = tpu.matmul %412, %414, %cst_85 {dimension_numbers = #tpu.dot_dimension_numbers<[1], [1], [0], [0], [0, 0, 1, 0], [], []>} : vector<8x8xbf16>, vector<8x8xbf16>, vector<8x8xf32> -> vector<8x8xf32>
    %418 = vector.broadcast %368 : vector<1x8xf32> to vector<8x8xf32>
    %419 = arith.addf %417, %418 : vector<8x8xf32>
    %cst_86 = arith.constant dense<0xFF800000> : vector<8xf32>
    %420 = vector.multi_reduction <maximumf>, %419, %cst_86 [1] : vector<8x8xf32> to vector<8xf32>
    %421 = vector.shape_cast %420 : vector<8xf32> to vector<8x1xf32>
    %422 = vector.broadcast %421 : vector<8x1xf32> to vector<8x8xf32>
    %423 = arith.subf %419, %422 : vector<8x8xf32>
    %424 = math.exp %423 : vector<8x8xf32>
    %cst_87 = arith.constant dense<0.000000e+00> : vector<8xf32>
    %425 = vector.multi_reduction <add>, %424, %cst_87 [1] : vector<8x8xf32> to vector<8xf32>
    %426 = vector.shape_cast %425 : vector<8xf32> to vector<8x1xf32>
    %427 = tpu.reciprocal %426 {approx = true} : vector<8x1xf32> -> vector<8x1xf32>
    %428 = vector.broadcast %427 : vector<8x1xf32> to vector<8x8xf32>
    %429 = arith.mulf %424, %428 : vector<8x8xf32>
    %430 = arith.truncf %429 : vector<8x8xf32> to vector<8x8xbf16>
    %cst_88 = arith.constant dense<0.000000e+00> : vector<8x8xf32>
    %431 = tpu.matmul %430, %416, %cst_88 {dimension_numbers = #tpu.dot_dimension_numbers<[1], [0], [0], [1], [0, 0, 1, 1], [], []>} : vector<8x8xbf16>, vector<8x8xbf16>, vector<8x8xf32> -> vector<8x8xf32>
    %432 = vector.extract_strided_slice %367 {offsets = [0, 24], sizes = [8, 8], strides = [1, 1]} : vector<8x96xf32> to vector<8x8xf32>
    %433 = arith.truncf %432 : vector<8x8xf32> to vector<8x8xbf16>
    %434 = vector.extract_strided_slice %367 {offsets = [0, 56], sizes = [8, 8], strides = [1, 1]} : vector<8x96xf32> to vector<8x8xf32>
    %435 = arith.truncf %434 : vector<8x8xf32> to vector<8x8xbf16>
    %436 = vector.extract_strided_slice %367 {offsets = [0, 88], sizes = [8, 8], strides = [1, 1]} : vector<8x96xf32> to vector<8x8xf32>
    %437 = arith.truncf %436 : vector<8x8xf32> to vector<8x8xbf16>
    %cst_89 = arith.constant dense<0.000000e+00> : vector<8x8xf32>
    %438 = tpu.matmul %433, %435, %cst_89 {dimension_numbers = #tpu.dot_dimension_numbers<[1], [1], [0], [0], [0, 0, 1, 0], [], []>} : vector<8x8xbf16>, vector<8x8xbf16>, vector<8x8xf32> -> vector<8x8xf32>
    %439 = vector.broadcast %368 : vector<1x8xf32> to vector<8x8xf32>
    %440 = arith.addf %438, %439 : vector<8x8xf32>
    %cst_90 = arith.constant dense<0xFF800000> : vector<8xf32>
    %441 = vector.multi_reduction <maximumf>, %440, %cst_90 [1] : vector<8x8xf32> to vector<8xf32>
    %442 = vector.shape_cast %441 : vector<8xf32> to vector<8x1xf32>
    %443 = vector.broadcast %442 : vector<8x1xf32> to vector<8x8xf32>
    %444 = arith.subf %440, %443 : vector<8x8xf32>
    %445 = math.exp %444 : vector<8x8xf32>
    %cst_91 = arith.constant dense<0.000000e+00> : vector<8xf32>
    %446 = vector.multi_reduction <add>, %445, %cst_91 [1] : vector<8x8xf32> to vector<8xf32>
    %447 = vector.shape_cast %446 : vector<8xf32> to vector<8x1xf32>
    %448 = tpu.reciprocal %447 {approx = true} : vector<8x1xf32> -> vector<8x1xf32>
    %449 = vector.broadcast %448 : vector<8x1xf32> to vector<8x8xf32>
    %450 = arith.mulf %445, %449 : vector<8x8xf32>
    %451 = arith.truncf %450 : vector<8x8xf32> to vector<8x8xbf16>
    %cst_92 = arith.constant dense<0.000000e+00> : vector<8x8xf32>
    %452 = tpu.matmul %451, %437, %cst_92 {dimension_numbers = #tpu.dot_dimension_numbers<[1], [0], [0], [1], [0, 0, 1, 1], [], []>} : vector<8x8xbf16>, vector<8x8xbf16>, vector<8x8xf32> -> vector<8x8xf32>
    %453 = tpu.concatenate %389, %410, %431, %452 in 1 : vector<8x8xf32>, vector<8x8xf32>, vector<8x8xf32>, vector<8x8xf32> -> vector<8x32xf32>
    %454 = vector.extract_strided_slice %12 {offsets = [40, 0], sizes = [8, 96], strides = [1, 1]} : vector<48x96xf32> to vector<8x96xf32>
    %455 = vector.extract_strided_slice %18 {offsets = [5, 0], sizes = [1, 8], strides = [1, 1]} : vector<6x8xf32> to vector<1x8xf32>
    %456 = vector.extract_strided_slice %454 {offsets = [0, 0], sizes = [8, 8], strides = [1, 1]} : vector<8x96xf32> to vector<8x8xf32>
    %457 = arith.truncf %456 : vector<8x8xf32> to vector<8x8xbf16>
    %458 = vector.extract_strided_slice %454 {offsets = [0, 32], sizes = [8, 8], strides = [1, 1]} : vector<8x96xf32> to vector<8x8xf32>
    %459 = arith.truncf %458 : vector<8x8xf32> to vector<8x8xbf16>
    %460 = vector.extract_strided_slice %454 {offsets = [0, 64], sizes = [8, 8], strides = [1, 1]} : vector<8x96xf32> to vector<8x8xf32>
    %461 = arith.truncf %460 : vector<8x8xf32> to vector<8x8xbf16>
    %cst_93 = arith.constant dense<0.000000e+00> : vector<8x8xf32>
    %462 = tpu.matmul %457, %459, %cst_93 {dimension_numbers = #tpu.dot_dimension_numbers<[1], [1], [0], [0], [0, 0, 1, 0], [], []>} : vector<8x8xbf16>, vector<8x8xbf16>, vector<8x8xf32> -> vector<8x8xf32>
    %463 = vector.broadcast %455 : vector<1x8xf32> to vector<8x8xf32>
    %464 = arith.addf %462, %463 : vector<8x8xf32>
    %cst_94 = arith.constant dense<0xFF800000> : vector<8xf32>
    %465 = vector.multi_reduction <maximumf>, %464, %cst_94 [1] : vector<8x8xf32> to vector<8xf32>
    %466 = vector.shape_cast %465 : vector<8xf32> to vector<8x1xf32>
    %467 = vector.broadcast %466 : vector<8x1xf32> to vector<8x8xf32>
    %468 = arith.subf %464, %467 : vector<8x8xf32>
    %469 = math.exp %468 : vector<8x8xf32>
    %cst_95 = arith.constant dense<0.000000e+00> : vector<8xf32>
    %470 = vector.multi_reduction <add>, %469, %cst_95 [1] : vector<8x8xf32> to vector<8xf32>
    %471 = vector.shape_cast %470 : vector<8xf32> to vector<8x1xf32>
    %472 = tpu.reciprocal %471 {approx = true} : vector<8x1xf32> -> vector<8x1xf32>
    %473 = vector.broadcast %472 : vector<8x1xf32> to vector<8x8xf32>
    %474 = arith.mulf %469, %473 : vector<8x8xf32>
    %475 = arith.truncf %474 : vector<8x8xf32> to vector<8x8xbf16>
    %cst_96 = arith.constant dense<0.000000e+00> : vector<8x8xf32>
    %476 = tpu.matmul %475, %461, %cst_96 {dimension_numbers = #tpu.dot_dimension_numbers<[1], [0], [0], [1], [0, 0, 1, 1], [], []>} : vector<8x8xbf16>, vector<8x8xbf16>, vector<8x8xf32> -> vector<8x8xf32>
    %477 = vector.extract_strided_slice %454 {offsets = [0, 8], sizes = [8, 8], strides = [1, 1]} : vector<8x96xf32> to vector<8x8xf32>
    %478 = arith.truncf %477 : vector<8x8xf32> to vector<8x8xbf16>
    %479 = vector.extract_strided_slice %454 {offsets = [0, 40], sizes = [8, 8], strides = [1, 1]} : vector<8x96xf32> to vector<8x8xf32>
    %480 = arith.truncf %479 : vector<8x8xf32> to vector<8x8xbf16>
    %481 = vector.extract_strided_slice %454 {offsets = [0, 72], sizes = [8, 8], strides = [1, 1]} : vector<8x96xf32> to vector<8x8xf32>
    %482 = arith.truncf %481 : vector<8x8xf32> to vector<8x8xbf16>
    %cst_97 = arith.constant dense<0.000000e+00> : vector<8x8xf32>
    %483 = tpu.matmul %478, %480, %cst_97 {dimension_numbers = #tpu.dot_dimension_numbers<[1], [1], [0], [0], [0, 0, 1, 0], [], []>} : vector<8x8xbf16>, vector<8x8xbf16>, vector<8x8xf32> -> vector<8x8xf32>
    %484 = vector.broadcast %455 : vector<1x8xf32> to vector<8x8xf32>
    %485 = arith.addf %483, %484 : vector<8x8xf32>
    %cst_98 = arith.constant dense<0xFF800000> : vector<8xf32>
    %486 = vector.multi_reduction <maximumf>, %485, %cst_98 [1] : vector<8x8xf32> to vector<8xf32>
    %487 = vector.shape_cast %486 : vector<8xf32> to vector<8x1xf32>
    %488 = vector.broadcast %487 : vector<8x1xf32> to vector<8x8xf32>
    %489 = arith.subf %485, %488 : vector<8x8xf32>
    %490 = math.exp %489 : vector<8x8xf32>
    %cst_99 = arith.constant dense<0.000000e+00> : vector<8xf32>
    %491 = vector.multi_reduction <add>, %490, %cst_99 [1] : vector<8x8xf32> to vector<8xf32>
    %492 = vector.shape_cast %491 : vector<8xf32> to vector<8x1xf32>
    %493 = tpu.reciprocal %492 {approx = true} : vector<8x1xf32> -> vector<8x1xf32>
    %494 = vector.broadcast %493 : vector<8x1xf32> to vector<8x8xf32>
    %495 = arith.mulf %490, %494 : vector<8x8xf32>
    %496 = arith.truncf %495 : vector<8x8xf32> to vector<8x8xbf16>
    %cst_100 = arith.constant dense<0.000000e+00> : vector<8x8xf32>
    %497 = tpu.matmul %496, %482, %cst_100 {dimension_numbers = #tpu.dot_dimension_numbers<[1], [0], [0], [1], [0, 0, 1, 1], [], []>} : vector<8x8xbf16>, vector<8x8xbf16>, vector<8x8xf32> -> vector<8x8xf32>
    %498 = vector.extract_strided_slice %454 {offsets = [0, 16], sizes = [8, 8], strides = [1, 1]} : vector<8x96xf32> to vector<8x8xf32>
    %499 = arith.truncf %498 : vector<8x8xf32> to vector<8x8xbf16>
    %500 = vector.extract_strided_slice %454 {offsets = [0, 48], sizes = [8, 8], strides = [1, 1]} : vector<8x96xf32> to vector<8x8xf32>
    %501 = arith.truncf %500 : vector<8x8xf32> to vector<8x8xbf16>
    %502 = vector.extract_strided_slice %454 {offsets = [0, 80], sizes = [8, 8], strides = [1, 1]} : vector<8x96xf32> to vector<8x8xf32>
    %503 = arith.truncf %502 : vector<8x8xf32> to vector<8x8xbf16>
    %cst_101 = arith.constant dense<0.000000e+00> : vector<8x8xf32>
    %504 = tpu.matmul %499, %501, %cst_101 {dimension_numbers = #tpu.dot_dimension_numbers<[1], [1], [0], [0], [0, 0, 1, 0], [], []>} : vector<8x8xbf16>, vector<8x8xbf16>, vector<8x8xf32> -> vector<8x8xf32>
    %505 = vector.broadcast %455 : vector<1x8xf32> to vector<8x8xf32>
    %506 = arith.addf %504, %505 : vector<8x8xf32>
    %cst_102 = arith.constant dense<0xFF800000> : vector<8xf32>
    %507 = vector.multi_reduction <maximumf>, %506, %cst_102 [1] : vector<8x8xf32> to vector<8xf32>
    %508 = vector.shape_cast %507 : vector<8xf32> to vector<8x1xf32>
    %509 = vector.broadcast %508 : vector<8x1xf32> to vector<8x8xf32>
    %510 = arith.subf %506, %509 : vector<8x8xf32>
    %511 = math.exp %510 : vector<8x8xf32>
    %cst_103 = arith.constant dense<0.000000e+00> : vector<8xf32>
    %512 = vector.multi_reduction <add>, %511, %cst_103 [1] : vector<8x8xf32> to vector<8xf32>
    %513 = vector.shape_cast %512 : vector<8xf32> to vector<8x1xf32>
    %514 = tpu.reciprocal %513 {approx = true} : vector<8x1xf32> -> vector<8x1xf32>
    %515 = vector.broadcast %514 : vector<8x1xf32> to vector<8x8xf32>
    %516 = arith.mulf %511, %515 : vector<8x8xf32>
    %517 = arith.truncf %516 : vector<8x8xf32> to vector<8x8xbf16>
    %cst_104 = arith.constant dense<0.000000e+00> : vector<8x8xf32>
    %518 = tpu.matmul %517, %503, %cst_104 {dimension_numbers = #tpu.dot_dimension_numbers<[1], [0], [0], [1], [0, 0, 1, 1], [], []>} : vector<8x8xbf16>, vector<8x8xbf16>, vector<8x8xf32> -> vector<8x8xf32>
    %519 = vector.extract_strided_slice %454 {offsets = [0, 24], sizes = [8, 8], strides = [1, 1]} : vector<8x96xf32> to vector<8x8xf32>
    %520 = arith.truncf %519 : vector<8x8xf32> to vector<8x8xbf16>
    %521 = vector.extract_strided_slice %454 {offsets = [0, 56], sizes = [8, 8], strides = [1, 1]} : vector<8x96xf32> to vector<8x8xf32>
    %522 = arith.truncf %521 : vector<8x8xf32> to vector<8x8xbf16>
    %523 = vector.extract_strided_slice %454 {offsets = [0, 88], sizes = [8, 8], strides = [1, 1]} : vector<8x96xf32> to vector<8x8xf32>
    %524 = arith.truncf %523 : vector<8x8xf32> to vector<8x8xbf16>
    %cst_105 = arith.constant dense<0.000000e+00> : vector<8x8xf32>
    %525 = tpu.matmul %520, %522, %cst_105 {dimension_numbers = #tpu.dot_dimension_numbers<[1], [1], [0], [0], [0, 0, 1, 0], [], []>} : vector<8x8xbf16>, vector<8x8xbf16>, vector<8x8xf32> -> vector<8x8xf32>
    %526 = vector.broadcast %455 : vector<1x8xf32> to vector<8x8xf32>
    %527 = arith.addf %525, %526 : vector<8x8xf32>
    %cst_106 = arith.constant dense<0xFF800000> : vector<8xf32>
    %528 = vector.multi_reduction <maximumf>, %527, %cst_106 [1] : vector<8x8xf32> to vector<8xf32>
    %529 = vector.shape_cast %528 : vector<8xf32> to vector<8x1xf32>
    %530 = vector.broadcast %529 : vector<8x1xf32> to vector<8x8xf32>
    %531 = arith.subf %527, %530 : vector<8x8xf32>
    %532 = math.exp %531 : vector<8x8xf32>
    %cst_107 = arith.constant dense<0.000000e+00> : vector<8xf32>
    %533 = vector.multi_reduction <add>, %532, %cst_107 [1] : vector<8x8xf32> to vector<8xf32>
    %534 = vector.shape_cast %533 : vector<8xf32> to vector<8x1xf32>
    %535 = tpu.reciprocal %534 {approx = true} : vector<8x1xf32> -> vector<8x1xf32>
    %536 = vector.broadcast %535 : vector<8x1xf32> to vector<8x8xf32>
    %537 = arith.mulf %532, %536 : vector<8x8xf32>
    %538 = arith.truncf %537 : vector<8x8xf32> to vector<8x8xbf16>
    %cst_108 = arith.constant dense<0.000000e+00> : vector<8x8xf32>
    %539 = tpu.matmul %538, %524, %cst_108 {dimension_numbers = #tpu.dot_dimension_numbers<[1], [0], [0], [1], [0, 0, 1, 1], [], []>} : vector<8x8xbf16>, vector<8x8xbf16>, vector<8x8xf32> -> vector<8x8xf32>
    %540 = tpu.concatenate %476, %497, %518, %539 in 1 : vector<8x8xf32>, vector<8x8xf32>, vector<8x8xf32>, vector<8x8xf32> -> vector<8x32xf32>
    %541 = tpu.concatenate %105, %192, %279, %366, %453, %540 in 0 : vector<8x32xf32>, vector<8x32xf32>, vector<8x32xf32>, vector<8x32xf32>, vector<8x32xf32>, vector<8x32xf32> -> vector<48x32xf32>
    %542 = arith.truncf %541 : vector<48x32xf32> to vector<48x32xbf16>
    %c0_109 = arith.constant 0 : index
    %c0_110 = arith.constant 0 : index
    %c0_111 = arith.constant 0 : index
    %543 = vector.load %arg9[%c0_109, %c0_110, %c0_111] : memref<1x32x32xbf16, #tpu.memory_space<vmem>>, vector<1x32x32xbf16>
    %544 = vector.shape_cast %543 : vector<1x32x32xbf16> to vector<32x32xbf16>
    %cst_112 = arith.constant dense<0.000000e+00> : vector<48x32xf32>
    %545 = tpu.matmul %542, %544, %cst_112 {dimension_numbers = #tpu.dot_dimension_numbers<[1], [0], [0], [1], [0, 0, 1, 1], [], []>} : vector<48x32xbf16>, vector<32x32xbf16>, vector<48x32xf32> -> vector<48x32xf32>
    %546 = vector.extract_strided_slice %4 {offsets = [1, 0], sizes = [1, 32], strides = [1, 1]} : vector<8x128xf32> to vector<1x32xf32>
    %547 = vector.broadcast %546 : vector<1x32xf32> to vector<48x32xf32>
    %548 = arith.addf %545, %547 : vector<48x32xf32>
    %549 = arith.addf %5, %548 : vector<48x32xf32>
    %550 = vector.extract_strided_slice %4 {offsets = [2, 0], sizes = [1, 32], strides = [1, 1]} : vector<8x128xf32> to vector<1x32xf32>
    %551 = vector.extract_strided_slice %4 {offsets = [3, 0], sizes = [1, 32], strides = [1, 1]} : vector<8x128xf32> to vector<1x32xf32>
    %cst_113 = arith.constant dense<0.000000e+00> : vector<48xf32>
    %552 = vector.multi_reduction <add>, %549, %cst_113 [1] : vector<48x32xf32> to vector<48xf32>
    %553 = vector.shape_cast %552 : vector<48xf32> to vector<48x1xf32>
    %cst_114 = arith.constant 3.200000e+01 : f32
    %554 = vector.broadcast %cst_114 : f32 to vector<48x1xf32>
    %555 = arith.divf %553, %554 : vector<48x1xf32>
    %556 = vector.broadcast %555 : vector<48x1xf32> to vector<48x32xf32>
    %557 = arith.subf %549, %556 : vector<48x32xf32>
    %558 = arith.mulf %557, %557 : vector<48x32xf32>
    %cst_115 = arith.constant dense<0.000000e+00> : vector<48xf32>
    %559 = vector.multi_reduction <add>, %558, %cst_115 [1] : vector<48x32xf32> to vector<48xf32>
    %560 = vector.shape_cast %559 : vector<48xf32> to vector<48x1xf32>
    %cst_116 = arith.constant 3.200000e+01 : f32
    %561 = vector.broadcast %cst_116 : f32 to vector<48x1xf32>
    %562 = arith.divf %560, %561 : vector<48x1xf32>
    %563 = vector.broadcast %555 : vector<48x1xf32> to vector<48x32xf32>
    %564 = arith.subf %549, %563 : vector<48x32xf32>
    %cst_117 = arith.constant 9.99999996E-13 : f32
    %565 = vector.broadcast %cst_117 : f32 to vector<48x1xf32>
    %566 = arith.addf %562, %565 : vector<48x1xf32>
    %567 = math.rsqrt %566 : vector<48x1xf32>
    %568 = vector.broadcast %567 : vector<48x1xf32> to vector<48x32xf32>
    %569 = arith.mulf %564, %568 : vector<48x32xf32>
    %570 = vector.broadcast %550 : vector<1x32xf32> to vector<48x32xf32>
    %571 = arith.mulf %569, %570 : vector<48x32xf32>
    %572 = vector.broadcast %551 : vector<1x32xf32> to vector<48x32xf32>
    %573 = arith.addf %571, %572 : vector<48x32xf32>
    %574 = arith.truncf %573 : vector<48x32xf32> to vector<48x32xbf16>
    %c0_118 = arith.constant 0 : index
    %c0_119 = arith.constant 0 : index
    %c0_120 = arith.constant 0 : index
    %575 = vector.load %arg10[%c0_118, %c0_119, %c0_120] : memref<1x32x64xbf16, #tpu.memory_space<vmem>>, vector<1x32x64xbf16>
    %576 = vector.shape_cast %575 : vector<1x32x64xbf16> to vector<32x64xbf16>
    %cst_121 = arith.constant dense<0.000000e+00> : vector<48x64xf32>
    %577 = tpu.matmul %574, %576, %cst_121 {dimension_numbers = #tpu.dot_dimension_numbers<[1], [0], [0], [1], [0, 0, 1, 1], [], []>} : vector<48x32xbf16>, vector<32x64xbf16>, vector<48x64xf32> -> vector<48x64xf32>
    %578 = vector.extract_strided_slice %4 {offsets = [4, 0], sizes = [1, 64], strides = [1, 1]} : vector<8x128xf32> to vector<1x64xf32>
    %579 = vector.broadcast %578 : vector<1x64xf32> to vector<48x64xf32>
    %580 = arith.addf %577, %579 : vector<48x64xf32>
    %581 = arith.mulf %580, %580 : vector<48x64xf32>
    %582 = arith.mulf %580, %581 : vector<48x64xf32>
    %cst_122 = arith.constant 4.471500e-02 : f32
    %583 = vector.broadcast %cst_122 : f32 to vector<48x64xf32>
    %584 = arith.mulf %583, %582 : vector<48x64xf32>
    %585 = arith.addf %580, %584 : vector<48x64xf32>
    %cst_123 = arith.constant 0.797884583 : f32
    %586 = vector.broadcast %cst_123 : f32 to vector<48x64xf32>
    %587 = arith.mulf %586, %585 : vector<48x64xf32>
    %588 = math.tanh %587 : vector<48x64xf32>
    %cst_124 = arith.constant 1.000000e+00 : f32
    %589 = vector.broadcast %cst_124 : f32 to vector<48x64xf32>
    %590 = arith.addf %589, %588 : vector<48x64xf32>
    %cst_125 = arith.constant 5.000000e-01 : f32
    %591 = vector.broadcast %cst_125 : f32 to vector<48x64xf32>
    %592 = arith.mulf %591, %590 : vector<48x64xf32>
    %593 = arith.mulf %580, %592 : vector<48x64xf32>
    %594 = arith.truncf %593 : vector<48x64xf32> to vector<48x64xbf16>
    %c0_126 = arith.constant 0 : index
    %c0_127 = arith.constant 0 : index
    %c0_128 = arith.constant 0 : index
    %595 = vector.load %arg11[%c0_126, %c0_127, %c0_128] : memref<1x64x32xbf16, #tpu.memory_space<vmem>>, vector<1x64x32xbf16>
    %596 = vector.shape_cast %595 : vector<1x64x32xbf16> to vector<64x32xbf16>
    %cst_129 = arith.constant dense<0.000000e+00> : vector<48x32xf32>
    %597 = tpu.matmul %594, %596, %cst_129 {dimension_numbers = #tpu.dot_dimension_numbers<[1], [0], [0], [1], [0, 0, 1, 1], [], []>} : vector<48x64xbf16>, vector<64x32xbf16>, vector<48x32xf32> -> vector<48x32xf32>
    %598 = vector.extract_strided_slice %4 {offsets = [5, 0], sizes = [1, 32], strides = [1, 1]} : vector<8x128xf32> to vector<1x32xf32>
    %599 = vector.broadcast %598 : vector<1x32xf32> to vector<48x32xf32>
    %600 = arith.addf %597, %599 : vector<48x32xf32>
    %601 = arith.addf %573, %600 : vector<48x32xf32>
    %602 = vector.extract_strided_slice %4 {offsets = [6, 0], sizes = [1, 32], strides = [1, 1]} : vector<8x128xf32> to vector<1x32xf32>
    %603 = vector.extract_strided_slice %4 {offsets = [7, 0], sizes = [1, 32], strides = [1, 1]} : vector<8x128xf32> to vector<1x32xf32>
    %cst_130 = arith.constant dense<0.000000e+00> : vector<48xf32>
    %604 = vector.multi_reduction <add>, %601, %cst_130 [1] : vector<48x32xf32> to vector<48xf32>
    %605 = vector.shape_cast %604 : vector<48xf32> to vector<48x1xf32>
    %cst_131 = arith.constant 3.200000e+01 : f32
    %606 = vector.broadcast %cst_131 : f32 to vector<48x1xf32>
    %607 = arith.divf %605, %606 : vector<48x1xf32>
    %608 = vector.broadcast %607 : vector<48x1xf32> to vector<48x32xf32>
    %609 = arith.subf %601, %608 : vector<48x32xf32>
    %610 = arith.mulf %609, %609 : vector<48x32xf32>
    %cst_132 = arith.constant dense<0.000000e+00> : vector<48xf32>
    %611 = vector.multi_reduction <add>, %610, %cst_132 [1] : vector<48x32xf32> to vector<48xf32>
    %612 = vector.shape_cast %611 : vector<48xf32> to vector<48x1xf32>
    %cst_133 = arith.constant 3.200000e+01 : f32
    %613 = vector.broadcast %cst_133 : f32 to vector<48x1xf32>
    %614 = arith.divf %612, %613 : vector<48x1xf32>
    %615 = vector.broadcast %607 : vector<48x1xf32> to vector<48x32xf32>
    %616 = arith.subf %601, %615 : vector<48x32xf32>
    %cst_134 = arith.constant 9.99999996E-13 : f32
    %617 = vector.broadcast %cst_134 : f32 to vector<48x1xf32>
    %618 = arith.addf %614, %617 : vector<48x1xf32>
    %619 = math.rsqrt %618 : vector<48x1xf32>
    %620 = vector.broadcast %619 : vector<48x1xf32> to vector<48x32xf32>
    %621 = arith.mulf %616, %620 : vector<48x32xf32>
    %622 = vector.broadcast %602 : vector<1x32xf32> to vector<48x32xf32>
    %623 = arith.mulf %621, %622 : vector<48x32xf32>
    %624 = vector.broadcast %603 : vector<1x32xf32> to vector<48x32xf32>
    %625 = arith.addf %623, %624 : vector<48x32xf32>
    %c0_135 = arith.constant 0 : index
    %c0_136 = arith.constant 0 : index
    %626 = vector.load %arg13[%c0_135, %c0_136] : memref<48x32xf32, #tpu.memory_space<vmem>>, vector<48x32xf32>
    tpu.vector_store %arg13[%c0_135, %c0_136], %625 {strides = array<i32>} : memref<48x32xf32, #tpu.memory_space<vmem>>, vector<48x32xf32>,
    %c1_i32 = arith.constant 1 : i32
    %627 = arith.cmpi eq, %arg0, %c1_i32 : i32
    %628 = arith.extui %627 : i1 to i32
    %c0_i32_137 = arith.constant 0 : i32
    %629 = arith.cmpi ne, %628, %c0_i32_137 : i32
    scf.if %629 {
      %c0_138 = arith.constant 0 : index
      %c0_139 = arith.constant 0 : index
      %630 = vector.load %arg3[%c0_138, %c0_139] : memref<8x128xf32, #tpu.memory_space<vmem>>, vector<8x128xf32>
      %631 = arith.truncf %625 : vector<48x32xf32> to vector<48x32xbf16>
      %632 = tpu.iota {dimensions = array<i32: 0>} : vector<8x48xi32>
      %633 = tpu.iota {dimensions = array<i32: 1>} : vector<8x48xi32>
      %c8_i32 = arith.constant 8 : i32
      %634 = vector.broadcast %c8_i32 : i32 to vector<8x48xi32>
      %635 = arith.muli %632, %634 : vector<8x48xi32>
      %636 = arith.cmpi eq, %633, %635 : vector<8x48xi32>
      %c6_i32 = arith.constant 6 : i32
      %637 = vector.broadcast %c6_i32 : i32 to vector<8x48xi32>
      %638 = arith.cmpi slt, %632, %637 : vector<8x48xi32>
      %639 = arith.andi %636, %638 : vector<8x48xi1>
      %640 = arith.extui %639 : vector<8x48xi1> to vector<8x48xi32>
      %641 = arith.sitofp %640 : vector<8x48xi32> to vector<8x48xf32>
      %642 = arith.truncf %641 : vector<8x48xf32> to vector<8x48xbf16>
      %cst_140 = arith.constant dense<0.000000e+00> : vector<8x32xf32>
      %643 = tpu.matmul %642, %631, %cst_140 {dimension_numbers = #tpu.dot_dimension_numbers<[1], [0], [0], [1], [0, 0, 1, 1], [], []>} : vector<8x48xbf16>, vector<48x32xbf16>, vector<8x32xf32> -> vector<8x32xf32>
      %644 = arith.truncf %643 : vector<8x32xf32> to vector<8x32xbf16>
      %c0_141 = arith.constant 0 : index
      %c0_142 = arith.constant 0 : index
      %645 = vector.load %arg6[%c0_141, %c0_142] : memref<32x32xbf16, #tpu.memory_space<vmem>>, vector<32x32xbf16>
      %cst_143 = arith.constant dense<0.000000e+00> : vector<8x32xf32>
      %646 = tpu.matmul %644, %645, %cst_143 {dimension_numbers = #tpu.dot_dimension_numbers<[1], [0], [0], [1], [0, 0, 1, 1], [], []>} : vector<8x32xbf16>, vector<32x32xbf16>, vector<8x32xf32> -> vector<8x32xf32>
      %647 = vector.extract_strided_slice %630 {offsets = [2, 0], sizes = [1, 32], strides = [1, 1]} : vector<8x128xf32> to vector<1x32xf32>
      %648 = vector.broadcast %647 : vector<1x32xf32> to vector<8x32xf32>
      %649 = arith.addf %646, %648 : vector<8x32xf32>
      %650 = math.tanh %649 : vector<8x32xf32>
      %651 = arith.mulf %650, %650 : vector<8x32xf32>
      %cst_144 = arith.constant dense<0.000000e+00> : vector<8xf32>
      %652 = vector.multi_reduction <add>, %651, %cst_144 [1] : vector<8x32xf32> to vector<8xf32>
      %653 = vector.shape_cast %652 : vector<8xf32> to vector<8x1xf32>
      %654 = math.sqrt %653 : vector<8x1xf32>
      %cst_145 = arith.constant 9.99999996E-13 : f32
      %655 = vector.broadcast %cst_145 : f32 to vector<8x1xf32>
      %656 = arith.maximumf %654, %655 : vector<8x1xf32>
      %657 = vector.broadcast %656 : vector<8x1xf32> to vector<8x32xf32>
      %658 = arith.divf %650, %657 : vector<8x32xf32>
      %659 = vector.extract_strided_slice %658 {offsets = [0, 0], sizes = [2, 32], strides = [1, 1]} : vector<8x32xf32> to vector<2x32xf32>
      %660 = vector.extract_strided_slice %658 {offsets = [2, 0], sizes = [4, 32], strides = [1, 1]} : vector<8x32xf32> to vector<4x32xf32>
      %cst_146 = arith.constant dense<0.000000e+00> : vector<2x4xf32>
      %661 = tpu.matmul %659, %660, %cst_146 {dimension_numbers = #tpu.dot_dimension_numbers<[1], [1], [0], [0], [0, 0, 1, 0], [], []>} : vector<2x32xf32>, vector<4x32xf32>, vector<2x4xf32> -> vector<2x4xf32>
      %cst_147 = arith.constant 2.000000e+01 : f32
      %662 = vector.broadcast %cst_147 : f32 to vector<2x4xf32>
      %663 = arith.mulf %661, %662 : vector<2x4xf32>
      %cst_148 = arith.constant 0.000000e+00 : f32
      %664 = vector.broadcast %cst_148 : f32 to vector<2x124xf32>
      %665 = tpu.concatenate %663, %664 in 1 : vector<2x4xf32>, vector<2x124xf32> -> vector<2x128xf32>
      %cst_149 = arith.constant 0.000000e+00 : f32
      %666 = vector.broadcast %cst_149 : f32 to vector<6x128xf32>
      %667 = tpu.concatenate %665, %666 in 0 : vector<2x128xf32>, vector<6x128xf32> -> vector<8x128xf32>
      %c0_150 = arith.constant 0 : index
      %c0_151 = arith.constant 0 : index
      %668 = vector.load %arg12[%c0_150, %c0_151] : memref<8x128xf32, #tpu.memory_space<vmem>>, vector<8x128xf32>
      tpu.vector_store %arg12[%c0_150, %c0_151], %667 {strides = array<i32>} : memref<8x128xf32, #tpu.memory_space<vmem>>, vector<8x128xf32>,
    } else {
    }
    return
  }
  func.func @transform_0(%arg0: i32) -> (i32, i32) {
    %c0_i32 = arith.constant 0 : i32
    %c0_i32_0 = arith.constant 0 : i32
    %c0_i32_1 = arith.constant 0 : i32
    return %c0_i32, %c0_i32_0 : i32, i32
  }
  func.func @transform_1(%arg0: i32) -> (i32, i32) {
    %c0_i32 = arith.constant 0 : i32
    %c0_i32_0 = arith.constant 0 : i32
    %c0_i32_1 = arith.constant 0 : i32
    return %c0_i32, %c0_i32_0 : i32, i32
  }
  func.func @transform_2(%arg0: i32) -> (i32, i32) {
    %c0_i32 = arith.constant 0 : i32
    %c0_i32_0 = arith.constant 0 : i32
    %c0_i32_1 = arith.constant 0 : i32
    return %c0_i32, %c0_i32_0 : i32, i32
  }
  func.func @transform_3(%arg0: i32) -> (i32, i32) {
    %c0_i32 = arith.constant 0 : i32
    %c0_i32_0 = arith.constant 0 : i32
    %c0_i32_1 = arith.constant 0 : i32
    return %c0_i32, %c0_i32_0 : i32, i32
  }
  func.func @transform_4(%arg0: i32) -> (i32, i32) {
    %c0_i32 = arith.constant 0 : i32
    %c0_i32_0 = arith.constant 0 : i32
    %c0_i32_1 = arith.constant 0 : i32
    return %c0_i32, %c0_i32_0 : i32, i32
  }
  func.func @transform_5(%arg0: i32) -> (i32, i32) {
    %c0_i32 = arith.constant 0 : i32
    %c0_i32_0 = arith.constant 0 : i32
    %c0_i32_1 = arith.constant 0 : i32
    return %c0_i32, %c0_i32_0 : i32, i32
  }
  func.func @transform_6(%arg0: i32) -> (i32, i32, i32) {
    %c0_i32 = arith.constant 0 : i32
    %c0_i32_0 = arith.constant 0 : i32
    %c0_i32_1 = arith.constant 0 : i32
    return %arg0, %c0_i32, %c0_i32_0 : i32, i32, i32
  }
  func.func @transform_7(%arg0: i32) -> (i32, i32, i32) {
    %c0_i32 = arith.constant 0 : i32
    %c0_i32_0 = arith.constant 0 : i32
    %c0_i32_1 = arith.constant 0 : i32
    return %arg0, %c0_i32, %c0_i32_0 : i32, i32, i32
  }
  func.func @transform_8(%arg0: i32) -> (i32, i32, i32) {
    %c0_i32 = arith.constant 0 : i32
    %c0_i32_0 = arith.constant 0 : i32
    %c0_i32_1 = arith.constant 0 : i32
    return %arg0, %c0_i32, %c0_i32_0 : i32, i32, i32
  }
  func.func @transform_9(%arg0: i32) -> (i32, i32, i32) {
    %c0_i32 = arith.constant 0 : i32
    %c0_i32_0 = arith.constant 0 : i32
    %c0_i32_1 = arith.constant 0 : i32
    return %arg0, %c0_i32, %c0_i32_0 : i32, i32, i32
  }
  func.func @transform_10(%arg0: i32) -> (i32, i32, i32) {
    %c0_i32 = arith.constant 0 : i32
    %c0_i32_0 = arith.constant 0 : i32
    %c0_i32_1 = arith.constant 0 : i32
    return %arg0, %c0_i32, %c0_i32_0 : i32, i32, i32
  }
  func.func @transform_11(%arg0: i32) -> (i32, i32) {
    %c0_i32 = arith.constant 0 : i32
    %c0_i32_0 = arith.constant 0 : i32
    %c0_i32_1 = arith.constant 0 : i32
    return %c0_i32, %c0_i32_0 : i32, i32
  }
}

</mosaic_0001>

<bundles_post_ra>
// kernel: model_forward.1
= control target key start
LH: loop header
LB: loop body
LE: loop exit
PB: predicated region body
PF: predicated region fallthrough
CT: control target
= control target key end

     0   :  { %s5551_s17 = smov 0   ;;  %s6682_s0 = inlined_call_operand.vmem [shape: s32[48,1], index: 0, kind: input, shape index: {}]   ;;  %s6683_s1 = inlined_call_operand.vmem [shape: s32[6,8], index: 1, kind: input, shape index: {}]   ;;  %s6684_s2 = inlined_call_operand.vmem [shape: f32[8,128], index: 2, kind: input, shape index: {}]   ;;  %s6685_s3 = inlined_call_operand.vmem [shape: bf16[50,32], index: 3, kind: input, shape index: {}]   ;;  %s6686_s4 = inlined_call_operand.vmem [shape: bf16[16,32], index: 4, kind: input, shape index: {}]   ;;  %s6687_s5 = inlined_call_operand.vmem [shape: bf16[32,32], index: 5, kind: input, shape index: {}]   ;;  %s6688_s6 = inlined_call_operand.vmem [shape: f32[2,8,128], index: 6, kind: input, shape index: {}]   ;;  %s6689_s7 = inlined_call_operand.vmem [shape: bf16[2,32,96], index: 7, kind: input, shape index: {}]   ;;  %s6690_s8 = inlined_call_operand.vmem [shape: bf16[2,32,32], index: 8, kind: input, shape index: {}]   ;;  %s6691_s9 = inlined_call_operand.vmem [shape: bf16[2,32,64], index: 9, kind: input, shape index: {}]   ;;  %s6692_s10 = inlined_call_operand.vmem [shape: bf16[2,64,32], index: 10, kind: input, shape index: {}]   ;;  %s6693_s11 = inlined_call_operand.vmem [shape: f32[8,128], index: 11, kind: output, shape index: {}]  }
   0x1 LB: > { %s5557_s18 = sadd.s32 4294967295, %s5467_s17   ;;  %p4541_p0 = scmp.ge.s32.totalorder %s5467_s17, 1  ;;  %s5467_s17 = sphi %s5551_s17, %s21_s17  }
   0x2   : > { %p371_p1 = scmp.lt.s32.totalorder %s5467_s17, 3 }
   0x4   : > { %p372_p2 = pnand %p4541_p0, %p371_p1 }
   0x5   : > { %p425_p3 = scmp.lt.s32.totalorder (!%p372_p2), %s5557_s18, 1  ;;  %p4551_p4 = scmp.ne.s32.totalorder (!%p372_p2), %s5557_s18, 0 }
   0x6   : > { %375 = sbr.rel (%p372_p2) target bundleno = 4859 (0x12fb), region = 64 }
   0xd   : > { %s426_s19 = scalar_select %p425_p3, %s5557_s18, 1 }
   0xe   : > { %453 = sbr.rel (%p4551_p4) target bundleno = 700 (0x2bc), region = 68  ;;  %v456_v0 = vld [vmem:[%s6682_s0 + $0x10] sm:$0xff] (!%p4551_p4)  ;;  %v454_v1 = vld [vmem:[%s6682_s0] sm:$0xff] (!%p4551_p4)  ;;  %v460_v2 = vlaneseq (!%p4551_p4)  ;;  %v5469_v3 = vmov (!%p4551_p4), 0   ;;  %v457_v4 = vld [vmem:[%s6682_s0 + $0x18] sm:$0xff] (!%p4551_p4)  ;;  %v5470_v5 = vmov (!%p4551_p4), 0.0  }
   0xf   : > { %s4542_s20 = sshll.u32 %s426_s19, 3  ;;  %s4655_s21 = sshll.u32 %s426_s19, 4  ;;  %5241 = vset.pattern.permute.xlu1 (!%p4551_p4), %v5469_v3  ;;  %5240 = vset.pattern.permute.xlu0 (!%p4551_p4), %v5469_v3  ;;  %826 = vst [vmem:[%s6693_s11] sm:$0xff] (!%p4551_p4), %v5470_v5  ;;  %v5242_v6 = vld [vmem:[%s6685_s3] sm:$0xff] (!%p4551_p4)   ;;  %v455_v7 = vld [vmem:[%s6682_s0 + $0x8] sm:$0xff] (!%p4551_p4)  ;;  %vm5471_vm0 = vmmov (!%p4551_p4), 0   ;;  %v5244_v18 = vld [vmem:[%s6685_s3 + $0x10] sm:$0xff] (!%p4551_p4)  }
  0x10   : > { %s5566_s24 = scalar_lea.vmem %s6688_s6, %s4542_s20  ;;  %s5571_s27 = scalar_lea.vmem %s6689_s7, %s4655_s21  ;;  %469 = vperm.xlu1 (!%p4551_p4), %5241, %v456_v0   ;;  %463 = vperm.xlu0 (!%p4551_p4), %5240, %v454_v1   ;;  %v5610_v8 = vshrl.u32 (!%p4551_p4), %v460_v2, 7  ;;  %v5243_v9 = vld [vmem:[%s6685_s3 + $0x8] sm:$0xff] (!%p4551_p4)   ;;  %v5615_v10 = vand.u32 (!%p4551_p4), 127, %v460_v2  ;;  %v5245_v11 = vld [vmem:[%s6686_s4] sm:$0xff] (!%p4551_p4)   ;;  %vm648_vm3 = vcmask (!%p4551_p4), 1040384   ;;  %vm550_vm4 = vcmask (!%p4551_p4), 130048  }
  0x11   : > { %s5576_s30 = scalar_lea.vmem %s6690_s8, %s4655_s21  ;;  %s5581_s14 = scalar_lea.vmem %s6691_s9, %s4655_s21  ;;  %4811 = vmatprep.subr.bf16.mxu1 (!%p4551_p4), %v5470_v5  ;;  %4797 = vmatprep.subr.bf16.mxu0 (!%p4551_p4), %v5470_v5  ;;  %v459_v14 = vld [vmem:[%s6682_s0 + $0x28] sm:$0xff] (!%p4551_p4)  ;;  %v458_v15 = vld [vmem:[%s6682_s0 + $0x20] sm:$0xff] (!%p4551_p4)  ;;  %v5246_v21 = vld [vmem:[%s6685_s3 + $0x18] ss:$0 sps:$4 sm:$0x11] (!%p4551_p4)   ;;  %vm638_vm11 = vcmask (!%p4551_p4), 408576  }
  0x12   : > { %s4658_s15 = sshll.u32 %s426_s19, 5  ;;  %4812 = vmatpush3.bf16.msra.mxu1 (!%p4551_p4), %v5242_v6  ;;  %v510_v12 = vadd.s32 (!%p4551_p4), 8, %v5610_v8  ;;  %v515_v13 = vand.u32 (!%p4551_p4), 7, %v5610_v8  ;;  %4798 = vmatpush3.bf16.msra.mxu0 (!%p4551_p4), %v5245_v11  ;;  %v511_v16 = vadd.s32 (!%p4551_p4), 16, %v5610_v8  ;;  %v512_v17 = vadd.s32 (!%p4551_p4), 24, %v5610_v8  ;;  %v5687_v1 = vld [vmem:[%s6684_s2] sm:$0xff] (!%p4551_p4) }
  0x13   : > { %s5586_s20 = scalar_lea.vmem %s6692_s10, %s4658_s15  ;;  %4813 = vmatprep.subr.bf16.mxu1 (!%p4551_p4), %v5470_v5  ;;  %4799 = vmatprep.mubr.msk.bf16.mxu0 (!%p4551_p4), %vm5471_vm0, %v5470_v5  ;;  %v650_v26 = vsel (!%p4551_p4), %vm648_vm3, %v5246_v21, 0  ;;  %v513_v29 = vadd.s32 (!%p4551_p4), 32, %v5610_v8  ;;  %v514_v30 = vadd.s32 (!%p4551_p4), 40, %v5610_v8  ;;  %v712_v0 = vsub.s32 (!%p4551_p4), 3, %v5610_v8 }
  0x14   : > { %472 = vperm.xlu1 (!%p4551_p4), %5241, %v457_v4   ;;  %466 = vperm.xlu0 (!%p4551_p4), %5240, %v455_v7   ;;  %v516_v19 = vand.u32 (!%p4551_p4), 7, %v510_v12  ;;  %vm521_vm1 = vcmp.eq.s32.totalorder (!%p4551_p4), %v5615_v10, %v515_v13  ;;  %v517_v22 = vand.u32 (!%p4551_p4), 7, %v511_v16  ;;  %v518_v23 = vand.u32 (!%p4551_p4), 7, %v512_v17 }
  0x15   : > { %4819 = vmatprep.mubr.msk.bf16.mxu1 %vm5471_vm0, %v5470_v5  ;;  %v4558_v20 = vsel %vm521_vm1, 1.0, %v5470_v5  ;;  %v519_v31 = vand.u32 7, %v513_v29  ;;  %v520_v32 = vand.u32 7, %v514_v30  ;;  %v713_v2 = vrot.slane %v5687_v1, %v712_v0 }
  0x16   : > { %4814 = vmatpush3.bf16.msra.mxu1 %v5243_v9  ;;  %vm522_vm2 = vcmp.eq.s32.totalorder %v5615_v10, %v516_v19  ;;  %vm523_vm5 = vcmp.eq.s32.totalorder %v5615_v10, %v517_v22  ;;  %vm524_vm6 = vcmp.eq.s32.totalorder %v5615_v10, %v518_v23 }
  0x17   : > { %4815 = vmatprep.subr.bf16.mxu1 %v5470_v5  ;;  %v4559_v24 = vsel %vm522_vm2, 1.0, %v5470_v5  ;;  %v4560_v27 = vsel %vm523_vm5, 1.0, %v5470_v5  ;;  %v4561_v28 = vsel %vm524_vm6, 1.0, %v5470_v5  ;;  %vm525_vm7 = vcmp.eq.s32.totalorder %v5615_v10, %v519_v31 }
  0x18   : > { %478 = vperm.xlu1 %5241, %v459_v14   ;;  %475 = vperm.xlu0 %5240, %v458_v15   ;;  %v539_v25 = vpack.c.bf16 %v4559_v24, %v4558_v20  ;;  %v540_v33 = vpack.c.bf16 %v4561_v28, %v4560_v27  ;;  %vm526_vm8 = vcmp.eq.s32.totalorder %v5615_v10, %v520_v32  ;;  %v4562_v34 = vsel %vm525_vm7, 1.0, %v5470_v5 }
  0x19   : > { %v4563_v35 = vsel %vm526_vm8, 1.0, %v5470_v5 }
  0x1a   : > { %4816 = vmatpush3.bf16.msra.mxu1 %v5244_v18  ;;  %4800 = vmatmul.mubr.msk.bf16.vlgmr.msra.gmra.mrb[0].mxu0 %vm550_vm4, %v539_v25  ;;  %v541_v36 = vpack.c.bf16 %v4563_v35, %v4562_v34 }
  0x1b   : > { %4817 = vmatprep.subr.bf16.mxu1 %v5470_v5  ;;  %4803 = vmatprep.mubr.msk.bf16.mxu0 %vm5471_vm0, %v5470_v5 }
  0x1e   : > { %4818 = vmatpush3.bf16.msra.mxu1 %v650_v26 }
  0x22   : > { %4804 = vmatmul.mubr.msk.bf16.gmra.mrb[4].mxu0 %vm550_vm4, %v540_v33 }
  0x23   : > { %4807 = vmatprep.mubr.msk.bf16.mxu0 %vm5471_vm0, %v5470_v5 }
  0x2a   : > { %4808 = vmatmul.mubr.msk.bf16.gmra.mrb[8].mxu0 %vm550_vm4, %v541_v36 }
  0x8f   : > { %v464_v37 = vpop.permute.xlu0 %463  ;;  %v470_v38 = vpop.permute.xlu1 %469 }
  0x90   : > { %vm480_vm9 = vcmp.eq.s32.totalorder %v5615_v10, %v464_v37  ;;  %vm482_vm12 = vcmp.eq.s32.totalorder %v5615_v10, %v470_v38 }
  0x91   : > { %v4552_v40 = vsel %vm480_vm9, 1.0, %v5470_v5  ;;  %v4554_v44 = vsel %vm482_vm12, 1.0, %v5470_v5 }
  0x93   : > { %v467_v39 = vpop.permute.xlu0 %466  ;;  %v473_v43 = vpop.permute.xlu1 %472 }
  0x94   : > { %vm481_vm10 = vcmp.eq.s32.totalorder %v5615_v10, %v467_v39  ;;  %vm483_vm13 = vcmp.eq.s32.totalorder %v5615_v10, %v473_v43 }
  0x95   : > { %v4553_v41 = vsel %vm481_vm10, 1.0, %v5470_v5  ;;  %v4555_v45 = vsel %vm483_vm13, 1.0, %v5470_v5 }
  0x96   : > { %v498_v42 = vpack.c.bf16 %v4553_v41, %v4552_v40  ;;  %v499_v48 = vpack.c.bf16 %v4555_v45, %v4554_v44 }
  0x97   : > { %v479_v46 = vpop.permute.xlu1 %478  ;;  %v476_v47 = vpop.permute.xlu0 %475 }
  0x98   : > { %4820 = vmatmul.mubr.msk.bf16.vlgmr.msra.gmra.mrb[0].mxu1 %vm638_vm11, %v498_v42  ;;  %vm485_vm14 = vcmp.eq.s32.totalorder %v5615_v10, %v479_v46  ;;  %vm484_vm15 = vcmp.eq.s32.totalorder %v5615_v10, %v476_v47 }
  0x99   : > { %4823 = vmatprep.mubr.msk.bf16.mxu1 %vm5471_vm0, %v5470_v5  ;;  %v4557_v49 = vsel %vm485_vm14, 1.0, %v5470_v5  ;;  %v4556_v50 = vsel %vm484_vm15, 1.0, %v5470_v5 }
  0x9a   : > { %v500_v51 = vpack.c.bf16 %v4557_v49, %v4556_v50 }
  0xa0   : > { %4824 = vmatmul.mubr.msk.bf16.gmra.mrb[4].mxu1 %vm638_vm11, %v499_v48 }
  0xa1   : > { %4827 = vmatprep.mubr.msk.bf16.mxu1 %vm5471_vm0, %v5470_v5  ;;  %vm720_vm0 = vcmask 261120  }
  0xa8   : > { %4828 = vmatmul.mubr.msk.bf16.gmra.mrb[8].mxu1 %vm638_vm11, %v500_v51 }
  0xed   : > { %v594_v52 = vpop.f32.mrb[0].mxu0 }
  0xee   : > { %v4801_v53 = vpop.f32.mrb[1].mxu0 }
  0xef   : > { %v597_v54 = vpop.f32.mrb[2].mxu0 }
  0xf0   : > { %v4802_v55 = vpop.f32.mrb[3].mxu0 }
  0xf5   : > { %v602_v56 = vpop.f32.mrb[4].mxu0 }
  0xf6   : > { %v4805_v57 = vpop.f32.mrb[5].mxu0 }
  0xf7   : > { %v605_v58 = vpop.f32.mrb[6].mxu0 }
  0xf8   : > { %v4806_v59 = vpop.f32.mrb[7].mxu0 }
  0xfd   : > { %v610_v60 = vpop.f32.mrb[8].mxu0 }
  0xfe   : > { %v4809_v61 = vpop.f32.mrb[9].mxu0 }
  0xff   : > { %v613_v62 = vpop.f32.mrb[10].mxu0 }
 0x100   : > { %v4810_v63 = vpop.f32.mrb[11].mxu0 }
 0x16b   : > { %v686_v3 = vpop.f32.mrb[0].mxu1 }
 0x16c   : > { %v687_v4 = vadd.f32 %v686_v3, %v594_v52  ;;  %v4821_v5 = vpop.f32.mrb[1].mxu1 }
 0x16d   : > { %v689_v6 = vpop.f32.mrb[2].mxu1 }
 0x16e   : > { %v690_v7 = vadd.f32 %v689_v6, %v597_v54  ;;  %v4822_v9 = vpop.f32.mrb[3].mxu1  ;;  %v714_v10 = vadd.f32 %v713_v2, %v687_v4 }
 0x170   : > { %v721_v11 = vsel %vm720_vm0, %v714_v10, 0.0  ;;  %v715_v12 = vadd.f32 %v713_v2, %v690_v7 }
 0x171   : > { %722 = vadd.xlane.f32.xlu0 %v721_v11 }
 0x172   : > { %v724_v13 = vsel %vm720_vm0, %v715_v12, 0.0 }
 0x173   : > { %725 = vadd.xlane.f32.xlu1 %v724_v13  ;;  %v694_v14 = vpop.f32.mrb[4].mxu1 }
 0x174   : > { %v695_v15 = vadd.f32 %v694_v14, %v602_v56  ;;  %v4825_v16 = vpop.f32.mrb[5].mxu1 }
 0x175   : > { %v697_v17 = vpop.f32.mrb[6].mxu1 }
 0x176   : > { %v698_v18 = vadd.f32 %v697_v17, %v605_v58  ;;  %v4826_v19 = vpop.f32.mrb[7].mxu1  ;;  %v716_v20 = vadd.f32 %v713_v2, %v695_v15 }
 0x178   : > { %v727_v21 = vsel %vm720_vm0, %v716_v20, 0.0  ;;  %v717_v22 = vadd.f32 %v713_v2, %v698_v18 }
 0x179   : > { %728 = vadd.xlane.f32.xlu0 %v727_v21 }
 0x17a   : > { %v730_v26 = vsel %vm720_vm0, %v717_v22, 0.0 }
 0x17b   : > { %v702_v23 = vpop.f32.mrb[8].mxu1 }
 0x17c   : > { %v703_v24 = vadd.f32 %v702_v23, %v610_v60  ;;  %v4829_v25 = vpop.f32.mrb[9].mxu1 }
 0x17d   : > { %731 = vadd.xlane.f32.xlu0 %v730_v26  ;;  %v705_v27 = vpop.f32.mrb[10].mxu1 }
 0x17e   : > { %v706_v28 = vadd.f32 %v705_v27, %v613_v62  ;;  %v4830_v29 = vpop.f32.mrb[11].mxu1  ;;  %v718_v30 = vadd.f32 %v713_v2, %v703_v24 }
 0x180   : > { %v733_v31 = vsel %vm720_vm0, %v718_v30, 0.0  ;;  %v719_v32 = vadd.f32 %v713_v2, %v706_v28 }
 0x181   : > { %734 = vadd.xlane.f32.xlu1 %v733_v31 }
 0x182   : > { %v736_v33 = vsel %vm720_vm0, %v719_v32, 0.0 }
 0x183   : > { %737 = vadd.xlane.f32.xlu0 %v736_v33 }
 0x1fe   : > { %v723_v34 = vpop.xlane.xlu0 %722 }
 0x1ff   : > { %v740_v35 = vmul.f32 0.03125, %v723_v34 }
 0x200   : > { %v726_v36 = vpop.xlane.xlu1 %725 }
 0x201   : > { %v746_v37 = vsub.f32 %v714_v10, %v740_v35  ;;  %v741_v38 = vmul.f32 0.03125, %v726_v36  ;;  %v802_v10 = vsub.s32 0, %v5610_v8 }
 0x203   : > { %v747_v39 = vsub.f32 %v715_v12, %v741_v38  ;;  %v752_v40 = vmul.f32 %v746_v37, %v746_v37  ;;  %v812_v12 = vsub.s32 1, %v5610_v8  ;;  %v803_v15 = vrot.slane %v5687_v1, %v802_v10 }
 0x205   : > { %v758_v41 = vsel %vm720_vm0, %v752_v40, 0.0  ;;  %v753_v42 = vmul.f32 %v747_v39, %v747_v39  ;;  %v813_v18 = vrot.slane %v5687_v1, %v812_v12 }
 0x206   : > { %759 = vadd.xlane.f32.xlu1 %v758_v41  ;;  %v729_v43 = vpop.xlane.xlu0 %728 }
 0x207   : > { %v742_v44 = vmul.f32 0.03125, %v729_v43  ;;  %v761_v45 = vsel %vm720_vm0, %v753_v42, 0.0 }
 0x208   : > { %762 = vadd.xlane.f32.xlu0 %v761_v45 }
 0x209   : > { %v748_v46 = vsub.f32 %v716_v20, %v742_v44 }
 0x20a   : > { %v732_v47 = vpop.xlane.xlu0 %731 }
 0x20b   : > { %v743_v48 = vmul.f32 0.03125, %v732_v47  ;;  %v754_v49 = vmul.f32 %v748_v46, %v748_v46 }
 0x20d   : > { %v749_v50 = vsub.f32 %v717_v22, %v743_v48  ;;  %v764_v51 = vsel %vm720_vm0, %v754_v49, 0.0 }
 0x20e   : > { %v735_v52 = vpop.xlane.xlu1 %734  ;;  %765 = vadd.xlane.f32.xlu1 %v764_v51 }
 0x20f   : > { %v744_v53 = vmul.f32 0.03125, %v735_v52  ;;  %v755_v54 = vmul.f32 %v749_v50, %v749_v50 }
 0x210   : > { %v738_v55 = vpop.xlane.xlu0 %737 }
 0x211   : > { %v750_v56 = vsub.f32 %v718_v30, %v744_v53  ;;  %v745_v57 = vmul.f32 0.03125, %v738_v55  ;;  %v767_v58 = vsel %vm720_vm0, %v755_v54, 0.0 }
 0x212   : > { %768 = vadd.xlane.f32.xlu0 %v767_v58 }
 0x213   : > { %v751_v59 = vsub.f32 %v719_v32, %v745_v57  ;;  %v756_v60 = vmul.f32 %v750_v56, %v750_v56 }
 0x215   : > { %v770_v61 = vsel %vm720_vm0, %v756_v60, 0.0  ;;  %v757_v62 = vmul.f32 %v751_v59, %v751_v59 }
 0x216   : > { %771 = vadd.xlane.f32.xlu1 %v770_v61 }
 0x217   : > { %v773_v63 = vsel %vm720_vm0, %v757_v62, 0.0 }
 0x218   : > { %774 = vadd.xlane.f32.xlu0 %v773_v63 }
 0x293   : > { %v760_v0 = vpop.xlane.xlu1 %759 }
 0x294   : > { %v776_v2 = vmul.f32 0.03125, %v760_v0 }
 0x295   : > { %v763_v3 = vpop.xlane.xlu0 %762 }
 0x296   : > { %v782_v4 = vadd.f32 1e-12, %v776_v2  ;;  %v777_v5 = vmul.f32 0.03125, %v763_v3 }
 0x298   : > { %5247 = vrsqrt.f32 %v782_v4  ;;  %v783_v6 = vadd.f32 1e-12, %v777_v5 }
 0x29a   : > { %5249 = vrsqrt.f32 %v783_v6 }
 0x29b   : > { %v766_v7 = vpop.xlane.xlu1 %765 }
 0x29c   : > { %v778_v9 = vmul.f32 0.03125, %v766_v7 }
 0x29e   : > { %v784_v11 = vadd.f32 1e-12, %v778_v9 }
 0x29f   : > { %v769_v13 = vpop.xlane.xlu0 %768 }
 0x2a0   : > { %5251 = vrsqrt.f32 %v784_v11  ;;  %v779_v14 = vmul.f32 0.03125, %v769_v13 }
 0x2a2   : > { %v5248_v16 = vpop.eup %5247  ;;  %v785_v17 = vadd.f32 1e-12, %v779_v14 }
 0x2a3   : > { %v794_v19 = vmul.f32 %v5248_v16, %v746_v37  ;;  %v772_v20 = vpop.xlane.xlu1 %771 }
 0x2a4   : > { %v5250_v21 = vpop.eup %5249  ;;  %5253 = vrsqrt.f32 %v785_v17  ;;  %v780_v22 = vmul.f32 0.03125, %v772_v20 }
 0x2a5   : > { %v804_v23 = vmul.f32 %v803_v15, %v794_v19  ;;  %v795_v24 = vmul.f32 %v5250_v21, %v747_v39  ;;  %v775_v25 = vpop.xlane.xlu0 %774 }
 0x2a6   : > { %v786_v26 = vadd.f32 1e-12, %v780_v22  ;;  %v781_v27 = vmul.f32 0.03125, %v775_v25 }
 0x2a7   : > { %v814_v8 = vadd.f32 %v813_v18, %v804_v23  ;;  %v805_v28 = vmul.f32 %v803_v15, %v795_v24 }
 0x2a8   : > { %5255 = vrsqrt.f32 %v786_v26  ;;  %v787_v29 = vadd.f32 1e-12, %v781_v27 }
 0x2a9   : > { %820 = vst.msk [vmem:[#allocation2] sm:$0xff] %vm720_vm0, %v814_v8  ;;  %v815_v30 = vadd.f32 %v813_v18, %v805_v28 }
 0x2aa   : > { %v5252_v31 = vpop.eup %5251  ;;  %5257 = vrsqrt.f32 %v787_v29 }
 0x2ab   : > { %821 = vst.msk [vmem:[#allocation2 + $0x8] sm:$0xff] %vm720_vm0, %v815_v30  ;;  %v796_v1 = vmul.f32 %v5252_v31, %v748_v46 }
 0x2ad   : > { %v806_v32 = vmul.f32 %v803_v15, %v796_v1 }
 0x2ae   : > { %v5254_v33 = vpop.eup %5253 }
 0x2af   : > { %v816_v34 = vadd.f32 %v813_v18, %v806_v32  ;;  %v797_v35 = vmul.f32 %v5254_v33, %v749_v50 }
 0x2b1   : > { %822 = vst.msk [vmem:[#allocation2 + $0x10] sm:$0xff] %vm720_vm0, %v816_v34  ;;  %v807_v36 = vmul.f32 %v803_v15, %v797_v35 }
 0x2b2   : > { %v5256_v37 = vpop.eup %5255 }
 0x2b3   : > { %v817_v38 = vadd.f32 %v813_v18, %v807_v36  ;;  %v798_v39 = vmul.f32 %v5256_v37, %v750_v56 }
 0x2b4   : > { %v5258_v40 = vpop.eup %5257 }
 0x2b5   : > { %823 = vst.msk [vmem:[#allocation2 + $0x18] sm:$0xff] %vm720_vm0, %v817_v38  ;;  %v808_v41 = vmul.f32 %v803_v15, %v798_v39  ;;  %v799_v42 = vmul.f32 %v5258_v40, %v751_v59 }
 0x2b7   : > { %v818_v43 = vadd.f32 %v813_v18, %v808_v41  ;;  %v809_v44 = vmul.f32 %v803_v15, %v799_v42 }
 0x2b9   : > { %824 = vst.msk [vmem:[#allocation2 + $0x20] sm:$0xff] %vm720_vm0, %v818_v43  ;;  %v819_v45 = vadd.f32 %v813_v18, %v809_v44 }
 0x2bb   : > { %825 = vst.msk [vmem:[#allocation2 + $0x28] sm:$0xff] %vm720_vm0, %v819_v45 }
 0x2bc PF: > { %v5304_v46 = vld [vmem:[%s5571_s27] sm:$0xff]   ;;  %v5472_v47 = vmov 0.0   ;;  %v5305_v48 = vld [vmem:[%s5571_s27 + $0x8] sm:$0xff]   ;;  %vm5473_vm1 = vmmov 0   ;;  %vm857_vm2 = vcmask 261120   ;;  %v830_v52 = vld [vmem:[#allocation2 + $0x10] sm:$0xff]  ;;  %v6694_v55 = vlaneseq }
 0x2bd   : > { %4831 = vmatprep.subr.bf16.mxu0 %v5472_v47  ;;  %4853 = vmatprep.subr.bf16.mxu1 %v5472_v47  ;;  %v828_v49 = vld [vmem:[#allocation2] sm:$0xff]  ;;  %v829_v50 = vld [vmem:[#allocation2 + $0x8] sm:$0xff]  ;;  %v831_v53 = vld [vmem:[#allocation2 + $0x18] sm:$0xff]  ;;  %s5474_s27 = smov 64   ;;  %s5475_s26 = smov 96   ;;  %vm935_vm3 = vcmask 64512  }
 0x2be   : > { %4832 = vmatpush3.bf16.msra.mxu0 %v5304_v46  ;;  %4835 = vmatprep.mubr.msk.bf16.mxu0 %vm5473_vm1, %v5472_v47  ;;  %v834_v51 = vpack.c.bf16 %v829_v50, %v828_v49  ;;  %v835_v54 = vpack.c.bf16 %v831_v53, %v830_v52  ;;  %v5729_v59 = vshrl.u32 %v6694_v55, 7  ;;  %v827_v61 = vld [vmem:[%s5566_s24] sm:$0xff]  ;;  %s5476_s28 = smov 88   ;;  %vm999_vm4 = vcmask 1043456   ;;  %s5478_s29 = smov 72  }
 0x2bf   : > { %4833 = vmatprep.subr.bf16.mxu0 %v5472_v47  ;;  %4855 = vmatprep.mubr.msk.bf16.mxu1 %vm5473_vm1, %v5472_v47  ;;  %v924_v19 = vld [vmem:[%s6683_s1] sm:$0x3f]  ;;  %v5477_v20 = vmov -1e+09   ;;  %s5479_s12 = smov 112   ;;  %s5480_s13 = smov 104  }
 0x2c0   : > { %v832_v56 = vld [vmem:[#allocation2 + $0x20] sm:$0xff]  ;;  %v843_v60 = vsub.s32 0, %v5729_v59  ;;  %vm925_vm5 = vcmp.gt.s32.totalorder %v924_v19, 0  ;;  %s5481_s15 = smov 80   ;;  %s5482_s16 = smov 120   ;;  %vm1386_vm6 = vcmask 130048  }
 0x2c1   : > { %v5758_v21 = vsel %vm925_vm5, 0.0, %v5477_v20  ;;  %s5483_s22 = smov 48   ;;  %s5484_s23 = smov 56   ;;  %vm1388_vm7 = vcmask 195584   ;;  %vm4061_vm8 = vcmask 523264  }
 0x2c2   : > { %4834 = vmatpush3.bf16.msra.mxu0 %v5305_v48  ;;  %v833_v57 = vld [vmem:[#allocation2 + $0x28] sm:$0xff]  ;;  %v5736_v62 = vrot.slane %v827_v61, %v843_v60  ;;  %v5761_v22 = vrot.slane %v5758_v21, %v843_v60  ;;  %s5485_s25 = smov 40   ;;  %p4645_p5 = scmp.ne.s32.totalorder %s5557_s18, 1 }
 0x2c3   : > { %4847 = vmatprep.subr.bf16.mxu0 %v5472_v47  ;;  %v836_v58 = vpack.c.bf16 %v833_v57, %v832_v56  ;;  %vm4252_vm9 = vcmp.lt.s32.totalorder (!%p4645_p5), %v5729_v59, 6  ;;  %vm5490_vm10 = vmmov (!%p4645_p5), 0   ;;  %vm4257_vm13 = vcmask (!%p4645_p5), 392192  }
 0x2c4   : > { %vm4457_vm0 = vcmask (!%p4645_p5), 31744  }
 0x2c5   : > { %4836 = vmatmul.mubr.msk.bf16.vlgmr.msra.gmra.mrb[0].mxu0 %vm857_vm2, %v834_v51 }
 0x2c6   : > { %4839 = vmatprep.mubr.msk.bf16.mxu0 %vm5473_vm1, %v5472_v47 }
 0x2cd   : > { %4840 = vmatmul.mubr.msk.bf16.gmra.mrb[4].mxu0 %vm857_vm2, %v835_v54 }
 0x2ce   : > { %4843 = vmatprep.mubr.msk.bf16.mxu0 %vm5473_vm1, %v5472_v47 }
 0x2d5   : > { %4844 = vmatmul.mubr.msk.bf16.gmra.mrb[8].mxu0 %vm857_vm2, %v836_v58 }
 0x2d6   : > { %4849 = vmatprep.mubr.msk.bf16.mxu0 %vm5473_vm1, %v5472_v47 }
 0x398   : > { %v901_v63 = vpop.f32.mrb[0].mxu0 }
 0x399   : > { %v902_v0 = vadd.f32 %v901_v63, %v5736_v62  ;;  %v4837_v2 = vpop.f32.mrb[1].mxu0 }
 0x39a   : > { %v904_v3 = vpop.f32.mrb[2].mxu0 }
 0x39b   : > { %v5739_v4 = vpack.c.bf16 %v902_v0, %v902_v0  ;;  %v4838_v5 = vpop.f32.mrb[3].mxu0  ;;  %v905_v28 = vadd.f32 %v904_v3, %v5736_v62 }
 0x39d   : > { %994 = vrot.lane.b32.xlu1 %v5739_v4, %s5474_s27  ;;  %933 = vrot.lane.b32.xlu0 %v5739_v4, %s5475_s26  ;;  %v5768_v29 = vpack.c.bf16 %v905_v28, %v905_v28 }
 0x3a0   : > { %v909_v6 = vpop.f32.mrb[4].mxu0 }
 0x3a1   : > { %1045 = vrot.lane.b32.xlu1 %v5739_v4, %s5476_s28  ;;  %v4841_v7 = vpop.f32.mrb[5].mxu0  ;;  %v910_v30 = vadd.f32 %v909_v6, %v5736_v62 }
 0x3a2   : > { %v912_v9 = vpop.f32.mrb[6].mxu0 }
 0x3a3   : > { %v4842_v10 = vpop.f32.mrb[7].mxu0  ;;  %v5775_v31 = vpack.c.bf16 %v910_v30, %v910_v30  ;;  %v913_v1 = vadd.f32 %v912_v9, %v5736_v62 }
 0x3a5   : > { %v5784_v32 = vpack.c.bf16 %v913_v1, %v913_v1 }
 0x3a8   : > { %v917_v15 = vpop.f32.mrb[8].mxu0 }
 0x3a9   : > { %v4845_v16 = vpop.f32.mrb[9].mxu0  ;;  %v918_v33 = vadd.f32 %v917_v15, %v5736_v62 }
 0x3aa   : > { %v920_v17 = vpop.f32.mrb[10].mxu0 }
 0x3ab   : > { %v4846_v18 = vpop.f32.mrb[11].mxu0  ;;  %v5795_v34 = vpack.c.bf16 %v918_v33, %v918_v33  ;;  %v921_v35 = vadd.f32 %v920_v17, %v5736_v62 }
 0x3ad   : > { %v5804_v36 = vpack.c.bf16 %v921_v35, %v921_v35 }
 0x40f   : > { %v995_v11 = vpop.permute.xlu1 %994  ;;  %v934_v12 = vpop.permute.xlu0 %933 }
 0x410   : > { %v940_v13 = vsel %vm935_vm3, %v934_v12, 0  ;;  %v1001_v14 = vsel %vm999_vm4, %v995_v11, 0 }
 0x411   : > { %4848 = vmatpush3.bf16.xpose.msra.mxu0 %v940_v13  ;;  %4854 = vmatpush3.bf16.msra.mxu1 %v1001_v14 }
 0x412   : > { %4859 = vmatprep.subr.bf16.mxu1 %v5472_v47  ;;  %4865 = vmatprep.subr.bf16.mxu0 %v5472_v47 }
 0x413   : > { %v1046_v42 = vpop.permute.xlu1 %1045 }
 0x414   : > { %v1051_v51 = vsel %vm935_vm3, %v1046_v42, 0 }
 0x418   : > { %4850 = vmatmul.mubr.msk.bf16.vlgmr.msra.gmra.mrb[12].mxu0 %vm935_vm3, %v5739_v4 }
 0x419   : > { %4867 = vmatprep.mubr.msk.bf16.mxu0 %vm5473_vm1, %v5472_v47 }
 0x4eb   : > { %v976_v23 = vpop.f32.mrb[12].mxu0 }
 0x4ec   : > { %v977_v24 = vadd.f32 %v976_v23, %v5761_v22  ;;  %v4851_v25 = vpop.f32.mrb[13].mxu0 }
 0x4ed   : > { %v979_v26 = vpop.f32.mrb[14].mxu0 }
 0x4ee   : > { %v4852_v27 = vpop.f32.mrb[15].mxu0  ;;  %v982_v8 = vsel %vm935_vm3, %v977_v24, -inf }
 0x4ef   : > { %983 = vmax.xlane.f32.xlu0 %v982_v8 }
 0x505   : > { %1265 = vrot.lane.b32.xlu0 %v5739_v4, %s5478_s29 }
 0x509   : > { %1614 = vrot.lane.b32.xlu0 %v5768_v29, %s5479_s12 }
 0x50d   : > { %1724 = vrot.lane.b32.xlu0 %v5768_v29, %s5480_s13 }
 0x511   : > { %1965 = vrot.lane.b32.xlu0 %v5775_v31, %s5476_s28 }
 0x515   : > { %2075 = vrot.lane.b32.xlu0 %v5775_v31, %s5481_s15 }
 0x519   : > { %2185 = vrot.lane.b32.xlu0 %v5775_v31, %s5478_s29 }
 0x51d   : > { %2314 = vrot.lane.b32.xlu0 %v5784_v32, %s5475_s26 }
 0x521   : > { %2422 = vrot.lane.b32.xlu0 %v5784_v32, %s5482_s16 }
 0x525   : > { %2532 = vrot.lane.b32.xlu0 %v5784_v32, %s5479_s12 }
 0x529   : > { %2642 = vrot.lane.b32.xlu0 %v5784_v32, %s5480_s13 }
 0x52d   : > { %2883 = vrot.lane.b32.xlu0 %v5795_v34, %s5476_s28 }
 0x531   : > { %2993 = vrot.lane.b32.xlu0 %v5795_v34, %s5481_s15 }
 0x535   : > { %3103 = vrot.lane.b32.xlu0 %v5795_v34, %s5478_s29 }
 0x539   : > { %3232 = vrot.lane.b32.xlu0 %v5804_v36, %s5475_s26 }
 0x53d   : > { %3340 = vrot.lane.b32.xlu0 %v5804_v36, %s5482_s16 }
 0x541   : > { %3450 = vrot.lane.b32.xlu0 %v5804_v36, %s5479_s12 }
 0x545   : > { %3560 = vrot.lane.b32.xlu0 %v5804_v36, %s5480_s13 }
 0x549   : > { %1215 = vrot.lane.b32.xlu0 %v5739_v4, %s5483_s22 }
 0x54d   : > { %1566 = vrot.lane.b32.xlu0 %v5768_v29, %s5484_s23 }
 0x551   : > { %1786 = vrot.lane.b32.xlu0 %v5768_v29, %s5485_s25 }
 0x555   : > { %2025 = vrot.lane.b32.xlu0 %v5775_v31, %s5484_s23 }
 0x559   : > { %2245 = vrot.lane.b32.xlu0 %v5775_v31, %s5485_s25 }
 0x55d   : > { %2484 = vrot.lane.b32.xlu0 %v5784_v32, %s5484_s23 }
 0x57c   : > { %v984_v37 = vpop.xlane.xlu0 %983 }
 0x57d   : > { %v985_v38 = vsub.f32 %v977_v24, %v984_v37 }
 0x57f   : > { %v986_v39 = vmul.f32 1.442695, %v985_v38 }
 0x580   : > { %v1266_v58 = vpop.permute.xlu0 %1265 }
 0x581   : > { %5314 = vpow2.f32 %v986_v39  ;;  %v1271_v60 = vsel %vm935_vm3, %v1266_v58, 0 }
 0x584   : > { %v1615_v10 = vpop.permute.xlu0 %1614 }
 0x588   : > { %v1725_v14 = vpop.permute.xlu0 %1724 }
 0x58b   : > { %v5315_v40 = vpop.eup %5314 }
 0x58c   : > { %v988_v41 = vsel %vm935_vm3, %v5315_v40, 0.0  ;;  %v1966_v18 = vpop.permute.xlu0 %1965 }
 0x58d   : > { %989 = vadd.xlane.f32.xlu1 %v988_v41  ;;  %v1971_v19 = vsel %vm935_vm3, %v1966_v18, 0 }
 0x590   : > { %v2076_v24 = vpop.permute.xlu0 %2075 }
 0x591   : > { %v2081_v25 = vsel %vm935_vm3, %v2076_v24, 0 }
 0x594   : > { %v2186_v8 = vpop.permute.xlu0 %2185 }
 0x595   : > { %v2191_v28 = vsel %vm935_vm3, %v2186_v8, 0 }
 0x59e   : > { %1043 = vrot.lane.b32.xlu1 %v5739_v4, %s5482_s16 }
 0x5a2   : > { %1155 = vrot.lane.b32.xlu1 %v5739_v4, %s5481_s15 }
 0x5a6   : > { %1153 = vrot.lane.b32.xlu1 %v5739_v4, %s5479_s12 }
 0x5aa   : > { %1263 = vrot.lane.b32.xlu1 %v5739_v4, %s5480_s13 }
 0x5ae   : > { %1396 = vrot.lane.b32.xlu1 %v5768_v29, %s5475_s26 }
 0x5b2   : > { %1506 = vrot.lane.b32.xlu1 %v5768_v29, %s5476_s28 }
 0x5b6   : > { %1504 = vrot.lane.b32.xlu1 %v5768_v29, %s5482_s16 }
 0x5ba   : > { %1616 = vrot.lane.b32.xlu1 %v5768_v29, %s5481_s15 }
 0x5be   : > { %1726 = vrot.lane.b32.xlu1 %v5768_v29, %s5478_s29 }
 0x5c2   : > { %1855 = vrot.lane.b32.xlu1 %v5775_v31, %s5475_s26 }
 0x5c6   : > { %1963 = vrot.lane.b32.xlu1 %v5775_v31, %s5482_s16 }
 0x5ca   : > { %2073 = vrot.lane.b32.xlu1 %v5775_v31, %s5479_s12 }
 0x5ce   : > { %2183 = vrot.lane.b32.xlu1 %v5775_v31, %s5480_s13 }
 0x5d2   : > { %2424 = vrot.lane.b32.xlu1 %v5784_v32, %s5476_s28 }
 0x5d6   : > { %2534 = vrot.lane.b32.xlu1 %v5784_v32, %s5481_s15 }
 0x5da   : > { %2644 = vrot.lane.b32.xlu1 %v5784_v32, %s5478_s29 }
 0x5de   : > { %2773 = vrot.lane.b32.xlu1 %v5795_v34, %s5475_s26  ;;  %s5487_s26 = smov 16  }
 0x5e2   : > { %2881 = vrot.lane.b32.xlu1 %v5795_v34, %s5482_s16 }
 0x5e6   : > { %2991 = vrot.lane.b32.xlu1 %v5795_v34, %s5479_s12 }
 0x5ea   : > { %3101 = vrot.lane.b32.xlu1 %v5795_v34, %s5480_s13 }
 0x5ee   : > { %3342 = vrot.lane.b32.xlu1 %v5804_v36, %s5476_s28 }
 0x5f2   : > { %3452 = vrot.lane.b32.xlu1 %v5804_v36, %s5481_s15 }
 0x5f6   : > { %3562 = vrot.lane.b32.xlu1 %v5804_v36, %s5478_s29 }
 0x5fa   : > { %1105 = vrot.lane.b32.xlu1 %v5739_v4, %s5484_s23 }
 0x5fe   : > { %1325 = vrot.lane.b32.xlu1 %v5739_v4, %s5485_s25 }
 0x602   : > { %1456 = vrot.lane.b32.xlu1 %v5768_v29, %s5474_s27 }
 0x606   : > { %1676 = vrot.lane.b32.xlu1 %v5768_v29, %s5483_s22 }
 0x60a   : > { %1915 = vrot.lane.b32.xlu1 %v5775_v31, %s5474_s27 }
 0x60e   : > { %2135 = vrot.lane.b32.xlu1 %v5775_v31, %s5483_s22 }
 0x612   : > { %2374 = vrot.lane.b32.xlu1 %v5784_v32, %s5474_s27 }
 0x616   : > { %2594 = vrot.lane.b32.xlu1 %v5784_v32, %s5483_s22 }
 0x61a   : > { %v990_v43 = vpop.xlane.xlu1 %989 }
 0x61b   : > { %5316 = vrcp.f32 %v990_v43 }
 0x61e   : > { %v1044_v44 = vpop.permute.xlu1 %1043 }
 0x622   : > { %v1156_v45 = vpop.permute.xlu1 %1155 }
 0x623   : > { %v1161_v54 = vsel %vm935_vm3, %v1156_v45, 0 }
 0x625   : > { %v5317_v46 = vpop.eup %5316 }
 0x626   : > { %v1154_v48 = vpop.permute.xlu1 %1153  ;;  %v992_v49 = vmul.f32 %v5317_v46, %v5315_v40 }
 0x628   : > { %v993_v50 = vpack.c.bf16 %v992_v49, %v992_v49 }
 0x62a   : > { %4856 = vmatmul.mubr.msk.bf16.vlgmr.msra.gmra.mrb[0].mxu1 %vm935_vm3, %v993_v50  ;;  %v1264_v52 = vpop.permute.xlu1 %1263 }
 0x62b   : > { %4860 = vmatpush3.bf16.xpose.msra.mxu1 %v1051_v51  ;;  %4861 = vmatprep.mubr.msk.bf16.mxu1 %vm5473_vm1, %v5472_v47 }
 0x62c   : > { %4871 = vmatprep.subr.bf16.mxu1 %v5472_v47 }
 0x62e   : > { %v1397_v53 = vpop.permute.xlu1 %1396 }
 0x62f   : > { %v1402_v63 = vsel %vm935_vm3, %v1397_v53, 0 }
 0x632   : > { %4862 = vmatmul.mubr.msk.bf16.vlgmr.msra.gmra.mrb[4].mxu1 %vm935_vm3, %v1044_v44  ;;  %v1507_v56 = vpop.permute.xlu1 %1506 }
 0x633   : > { %4872 = vmatpush3.bf16.xpose.msra.mxu1 %v1161_v54  ;;  %4873 = vmatprep.mubr.msk.bf16.mxu1 %vm5473_vm1, %v5472_v47  ;;  %v1512_v3 = vsel %vm935_vm3, %v1507_v56, 0 }
 0x634   : > { %4883 = vmatprep.subr.bf16.mxu1 %v5472_v47 }
 0x636   : > { %v1505_v57 = vpop.permute.xlu1 %1504 }
 0x63a   : > { %4874 = vmatmul.mubr.msk.bf16.vlgmr.msra.gmra.mrb[8].mxu1 %vm935_vm3, %v1154_v48  ;;  %v1617_v61 = vpop.permute.xlu1 %1616 }
 0x63b   : > { %4884 = vmatpush3.bf16.xpose.msra.mxu1 %v1271_v60  ;;  %4885 = vmatprep.mubr.msk.bf16.mxu1 %vm5473_vm1, %v5472_v47  ;;  %v1622_v6 = vsel %vm935_vm3, %v1617_v61, 0 }
 0x63c   : > { %4895 = vmatprep.subr.bf16.mxu1 %v5472_v47 }
 0x63e   : > { %v1727_v62 = vpop.permute.xlu1 %1726 }
 0x63f   : > { %v1732_v11 = vsel %vm935_vm3, %v1727_v62, 0 }
 0x642   : > { %v1856_v0 = vpop.permute.xlu1 %1855  ;;  %4886 = vmatmul.mubr.msk.bf16.vlgmr.msra.gmra.mrb[12].mxu1 %vm935_vm3, %v1264_v52 }
 0x643   : > { %4896 = vmatpush3.bf16.xpose.msra.mxu1 %v1402_v63  ;;  %4897 = vmatprep.mubr.msk.bf16.mxu1 %vm5473_vm1, %v5472_v47  ;;  %v1861_v15 = vsel %vm935_vm3, %v1856_v0, 0 }
 0x644   : > { %4907 = vmatprep.subr.bf16.mxu1 %v5472_v47 }
 0x646   : > { %v1964_v2 = vpop.permute.xlu1 %1963 }
 0x64a   : > { %v2074_v4 = vpop.permute.xlu1 %2073  ;;  %4898 = vmatmul.mubr.msk.bf16.vlgmr.msra.gmra.mrb[16].mxu1 %vm935_vm3, %v5768_v29 }
 0x64b   : > { %4908 = vmatpush3.bf16.xpose.msra.mxu1 %v1512_v3  ;;  %4909 = vmatprep.mubr.msk.bf16.mxu1 %vm5473_vm1, %v5472_v47 }
 0x64c   : > { %4919 = vmatprep.subr.bf16.mxu1 %v5472_v47 }
 0x64e   : > { %v2184_v5 = vpop.permute.xlu1 %2183 }
 0x652   : > { %v2425_v7 = vpop.permute.xlu1 %2424  ;;  %4910 = vmatmul.mubr.msk.bf16.vlgmr.msra.gmra.mrb[20].mxu1 %vm935_vm3, %v1505_v57 }
 0x653   : > { %4920 = vmatpush3.bf16.xpose.msra.mxu1 %v1622_v6  ;;  %4921 = vmatprep.mubr.msk.bf16.mxu1 %vm5473_vm1, %v5472_v47  ;;  %v2430_v33 = vsel %vm935_vm3, %v2425_v7, 0 }
 0x654   : > { %4931 = vmatprep.subr.bf16.mxu1 %v5472_v47 }
 0x656   : > { %v2535_v9 = vpop.permute.xlu1 %2534 }
 0x657   : > { %v2540_v37 = vsel %vm935_vm3, %v2535_v9, 0 }
 0x65a   : > { %v2645_v12 = vpop.permute.xlu1 %2644  ;;  %4922 = vmatmul.mubr.msk.bf16.vlgmr.msra.gmra.mrb[24].mxu1 %vm935_vm3, %v1615_v10 }
 0x65b   : > { %4932 = vmatpush3.bf16.xpose.msra.mxu1 %v1732_v11  ;;  %4933 = vmatprep.mubr.msk.bf16.mxu1 %vm5473_vm1, %v5472_v47  ;;  %v2650_v39 = vsel %vm935_vm3, %v2645_v12, 0 }
 0x65c   : > { %4943 = vmatprep.subr.bf16.mxu1 %v5472_v47 }
 0x65e   : > { %v2774_v13 = vpop.permute.xlu1 %2773 }
 0x65f   : > { %v2779_v41 = vsel %vm935_vm3, %v2774_v13, 0 }
 0x662   : > { %v5926_v16 = vpop.permute.xlu1 %2881  ;;  %4934 = vmatmul.mubr.msk.bf16.vlgmr.msra.gmra.mrb[28].mxu1 %vm935_vm3, %v1725_v14 }
 0x663   : > { %4944 = vmatpush3.bf16.xpose.msra.mxu1 %v1861_v15  ;;  %4945 = vmatprep.mubr.msk.bf16.mxu1 %vm5473_vm1, %v5472_v47 }
 0x664   : > { %4955 = vmatprep.subr.bf16.mxu1 %v5472_v47 }
 0x666   : > { %v5932_v17 = vpop.permute.xlu1 %2991 }
 0x66a   : > { %v5935_v20 = vpop.permute.xlu1 %3101  ;;  %4946 = vmatmul.mubr.msk.bf16.vlgmr.msra.gmra.mrb[32].mxu1 %vm935_vm3, %v5775_v31  ;;  %v2315_v31 = vpop.permute.xlu0 %2314 }
 0x66b   : > { %4956 = vmatpush3.bf16.xpose.msra.mxu1 %v1971_v19  ;;  %4957 = vmatprep.mubr.msk.bf16.mxu1 %vm5473_vm1, %v5472_v47  ;;  %v2320_v1 = vsel %vm935_vm3, %v2315_v31, 0 }
 0x66c   : > { %4967 = vmatprep.subr.bf16.mxu1 %v5472_v47 }
 0x66e   : > { %v5942_v23 = vpop.permute.xlu1 %3342  ;;  %v2423_v35 = vpop.permute.xlu0 %2422 }
 0x66f   : > { %v3348_v51 = vsel %vm935_vm3, %v5942_v23, 0 }
 0x672   : > { %v5945_v26 = vpop.permute.xlu1 %3452  ;;  %4958 = vmatmul.mubr.msk.bf16.vlgmr.msra.gmra.mrb[36].mxu1 %vm935_vm3, %v1964_v2  ;;  %v2533_v38 = vpop.permute.xlu0 %2532 }
 0x673   : > { %4968 = vmatpush3.bf16.xpose.msra.mxu1 %v2081_v25  ;;  %4969 = vmatprep.mubr.msk.bf16.mxu1 %vm5473_vm1, %v5472_v47  ;;  %v3458_v53 = vsel %vm935_vm3, %v5945_v26, 0 }
 0x674   : > { %4979 = vmatprep.subr.bf16.mxu1 %v5472_v47 }
 0x676   : > { %v5951_v27 = vpop.permute.xlu1 %3562  ;;  %v2643_v40 = vpop.permute.xlu0 %2642 }
 0x677   : > { %v3568_v56 = vsel %vm935_vm3, %v5951_v27, 0 }
 0x67a   : > { %v1106_v29 = vpop.permute.xlu1 %1105  ;;  %4970 = vmatmul.mubr.msk.bf16.vlgmr.msra.gmra.mrb[40].mxu1 %vm935_vm3, %v2074_v4  ;;  %v2884_v42 = vpop.permute.xlu0 %2883 }
 0x67b   : > { %v1111_v30 = vsel %vm999_vm4, %v1106_v29, 0  ;;  %4980 = vmatpush3.bf16.xpose.msra.mxu1 %v2191_v28  ;;  %4981 = vmatprep.mubr.msk.bf16.mxu1 %vm5473_vm1, %v5472_v47  ;;  %v2889_v43 = vsel %vm935_vm3, %v2884_v42, 0 }
 0x67c   : > { %4866 = vmatpush3.bf16.msra.mxu0 %v1111_v30  ;;  %4991 = vmatprep.subr.bf16.mxu1 %v5472_v47 }
 0x67d   : > { %4877 = vmatprep.subr.bf16.mxu0 %v5472_v47 }
 0x67e   : > { %v2994_v44 = vpop.permute.xlu0 %2993 }
 0x67f   : > { %v2999_v45 = vsel %vm935_vm3, %v2994_v44, 0  ;;  %v6068_v44 = vsub.s32 2, %v5729_v59 }
 0x682   : > { %4982 = vmatmul.mubr.msk.bf16.vlgmr.msra.gmra.mrb[44].mxu1 %vm935_vm3, %v2184_v5  ;;  %v3104_v46 = vpop.permute.xlu0 %3103 }
 0x683   : > { %4992 = vmatpush3.bf16.xpose.msra.mxu1 %v2320_v1  ;;  %4993 = vmatprep.mubr.msk.bf16.mxu1 %vm5473_vm1, %v5472_v47  ;;  %v3109_v48 = vsel %vm935_vm3, %v3104_v46, 0 }
 0x684   : > { %5003 = vmatprep.subr.bf16.mxu1 %v5472_v47 }
 0x686   : > { %v3233_v49 = vpop.permute.xlu0 %3232 }
 0x687   : > { %v3238_v50 = vsel %vm935_vm3, %v3233_v49, 0  ;;  %v1853_v49 = vrot.slane %v5758_v21, %v6068_v44 }
 0x68a   : > { %4994 = vmatmul.mubr.msk.bf16.vlgmr.msra.gmra.mrb[48].mxu1 %vm935_vm3, %v5784_v32  ;;  %v3341_v52 = vpop.permute.xlu0 %3340 }
 0x68b   : > { %5004 = vmatpush3.bf16.xpose.msra.mxu1 %v2430_v33  ;;  %5005 = vmatprep.mubr.msk.bf16.mxu1 %vm5473_vm1, %v5472_v47 }
 0x68c   : > { %5015 = vmatprep.subr.bf16.mxu1 %v5472_v47 }
 0x68e   : > { %v3451_v54 = vpop.permute.xlu0 %3450 }
 0x692   : > { %5006 = vmatmul.mubr.msk.bf16.vlgmr.msra.gmra.mrb[52].mxu1 %vm935_vm3, %v2423_v35  ;;  %v3561_v57 = vpop.permute.xlu0 %3560 }
 0x693   : > { %5016 = vmatpush3.bf16.xpose.msra.mxu1 %v2540_v37  ;;  %5017 = vmatprep.mubr.msk.bf16.mxu1 %vm5473_vm1, %v5472_v47 }
 0x694   : > { %5027 = vmatprep.subr.bf16.mxu1 %v5472_v47 }
 0x69a   : > { %5018 = vmatmul.mubr.msk.bf16.vlgmr.msra.gmra.mrb[56].mxu1 %vm935_vm3, %v2533_v38 }
 0x69b   : > { %5028 = vmatpush3.bf16.xpose.msra.mxu1 %v2650_v39  ;;  %5029 = vmatprep.mubr.msk.bf16.mxu1 %vm5473_vm1, %v5472_v47 }
 0x69c   : > { %5039 = vmatprep.subr.bf16.mxu1 %v5472_v47 }
 0x6a2   : > { %5030 = vmatmul.mubr.msk.bf16.vlgmr.msra.gmra.mrb[60].mxu1 %vm935_vm3, %v2643_v40 }
 0x6a3   : > { %5040 = vmatpush3.bf16.xpose.msra.mxu1 %v2779_v41  ;;  %5041 = vmatprep.mubr.msk.bf16.mxu1 %vm5473_vm1, %v5472_v47 }
 0x6a4   : > { %5051 = vmatprep.subr.bf16.mxu1 %v5472_v47 }
 0x6aa   : > { %5042 = vmatmul.mubr.msk.bf16.vlgmr.msra.gmra.mrb[64].mxu1 %vm935_vm3, %v5795_v34 }
 0x6ab   : > { %5052 = vmatpush3.bf16.xpose.msra.mxu1 %v2889_v43  ;;  %5053 = vmatprep.mubr.msk.bf16.mxu1 %vm5473_vm1, %v5472_v47 }
 0x6ac   : > { %5063 = vmatprep.subr.bf16.mxu1 %v5472_v47 }
 0x6b2   : > { %5054 = vmatmul.mubr.msk.bf16.vlgmr.msra.gmra.mrb[68].mxu1 %vm935_vm3, %v5926_v16  ;;  %v1393_v16 = vsub.s32 1, %v5729_v59 }
 0x6b3   : > { %5064 = vmatpush3.bf16.xpose.msra.mxu1 %v2999_v45  ;;  %5065 = vmatprep.mubr.msk.bf16.mxu1 %vm5473_vm1, %v5472_v47 }
 0x6b4   : > { %5075 = vmatprep.subr.bf16.mxu1 %v5472_v47 }
 0x6ba   : > { %5066 = vmatmul.mubr.msk.bf16.vlgmr.msra.gmra.mrb[72].mxu1 %vm935_vm3, %v5932_v17 }
 0x6bb   : > { %5076 = vmatpush3.bf16.xpose.msra.mxu1 %v3109_v48  ;;  %5077 = vmatprep.mubr.msk.bf16.mxu1 %vm5473_vm1, %v5472_v47 }
 0x6bc   : > { %5087 = vmatprep.subr.bf16.mxu1 %v5472_v47 }
 0x6c2   : > { %5078 = vmatmul.mubr.msk.bf16.vlgmr.msra.gmra.mrb[76].mxu1 %vm935_vm3, %v5935_v20  ;;  %v1394_v20 = vrot.slane %v5758_v21, %v1393_v16 }
 0x6c3   : > { %5088 = vmatpush3.bf16.xpose.msra.mxu1 %v3238_v50  ;;  %5089 = vmatprep.mubr.msk.bf16.mxu1 %vm5473_vm1, %v5472_v47 }
 0x6c4   : > { %5099 = vmatprep.subr.bf16.mxu1 %v5472_v47 }
 0x6ca   : > { %5090 = vmatmul.mubr.msk.bf16.vlgmr.msra.gmra.mrb[80].mxu1 %vm935_vm3, %v5804_v36 }
 0x6cb   : > { %5100 = vmatpush3.bf16.xpose.msra.mxu1 %v3348_v51  ;;  %5101 = vmatprep.mubr.msk.bf16.mxu1 %vm5473_vm1, %v5472_v47 }
 0x6cc   : > { %5111 = vmatprep.subr.bf16.mxu1 %v5472_v47 }
 0x6d2   : > { %5102 = vmatmul.mubr.msk.bf16.vlgmr.msra.gmra.mrb[84].mxu1 %vm935_vm3, %v3341_v52 }
 0x6d3   : > { %5112 = vmatpush3.bf16.xpose.msra.mxu1 %v3458_v53  ;;  %5113 = vmatprep.mubr.msk.bf16.mxu1 %vm5473_vm1, %v5472_v47 }
 0x6d4   : > { %5123 = vmatprep.subr.bf16.mxu1 %v5472_v47 }
 0x6da   : > { %5114 = vmatmul.mubr.msk.bf16.vlgmr.msra.gmra.mrb[88].mxu1 %vm935_vm3, %v3451_v54 }
 0x6db   : > { %5124 = vmatpush3.bf16.xpose.msra.mxu1 %v3568_v56  ;;  %5125 = vmatprep.mubr.msk.bf16.mxu1 %vm5473_vm1, %v5472_v47 }
 0x6dc   : > { %5135 = vmatprep.subr.bf16.mxu1 %v5472_v47 }
 0x6e2   : > { %5126 = vmatmul.mubr.msk.bf16.vlgmr.msra.gmra.mrb[92].mxu1 %vm935_vm3, %v3561_v57 }
 0x6e3   : > { %5139 = vmatprep.mubr.msk.bf16.mxu1 %vm5473_vm1, %v5472_v47 }
 0x6fd   : > { %v6032_v58 = vpop.f32.mrb[0].mxu1 }
 0x6fe   : > { %v4857_v60 = vpop.f32.mrb[1].mxu1 }
 0x6ff   : > { %v1040_v61 = vpop.f32.mrb[2].mxu1 }
 0x700   : > { %v4858_v62 = vpop.f32.mrb[3].mxu1 }
 0x705   : > { %v1087_v63 = vpop.f32.mrb[4].mxu1 }
 0x706   : > { %v6035_v0 = vadd.f32 %v1087_v63, %v5761_v22  ;;  %v4863_v2 = vpop.f32.mrb[5].mxu1 }
 0x707   : > { %v1090_v3 = vpop.f32.mrb[6].mxu1 }
 0x708   : > { %v4864_v4 = vpop.f32.mrb[7].mxu1  ;;  %v1093_v5 = vsel %vm935_vm3, %v6035_v0, -inf }
 0x709   : > { %1094 = vmax.xlane.f32.xlu1 %v1093_v5 }
 0x70d   : > { %v1197_v6 = vpop.f32.mrb[8].mxu1 }
 0x70e   : > { %v6040_v7 = vadd.f32 %v1197_v6, %v5761_v22  ;;  %v4875_v9 = vpop.f32.mrb[9].mxu1 }
 0x70f   : > { %v1200_v10 = vpop.f32.mrb[10].mxu1 }
 0x710   : > { %v4876_v11 = vpop.f32.mrb[11].mxu1  ;;  %v1203_v12 = vsel %vm935_vm3, %v6040_v7, -inf }
 0x711   : > { %1204 = vmax.xlane.f32.xlu0 %v1203_v12 }
 0x715   : > { %v1307_v13 = vpop.f32.mrb[12].mxu1 }
 0x716   : > { %v6045_v14 = vadd.f32 %v1307_v13, %v5761_v22  ;;  %v4887_v15 = vpop.f32.mrb[13].mxu1 }
 0x717   : > { %v1310_v17 = vpop.f32.mrb[14].mxu1 }
 0x718   : > { %v4888_v18 = vpop.f32.mrb[15].mxu1  ;;  %v1313_v19 = vsel %vm935_vm3, %v6045_v14, -inf }
 0x719   : > { %1314 = vmax.xlane.f32.xlu0 %v1313_v19 }
 0x71d   : > { %v1438_v23 = vpop.f32.mrb[16].mxu1 }
 0x71e   : > { %v6053_v24 = vadd.f32 %v1438_v23, %v1394_v20  ;;  %v4899_v25 = vpop.f32.mrb[17].mxu1 }
 0x71f   : > { %v1441_v26 = vpop.f32.mrb[18].mxu1 }
 0x720   : > { %v4900_v22 = vpop.f32.mrb[19].mxu1  ;;  %v1444_v27 = vsel %vm935_vm3, %v6053_v24, -inf }
 0x721   : > { %1445 = vmax.xlane.f32.xlu1 %v1444_v27  ;;  %v6086_v22 = vpop.permute.xlu1 %1325 }
 0x725   : > { %v1548_v8 = vpop.f32.mrb[20].mxu1 }
 0x726   : > { %v6057_v28 = vadd.f32 %v1548_v8, %v1394_v20  ;;  %v4911_v29 = vpop.f32.mrb[21].mxu1 }
 0x727   : > { %v1551_v30 = vpop.f32.mrb[22].mxu1 }
 0x728   : > { %v4912_v31 = vpop.f32.mrb[23].mxu1  ;;  %v1554_v1 = vsel %vm935_vm3, %v6057_v28, -inf }
 0x729   : > { %1555 = vmax.xlane.f32.xlu0 %v1554_v1  ;;  %v6090_v31 = vpop.permute.xlu1 %1456  ;;  %v2311_v1 = vsub.s32 3, %v5729_v59 }
 0x72d   : > { %v1658_v33 = vpop.f32.mrb[24].mxu1 }
 0x72e   : > { %v6061_v35 = vadd.f32 %v1658_v33, %v1394_v20  ;;  %v4923_v37 = vpop.f32.mrb[25].mxu1 }
 0x72f   : > { %v1661_v38 = vpop.f32.mrb[26].mxu1 }
 0x730   : > { %v4924_v39 = vpop.f32.mrb[27].mxu1  ;;  %v1664_v40 = vsel %vm935_vm3, %v6061_v35, -inf }
 0x731   : > { %1665 = vmax.xlane.f32.xlu1 %v1664_v40 }
 0x735   : > { %v1768_v41 = vpop.f32.mrb[28].mxu1 }
 0x736   : > { %v6065_v42 = vadd.f32 %v1768_v41, %v1394_v20  ;;  %v4935_v43 = vpop.f32.mrb[29].mxu1  ;;  %v2312_v41 = vrot.slane %v5758_v21, %v2311_v1 }
 0x737   : > { %v1771_v45 = vpop.f32.mrb[30].mxu1  ;;  %v6100_v43 = vpop.permute.xlu1 %1676 }
 0x738   : > { %v4936_v46 = vpop.f32.mrb[31].mxu1  ;;  %v1774_v48 = vsel %vm935_vm3, %v6065_v42, -inf  ;;  %v6102_v45 = vpop.permute.xlu0 %1215 }
 0x739   : > { %1775 = vmax.xlane.f32.xlu0 %v1774_v48  ;;  %v1221_v55 = vsel %vm999_vm4, %v6102_v45, 0 }
 0x73d   : > { %v1897_v50 = vpop.f32.mrb[32].mxu1 }
 0x73e   : > { %v6074_v51 = vadd.f32 %v1897_v50, %v1853_v49  ;;  %v4947_v52 = vpop.f32.mrb[33].mxu1 }
 0x73f   : > { %v1900_v53 = vpop.f32.mrb[34].mxu1 }
 0x740   : > { %v4948_v54 = vpop.f32.mrb[35].mxu1  ;;  %v1903_v56 = vsel %vm935_vm3, %v6074_v51, -inf }
 0x741   : > { %1904 = vmax.xlane.f32.xlu1 %v1903_v56  ;;  %v6108_v54 = vpop.permute.xlu1 %1915 }
 0x745   : > { %v2007_v57 = vpop.f32.mrb[36].mxu1 }
 0x746   : > { %v6078_v60 = vadd.f32 %v2007_v57, %v1853_v49  ;;  %v4959_v61 = vpop.f32.mrb[37].mxu1 }
 0x747   : > { %v2010_v62 = vpop.f32.mrb[38].mxu1  ;;  %v6114_v61 = vpop.permute.xlu0 %1566 }
 0x748   : > { %v4960_v63 = vpop.f32.mrb[39].mxu1  ;;  %v2013_v2 = vsel %vm935_vm3, %v6078_v60, -inf }
 0x749   : > { %2014 = vmax.xlane.f32.xlu0 %v2013_v2  ;;  %v2770_v63 = vsub.s32 4, %v5729_v59 }
 0x74d   : > { %v2117_v3 = vpop.f32.mrb[40].mxu1 }
 0x74e   : > { %v4971_v4 = vpop.f32.mrb[41].mxu1  ;;  %v6088_v30 = vadd.f32 %v2117_v3, %v1853_v49 }
 0x74f   : > { %v2120_v5 = vpop.f32.mrb[42].mxu1  ;;  %v6121_v4 = vpop.permute.xlu1 %2135 }
 0x750   : > { %v4972_v6 = vpop.f32.mrb[43].mxu1 }
 0x752   : > { %2833 = vrot.lane.b32.xlu1 %v5795_v34, %s5474_s27 }
 0x755   : > { %v2227_v9 = vpop.f32.mrb[44].mxu1 }
 0x756   : > { %v4983_v10 = vpop.f32.mrb[45].mxu1  ;;  %v6095_v40 = vadd.f32 %v2227_v9, %v1853_v49  ;;  %v6123_v9 = vpop.permute.xlu0 %1786 }
 0x757   : > { %v2230_v11 = vpop.f32.mrb[46].mxu1 }
 0x758   : > { %v4984_v12 = vpop.f32.mrb[47].mxu1  ;;  %v2233_v50 = vsel %vm935_vm3, %v6095_v40, -inf }
 0x759   : > { %v2771_v12 = vrot.slane %v5758_v21, %v2770_v63 }
 0x75d   : > { %v2356_v13 = vpop.f32.mrb[48].mxu1 }
 0x75e   : > { %v4995_v15 = vpop.f32.mrb[49].mxu1  ;;  %v6104_v46 = vadd.f32 %v2356_v13, %v2312_v41 }
 0x75f   : > { %2704 = vrot.lane.b32.xlu0 %v5784_v32, %s5485_s25  ;;  %v2359_v17 = vpop.f32.mrb[50].mxu1  ;;  %v2123_v32 = vsel %vm935_vm3, %v6088_v30, -inf  ;;  %v6132_v15 = vpop.permute.xlu1 %2374 }
 0x760   : > { %v4996_v18 = vpop.f32.mrb[51].mxu1  ;;  %v2362_v57 = vsel %vm935_vm3, %v6104_v46, -inf }
 0x765   : > { %v2466_v19 = vpop.f32.mrb[52].mxu1 }
 0x766   : > { %v5007_v20 = vpop.f32.mrb[53].mxu1  ;;  %v6110_v56 = vadd.f32 %v2466_v19, %v2312_v41 }
 0x767   : > { %v2469_v23 = vpop.f32.mrb[54].mxu1  ;;  %v6138_v20 = vpop.permute.xlu0 %2025 }
 0x768   : > { %v5008_v25 = vpop.f32.mrb[55].mxu1  ;;  %v2472_v3 = vsel %vm935_vm3, %v6110_v56, -inf }
 0x76d   : > { %v2576_v26 = vpop.f32.mrb[56].mxu1 }
 0x76e   : > { %v5019_v27 = vpop.f32.mrb[57].mxu1  ;;  %v6116_v62 = vadd.f32 %v2576_v26, %v2312_v41 }
 0x76f   : > { %v2579_v8 = vpop.f32.mrb[58].mxu1 }
 0x770   : > { %v5020_v29 = vpop.f32.mrb[59].mxu1  ;;  %v2582_v13 = vsel %vm935_vm3, %v6116_v62, -inf }
 0x771   : > { %v6144_v29 = vpop.permute.xlu1 %2594 }
 0x775   : > { %v2686_v33 = vpop.f32.mrb[60].mxu1 }
 0x776   : > { %2124 = vmax.xlane.f32.xlu1 %v2123_v32  ;;  %v5031_v37 = vpop.f32.mrb[61].mxu1  ;;  %v6125_v11 = vadd.f32 %v2686_v33, %v2312_v41  ;;  %v6146_v33 = vpop.permute.xlu0 %2245 }
 0x777   : > { %v2689_v38 = vpop.f32.mrb[62].mxu1 }
 0x778   : > { %v5032_v39 = vpop.f32.mrb[63].mxu1  ;;  %v2692_v19 = vsel %vm935_vm3, %v6125_v11, -inf }
 0x77d   : > { %v2815_v48 = vpop.f32.mrb[64].mxu1 }
 0x77e   : > { %2234 = vmax.xlane.f32.xlu0 %v2233_v50  ;;  %v5043_v52 = vpop.f32.mrb[65].mxu1  ;;  %v6134_v17 = vadd.f32 %v2815_v48, %v2771_v12  ;;  %v6695_v50 = vsub.s32 5, %v5729_v59 }
 0x77f   : > { %v2818_v53 = vpop.f32.mrb[66].mxu1 }
 0x780   : > { %v5044_v49 = vpop.f32.mrb[67].mxu1  ;;  %v2821_v8 = vsel %vm935_vm3, %v6134_v17, -inf }
 0x782   : > { %2363 = vmax.xlane.f32.xlu0 %v2362_v57 }
 0x785   : > { %v2925_v2 = vpop.f32.mrb[68].mxu1 }
 0x786   : > { %2473 = vmax.xlane.f32.xlu0 %v2472_v3  ;;  %v5055_v5 = vpop.f32.mrb[69].mxu1  ;;  %v6140_v27 = vadd.f32 %v2925_v2, %v2771_v12 }
 0x787   : > { %v2928_v6 = vpop.f32.mrb[70].mxu1  ;;  %v6160_v5 = vpop.permute.xlu0 %2484 }
 0x788   : > { %v5056_v10 = vpop.f32.mrb[71].mxu1  ;;  %v2931_v38 = vsel %vm935_vm3, %v6140_v27, -inf  ;;  %v3230_v6 = vrot.slane %v5758_v21, %v6695_v50 }
 0x78a   : > { %2583 = vmax.xlane.f32.xlu0 %v2582_v13 }
 0x78d   : > { %v3035_v18 = vpop.f32.mrb[72].mxu1 }
 0x78e   : > { %2693 = vmax.xlane.f32.xlu0 %v2692_v19  ;;  %v5067_v23 = vpop.f32.mrb[73].mxu1  ;;  %v6148_v32 = vadd.f32 %v3035_v18, %v2771_v12 }
 0x78f   : > { %v3038_v25 = vpop.f32.mrb[74].mxu1 }
 0x790   : > { %v5068_v26 = vpop.f32.mrb[75].mxu1  ;;  %v3041_v3 = vsel %vm935_vm3, %v6148_v32, -inf }
 0x792   : > { %2822 = vmax.xlane.f32.xlu0 %v2821_v8 }
 0x795   : > { %v3145_v37 = vpop.f32.mrb[76].mxu1 }
 0x796   : > { %v6152_v39 = vadd.f32 %v3145_v37, %v2771_v12  ;;  %v1095_v41 = vpop.xlane.xlu1 %1094  ;;  %2932 = vmax.xlane.f32.xlu0 %v2931_v38  ;;  %v5079_v48 = vpop.f32.mrb[77].mxu1 }
 0x797   : > { %v1096_v52 = vsub.f32 %v6035_v0, %v1095_v41  ;;  %v3148_v53 = vpop.f32.mrb[78].mxu1 }
 0x798   : > { %v5080_v49 = vpop.f32.mrb[79].mxu1  ;;  %v3151_v57 = vsel %vm935_vm3, %v6152_v39, -inf }
 0x799   : > { %v1097_v2 = vmul.f32 1.442695, %v1096_v52  ;;  %3152 = vmax.xlane.f32.xlu1 %v3151_v57 }
 0x79a   : > { %3042 = vmax.xlane.f32.xlu0 %v3041_v3 }
 0x79b   : > { %5318 = vpow2.f32 %v1097_v2 }
 0x79d   : > { %v3274_v10 = vpop.f32.mrb[80].mxu1 }
 0x79e   : > { %v6165_v0 = vadd.f32 %v3274_v10, %v3230_v6  ;;  %v5091_v12 = vpop.f32.mrb[81].mxu1  ;;  %v1205_v13 = vpop.xlane.xlu0 %1204 }
 0x79f   : > { %v1206_v18 = vsub.f32 %v6040_v7, %v1205_v13  ;;  %v3277_v19 = vpop.f32.mrb[82].mxu1 }
 0x7a0   : > { %v5092_v23 = vpop.f32.mrb[83].mxu1  ;;  %v3280_v25 = vsel %vm935_vm3, %v6165_v0, -inf }
 0x7a1   : > { %v1207_v26 = vmul.f32 1.442695, %v1206_v18  ;;  %3281 = vmax.xlane.f32.xlu1 %v3280_v25 }
 0x7a3   : > { %5320 = vpow2.f32 %v1207_v26 }
 0x7a5   : > { %v6170_v8 = vpop.eup %5318  ;;  %v3384_v37 = vpop.f32.mrb[84].mxu1 }
 0x7a6   : > { %v6172_v21 = vadd.f32 %v3384_v37, %v3230_v6  ;;  %v5103_v38 = vpop.f32.mrb[85].mxu1  ;;  %v1315_v41 = vpop.xlane.xlu0 %1314  ;;  %v1099_v48 = vsel %vm935_vm3, %v6170_v8, 0.0 }
 0x7a7   : > { %v1316_v7 = vsub.f32 %v6045_v14, %v1315_v41  ;;  %1100 = vadd.xlane.f32.xlu1 %v1099_v48  ;;  %v3387_v52 = vpop.f32.mrb[86].mxu1 }
 0x7a8   : > { %v5104_v53 = vpop.f32.mrb[87].mxu1  ;;  %v3390_v57 = vsel %vm935_vm3, %v6172_v21, -inf }
 0x7a9   : > { %v1317_v49 = vmul.f32 1.442695, %v1316_v7 }
 0x7ab   : > { %5322 = vpow2.f32 %v1317_v49  ;;  %3391 = vmax.xlane.f32.xlu1 %v3390_v57 }
 0x7ad   : > { %v6179_v2 = vpop.eup %5320  ;;  %v3494_v3 = vpop.f32.mrb[88].mxu1 }
 0x7ae   : > { %v6181_v10 = vadd.f32 %v3494_v3, %v3230_v6  ;;  %v1446_v12 = vpop.xlane.xlu1 %1445  ;;  %v5115_v13 = vpop.f32.mrb[89].mxu1  ;;  %v1209_v18 = vsel %vm935_vm3, %v6179_v2, 0.0 }
 0x7af   : > { %v1447_v14 = vsub.f32 %v6053_v24, %v1446_v12  ;;  %v3497_v19 = vpop.f32.mrb[90].mxu1  ;;  %1210 = vadd.xlane.f32.xlu1 %v1209_v18 }
 0x7b0   : > { %v5116_v23 = vpop.f32.mrb[91].mxu1  ;;  %v3500_v26 = vsel %vm935_vm3, %v6181_v10, -inf }
 0x7b1   : > { %v1448_v25 = vmul.f32 1.442695, %v1447_v14 }
 0x7b3   : > { %5324 = vpow2.f32 %v1448_v25  ;;  %3501 = vmax.xlane.f32.xlu1 %v3500_v26 }
 0x7b5   : > { %v6188_v37 = vpop.eup %5322  ;;  %v3604_v38 = vpop.f32.mrb[92].mxu1 }
 0x7b6   : > { %v6190_v41 = vadd.f32 %v3604_v38, %v3230_v6  ;;  %v5127_v48 = vpop.f32.mrb[93].mxu1  ;;  %v1556_v7 = vpop.xlane.xlu0 %1555  ;;  %v1319_v52 = vsel %vm935_vm3, %v6188_v37, 0.0 }
 0x7b7   : > { %v1557_v24 = vsub.f32 %v6057_v28, %v1556_v7  ;;  %v3607_v53 = vpop.f32.mrb[94].mxu1  ;;  %1320 = vadd.xlane.f32.xlu1 %v1319_v52 }
 0x7b8   : > { %v5128_v49 = vpop.f32.mrb[95].mxu1  ;;  %v3610_v3 = vsel %vm935_vm3, %v6190_v41, -inf }
 0x7b9   : > { %v1558_v57 = vmul.f32 1.442695, %v1557_v24 }
 0x7bb   : > { %5326 = vpow2.f32 %v1558_v57  ;;  %3611 = vmax.xlane.f32.xlu1 %v3610_v3 }
 0x7bd   : > { %v6197_v12 = vpop.eup %5324 }
 0x7be   : > { %v1666_v6 = vpop.xlane.xlu1 %1665  ;;  %v1450_v13 = vsel %vm935_vm3, %v6197_v12, 0.0 }
 0x7bf   : > { %v1667_v18 = vsub.f32 %v6061_v35, %v1666_v6  ;;  %1451 = vadd.xlane.f32.xlu1 %v1450_v13 }
 0x7c1   : > { %v1668_v14 = vmul.f32 1.442695, %v1667_v18 }
 0x7c3   : > { %5328 = vpow2.f32 %v1668_v14 }
 0x7c5   : > { %v6202_v28 = vpop.eup %5326 }
 0x7c6   : > { %v1776_v19 = vpop.xlane.xlu0 %1775  ;;  %v1560_v23 = vsel %vm935_vm3, %v6202_v28, 0.0 }
 0x7c7   : > { %v1777_v25 = vsub.f32 %v6065_v42, %v1776_v19  ;;  %1561 = vadd.xlane.f32.xlu0 %v1560_v23 }
 0x7c9   : > { %v1778_v26 = vmul.f32 1.442695, %v1777_v25 }
 0x7cb   : > { %5330 = vpow2.f32 %v1778_v26 }
 0x7cd   : > { %v6207_v38 = vpop.eup %5328 }
 0x7ce   : > { %v1905_v48 = vpop.xlane.xlu1 %1904  ;;  %v1670_v35 = vsel %vm935_vm3, %v6207_v38, 0.0 }
 0x7cf   : > { %v1906_v7 = vsub.f32 %v6074_v51, %v1905_v48  ;;  %1671 = vadd.xlane.f32.xlu1 %v1670_v35 }
 0x7d1   : > { %v1907_v52 = vmul.f32 1.442695, %v1906_v7 }
 0x7d2   : > { %v6227_v18 = vpop.permute.xlu1 %2833 }
 0x7d3   : > { %5332 = vpow2.f32 %v1907_v52 }
 0x7d5   : > { %v6212_v24 = vpop.eup %5330 }
 0x7d6   : > { %v2015_v53 = vpop.xlane.xlu0 %2014  ;;  %v1780_v42 = vsel %vm935_vm3, %v6212_v24, 0.0 }
 0x7d7   : > { %v2016_v49 = vsub.f32 %v6078_v60, %v2015_v53  ;;  %1781 = vadd.xlane.f32.xlu0 %v1780_v42 }
 0x7d9   : > { %v2017_v57 = vmul.f32 1.442695, %v2016_v49 }
 0x7da   : > { %v6230_v23 = vpop.permute.xlu0 %2704 }
 0x7db   : > { %5334 = vpow2.f32 %v2017_v57 }
 0x7dd   : > { %v6217_v3 = vpop.eup %5332 }
 0x7de   : > { %v1909_v6 = vsel %vm935_vm3, %v6217_v3, 0.0 }
 0x7df   : > { %1910 = vadd.xlane.f32.xlu0 %v1909_v6 }
 0x7e0   : > { %3053 = vrot.lane.b32.xlu1 %v5795_v34, %s5483_s22 }
 0x7e5   : > { %v6223_v51 = vpop.eup %5334 }
 0x7e6   : > { %v2019_v13 = vsel %vm935_vm3, %v6223_v51, 0.0 }
 0x7e7   : > { %2020 = vadd.xlane.f32.xlu0 %v2019_v13 }
 0x803   : > { %v2125_v60 = vpop.xlane.xlu1 %2124 }
 0x804   : > { %v2126_v14 = vsub.f32 %v6088_v30, %v2125_v60 }
 0x806   : > { %v2127_v19 = vmul.f32 1.442695, %v2126_v14 }
 0x808   : > { %5336 = vpow2.f32 %v2127_v19 }
 0x80b   : > { %v2235_v25 = vpop.xlane.xlu0 %2234 }
 0x80c   : > { %v2236_v26 = vsub.f32 %v6095_v40, %v2235_v25 }
 0x80e   : > { %v2237_v48 = vmul.f32 1.442695, %v2236_v26 }
 0x80f   : > { %v2364_v35 = vpop.xlane.xlu0 %2363 }
 0x810   : > { %5338 = vpow2.f32 %v2237_v48  ;;  %v2365_v7 = vsub.f32 %v6104_v46, %v2364_v35 }
 0x812   : > { %v6234_v52 = vpop.eup %5336  ;;  %v2366_v53 = vmul.f32 1.442695, %v2365_v7 }
 0x813   : > { %v2474_v42 = vpop.xlane.xlu0 %2473  ;;  %v2129_v49 = vsel %vm935_vm3, %v6234_v52, 0.0 }
 0x814   : > { %5340 = vpow2.f32 %v2366_v53  ;;  %2130 = vadd.xlane.f32.xlu0 %v2129_v49 }
 0x817   : > { %v2584_v30 = vpop.xlane.xlu0 %2583 }
 0x818   : > { %v2585_v57 = vsub.f32 %v6116_v62, %v2584_v30 }
 0x81a   : > { %v6239_v6 = vpop.eup %5338  ;;  %v2586_v40 = vmul.f32 1.442695, %v2585_v57 }
 0x81b   : > { %v2694_v13 = vpop.xlane.xlu0 %2693  ;;  %v2239_v60 = vsel %vm935_vm3, %v6239_v6, 0.0 }
 0x81c   : > { %5342 = vpow2.f32 %v2586_v40  ;;  %2240 = vadd.xlane.f32.xlu0 %v2239_v60 }
 0x81e   : > { %v6243_v46 = vpop.eup %5340 }
 0x81f   : > { %v2823_v14 = vpop.xlane.xlu0 %2822  ;;  %v2368_v19 = vsel %vm935_vm3, %v6243_v46, 0.0 }
 0x820   : > { %v2824_v25 = vsub.f32 %v6134_v17, %v2823_v14  ;;  %2369 = vadd.xlane.f32.xlu0 %v2368_v19 }
 0x822   : > { %v2825_v26 = vmul.f32 1.442695, %v2824_v25 }
 0x823   : > { %v2933_v62 = vpop.xlane.xlu0 %2932 }
 0x824   : > { %5344 = vpow2.f32 %v2825_v26 }
 0x826   : > { %v6248_v48 = vpop.eup %5342  ;;  %v3153_v30 = vpop.xlane.xlu1 %3152 }
 0x827   : > { %v3043_v35 = vpop.xlane.xlu0 %3042  ;;  %v2588_v7 = vsel %vm935_vm3, %v6248_v48, 0.0  ;;  %v3154_v45 = vsub.f32 %v6152_v39, %v3153_v30 }
 0x828   : > { %v3044_v53 = vsub.f32 %v6148_v32, %v3043_v35  ;;  %2589 = vadd.xlane.f32.xlu1 %v2588_v7  ;;  %v2475_v35 = vsub.f32 %v6110_v56, %v2474_v42 }
 0x82a   : > { %v3045_v49 = vmul.f32 1.442695, %v3044_v53 }
 0x82c   : > { %5346 = vpow2.f32 %v3045_v49 }
 0x82e   : > { %v6253_v57 = vpop.eup %5344  ;;  %v6257_v40 = vpop.xlane.xlu1 %3281 }
 0x82f   : > { %v2827_v17 = vsel %vm935_vm3, %v6253_v57, 0.0 }
 0x830   : > { %2828 = vadd.xlane.f32.xlu1 %v2827_v17  ;;  %v2476_v17 = vmul.f32 1.442695, %v2475_v35 }
 0x834   : > { %v1101_v60 = vpop.xlane.xlu1 %1100 }
 0x835   : > { %5348 = vrcp.f32 %v1101_v60  ;;  %v2695_v60 = vsub.f32 %v6125_v11, %v2694_v13 }
 0x836   : > { %v6259_v14 = vpop.eup %5346  ;;  %2943 = vrot.lane.b32.xlu0 %v5795_v34, %s5484_s23 }
 0x837   : > { %v3047_v32 = vsel %vm935_vm3, %v6259_v14, 0.0  ;;  %v2696_v56 = vmul.f32 1.442695, %v2695_v60 }
 0x838   : > { %v6265_v19 = vpop.xlane.xlu1 %3391  ;;  %3048 = vadd.xlane.f32.xlu1 %v3047_v32 }
 0x83c   : > { %v1211_v25 = vpop.xlane.xlu1 %1210 }
 0x83d   : > { %5350 = vrcp.f32 %v1211_v25  ;;  %v1331_v25 = vsel %vm999_vm4, %v6086_v22, 0 }
 0x83f   : > { %v5349_v26 = vpop.eup %5348 }
 0x840   : > { %v1103_v7 = vmul.f32 %v5349_v26, %v6170_v8  ;;  %v6269_v53 = vpop.xlane.xlu1 %3501  ;;  %v2934_v8 = vsub.f32 %v6140_v27, %v2933_v62  ;;  %v3155_v27 = vmul.f32 1.442695, %v3154_v45 }
 0x842   : > { %v1104_v49 = vpack.c.bf16 %v1103_v7, %v1103_v7  ;;  %v1462_v7 = vsel %vm999_vm4, %v6090_v31, 0 }
 0x844   : > { %4868 = vmatmul.mubr.msk.bf16.vlgmr.msra.gmra.mrb[16].mxu0 %vm935_vm3, %v1104_v49  ;;  %v1321_v50 = vpop.xlane.xlu1 %1320 }
 0x845   : > { %4878 = vmatpush3.bf16.msra.mxu0 %v1221_v55  ;;  %4879 = vmatprep.mubr.msk.bf16.mxu0 %vm5473_vm1, %v5472_v47  ;;  %5352 = vrcp.f32 %v1321_v50  ;;  %v2935_v55 = vmul.f32 1.442695, %v2934_v8 }
 0x846   : > { %4889 = vmatprep.subr.bf16.mxu0 %v5472_v47  ;;  %5354 = vpow2.f32 %v2476_v17 }
 0x847   : > { %v5351_v42 = vpop.eup %5350  ;;  %5356 = vpow2.f32 %v2696_v56 }
 0x848   : > { %v6279_v32 = vpop.xlane.xlu1 %3611  ;;  %v1213_v11 = vmul.f32 %v5351_v42, %v6179_v2 }
 0x849   : > { %3292 = vrot.lane.b32.xlu1 %v5804_v36, %s5474_s27  ;;  %s5486_s27 = smov 8  }
 0x84a   : > { %v1214_v13 = vpack.c.bf16 %v1213_v11, %v1213_v11 }
 0x84c   : > { %v1452_v50 = vpop.xlane.xlu1 %1451  ;;  %4880 = vmatmul.mubr.msk.bf16.vlgmr.msra.gmra.mrb[20].mxu0 %vm935_vm3, %v1214_v13 }
 0x84d   : > { %4890 = vmatpush3.bf16.msra.mxu0 %v1331_v25  ;;  %5358 = vrcp.f32 %v1452_v50  ;;  %4891 = vmatprep.mubr.msk.bf16.mxu0 %vm5473_vm1, %v5472_v47  ;;  %v1682_v50 = vsel %vm999_vm4, %v6100_v43, 0  ;;  %v1792_v43 = vsel %vm999_vm4, %v6123_v9, 0 }
 0x84e   : > { %5360 = vpow2.f32 %v2935_v55  ;;  %4901 = vmatprep.subr.bf16.mxu0 %v5472_v47 }
 0x84f   : > { %v5353_v2 = vpop.eup %5352  ;;  %5362 = vpow2.f32 %v3155_v27 }
 0x850   : > { %v6291_v62 = vpop.eup %5354  ;;  %v1323_v39 = vmul.f32 %v5353_v2, %v6188_v37  ;;  %v3283_v37 = vsub.f32 %v6165_v0, %v6257_v40  ;;  %v1572_v0 = vsel %vm999_vm4, %v6114_v61, 0 }
 0x851   : > { %v2478_v22 = vsel %vm935_vm3, %v6291_v62, 0.0  ;;  %v6296_v35 = vpop.eup %5356 }
 0x852   : > { %v1324_v30 = vpack.c.bf16 %v1323_v39, %v1323_v39  ;;  %v2698_v17 = vsel %vm935_vm3, %v6296_v35, 0.0  ;;  %v3284_v56 = vmul.f32 1.442695, %v3283_v37  ;;  %v1921_v37 = vsel %vm999_vm4, %v6108_v54, 0 }
 0x854   : > { %v1562_v26 = vpop.xlane.xlu0 %1561  ;;  %4892 = vmatmul.mubr.msk.bf16.vlgmr.msra.gmra.mrb[24].mxu0 %vm935_vm3, %v1324_v30 }
 0x855   : > { %5364 = vrcp.f32 %v1562_v26  ;;  %2479 = vadd.xlane.f32.xlu0 %v2478_v22  ;;  %4902 = vmatpush3.bf16.msra.mxu0 %v1462_v7 }
 0x856   : > { %4903 = vmatprep.mubr.msk.bf16.mxu0 %vm5473_vm1, %v5472_v47  ;;  %4913 = vmatprep.subr.bf16.mxu0 %v5472_v47 }
 0x857   : > { %v5359_v49 = vpop.eup %5358 }
 0x858   : > { %v6308_v60 = vpop.eup %5360  ;;  %v1454_v31 = vmul.f32 %v5359_v49, %v6197_v12 }
 0x859   : > { %2699 = vadd.xlane.f32.xlu0 %v2698_v17  ;;  %v2937_v11 = vsel %vm935_vm3, %v6308_v60, 0.0  ;;  %v6313_v55 = vpop.eup %5362  ;;  %v2031_v17 = vsel %vm999_vm4, %v6138_v20, 0  ;;  %v3613_v20 = vsub.f32 %v6190_v41, %v6279_v32 }
 0x85a   : > { %v1455_v8 = vpack.c.bf16 %v1454_v31, %v1454_v31  ;;  %v3157_v45 = vsel %vm935_vm3, %v6313_v55, 0.0 }
 0x85c   : > { %v1672_v42 = vpop.xlane.xlu1 %1671  ;;  %4904 = vmatmul.mubr.msk.bf16.vlgmr.msra.gmra.mrb[28].mxu0 %vm935_vm3, %v1455_v8  ;;  %v2141_v8 = vsel %vm999_vm4, %v6121_v4, 0 }
 0x85d   : > { %5366 = vrcp.f32 %v1672_v42  ;;  %2938 = vadd.xlane.f32.xlu0 %v2937_v11  ;;  %4914 = vmatpush3.bf16.msra.mxu0 %v1572_v0 }
 0x85e   : > { %4915 = vmatprep.mubr.msk.bf16.mxu0 %vm5473_vm1, %v5472_v47  ;;  %5368 = vpow2.f32 %v3284_v56  ;;  %4925 = vmatprep.subr.bf16.mxu0 %v5472_v47 }
 0x85f   : > { %v5365_v12 = vpop.eup %5364 }
 0x860   : > { %v1564_v40 = vmul.f32 %v5365_v12, %v6202_v28 }
 0x861   : > { %3158 = vadd.xlane.f32.xlu0 %v3157_v45 }
 0x862   : > { %v1565_v13 = vpack.c.bf16 %v1564_v40, %v1564_v40 }
 0x864   : > { %v1782_v61 = vpop.xlane.xlu0 %1781  ;;  %4916 = vmatmul.mubr.msk.bf16.vlgmr.msra.gmra.mrb[32].mxu0 %vm935_vm3, %v1565_v13 }
 0x865   : > { %5370 = vrcp.f32 %v1782_v61  ;;  %4926 = vmatpush3.bf16.msra.mxu0 %v1682_v50  ;;  %4927 = vmatprep.mubr.msk.bf16.mxu0 %vm5473_vm1, %v5472_v47  ;;  %v2251_v61 = vsel %vm999_vm4, %v6146_v33, 0 }
 0x866   : > { %4937 = vmatprep.subr.bf16.mxu0 %v5472_v47 }
 0x867   : > { %v5367_v25 = vpop.eup %5366 }
 0x868   : > { %v1674_v28 = vmul.f32 %v5367_v25, %v6207_v38  ;;  %v6331_v27 = vpop.eup %5368 }
 0x869   : > { %v3286_v30 = vsel %vm935_vm3, %v6331_v27, 0.0 }
 0x86a   : > { %v1675_v2 = vpack.c.bf16 %v1674_v28, %v1674_v28 }
 0x86c   : > { %v1911_v39 = vpop.xlane.xlu0 %1910  ;;  %4928 = vmatmul.mubr.msk.bf16.vlgmr.msra.gmra.mrb[36].mxu0 %vm935_vm3, %v1675_v2  ;;  %v2380_v2 = vsel %vm999_vm4, %v6132_v15, 0 }
 0x86d   : > { %5372 = vrcp.f32 %v1911_v39  ;;  %3287 = vadd.xlane.f32.xlu1 %v3286_v30  ;;  %4938 = vmatpush3.bf16.msra.mxu0 %v1792_v43  ;;  %v2490_v39 = vsel %vm999_vm4, %v6160_v5, 0 }
 0x86e   : > { %4939 = vmatprep.mubr.msk.bf16.mxu0 %vm5473_vm1, %v5472_v47  ;;  %4949 = vmatprep.subr.bf16.mxu0 %v5472_v47 }
 0x86f   : > { %v5371_v26 = vpop.eup %5370 }
 0x870   : > { %v1784_v38 = vmul.f32 %v5371_v26, %v6212_v24 }
 0x872   : > { %v1785_v22 = vpack.c.bf16 %v1784_v38, %v1784_v38 }
 0x874   : > { %v2021_v7 = vpop.xlane.xlu0 %2020  ;;  %4940 = vmatmul.mubr.msk.bf16.vlgmr.msra.gmra.mrb[40].mxu0 %vm935_vm3, %v1785_v22 }
 0x875   : > { %5374 = vrcp.f32 %v2021_v7  ;;  %4950 = vmatpush3.bf16.msra.mxu0 %v1921_v37  ;;  %4951 = vmatprep.mubr.msk.bf16.mxu0 %vm5473_vm1, %v5472_v47  ;;  %v2600_v7 = vsel %vm999_vm4, %v6144_v29, 0 }
 0x876   : > { %4961 = vmatprep.subr.bf16.mxu0 %v5472_v47 }
 0x877   : > { %v5373_v9 = vpop.eup %5372  ;;  %3163 = vrot.lane.b32.xlu0 %v5795_v34, %s5485_s25  ;;  %v3393_v34 = vsub.f32 %v6172_v21, %v6265_v19  ;;  %v3614_v21 = vmul.f32 1.442695, %v3613_v20 }
 0x878   : > { %v1913_v24 = vmul.f32 %v5373_v9, %v6217_v3 }
 0x879   : > { %v3394_v56 = vmul.f32 1.442695, %v3393_v34  ;;  %v2839_v34 = vsel %vm999_vm4, %v6227_v18, 0 }
 0x87a   : > { %v1914_v49 = vpack.c.bf16 %v1913_v24, %v1913_v24 }
 0x87b   : > { %5376 = vpow2.f32 %v3394_v56 }
 0x87c   : > { %4952 = vmatmul.mubr.msk.bf16.vlgmr.msra.gmra.mrb[44].mxu0 %vm935_vm3, %v1914_v49  ;;  %5378 = vpow2.f32 %v3614_v21  ;;  %v2710_v49 = vsel %vm999_vm4, %v6230_v23, 0 }
 0x87d   : > { %4962 = vmatpush3.bf16.msra.mxu0 %v2031_v17  ;;  %4963 = vmatprep.mubr.msk.bf16.mxu0 %vm5473_vm1, %v5472_v47 }
 0x87e   : > { %3402 = vrot.lane.b32.xlu1 %v5804_v36, %s5484_s23  ;;  %4973 = vmatprep.subr.bf16.mxu0 %v5472_v47 }
 0x87f   : > { %v5375_v54 = vpop.eup %5374 }
 0x880   : > { %v2023_v3 = vmul.f32 %v5375_v54, %v6223_v51  ;;  %v3503_v51 = vsub.f32 %v6181_v10, %v6269_v53 }
 0x882   : > { %v2024_v31 = vpack.c.bf16 %v2023_v3, %v2023_v3  ;;  %v3504_v19 = vmul.f32 1.442695, %v3503_v51 }
 0x884   : > { %4964 = vmatmul.mubr.msk.bf16.vlgmr.msra.gmra.mrb[48].mxu0 %vm935_vm3, %v2024_v31  ;;  %5380 = vpow2.f32 %v3504_v19 }
 0x885   : > { %4974 = vmatpush3.bf16.msra.mxu0 %v2141_v8  ;;  %4975 = vmatprep.mubr.msk.bf16.mxu0 %vm5473_vm1, %v5472_v47  ;;  %v6372_v42 = vpop.eup %5376 }
 0x886   : > { %4985 = vmatprep.subr.bf16.mxu0 %v5472_v47  ;;  %v3396_v4 = vsel %vm935_vm3, %v6372_v42, 0.0  ;;  %v6376_v41 = vpop.eup %5378 }
 0x887   : > { %v3616_v32 = vsel %vm935_vm3, %v6376_v41, 0.0 }
 0x88e   : > { %v6380_v11 = vpop.eup %5380 }
 0x88f   : > { %v3506_v10 = vsel %vm935_vm3, %v6380_v11, 0.0 }
 0x896   : > { %3397 = vadd.xlane.f32.xlu0 %v3396_v4 }
 0x89a   : > { %3617 = vadd.xlane.f32.xlu0 %v3616_v32 }
 0x8a1   : > { %v2131_v0 = vpop.xlane.xlu0 %2130 }
 0x8a2   : > { %5382 = vrcp.f32 %v2131_v0  ;;  %3507 = vadd.xlane.f32.xlu1 %v3506_v10 }
 0x8a9   : > { %v2241_v53 = vpop.xlane.xlu0 %2240 }
 0x8aa   : > { %5384 = vrcp.f32 %v2241_v53 }
 0x8ac   : > { %v5383_v12 = vpop.eup %5382 }
 0x8ad   : > { %v2133_v40 = vmul.f32 %v5383_v12, %v6234_v52  ;;  %v2370_v45 = vpop.xlane.xlu0 %2369 }
 0x8ae   : > { %5386 = vrcp.f32 %v2370_v45 }
 0x8af   : > { %v2134_v13 = vpack.c.bf16 %v2133_v40, %v2133_v40 }
 0x8b0   : > { %3512 = vrot.lane.b32.xlu0 %v5804_v36, %s5483_s22 }
 0x8b1   : > { %4976 = vmatmul.mubr.msk.bf16.vlgmr.msra.gmra.mrb[52].mxu0 %vm935_vm3, %v2134_v13  ;;  %v2944_v15 = vpop.permute.xlu0 %2943 }
 0x8b2   : > { %4986 = vmatpush3.bf16.msra.mxu0 %v2251_v61  ;;  %4987 = vmatprep.mubr.msk.bf16.mxu0 %vm5473_vm1, %v5472_v47  ;;  %v2949_v56 = vsel %vm999_vm4, %v2944_v15, 0 }
 0x8b3   : > { %3622 = vrot.lane.b32.xlu1 %v5804_v36, %s5485_s25  ;;  %4997 = vmatprep.subr.bf16.mxu0 %v5472_v47 }
 0x8b4   : > { %v5385_v52 = vpop.eup %5384 }
 0x8b5   : > { %v2243_v50 = vmul.f32 %v5385_v52, %v6239_v6  ;;  %v3054_v6 = vpop.permute.xlu1 %3053 }
 0x8b6   : > { %v3059_v51 = vsel %vm999_vm4, %v3054_v6, 0 }
 0x8b7   : > { %v2244_v25 = vpack.c.bf16 %v2243_v50, %v2243_v50 }
 0x8b8   : > { %v5387_v28 = vpop.eup %5386 }
 0x8b9   : > { %4988 = vmatmul.mubr.msk.bf16.vlgmr.msra.gmra.mrb[56].mxu0 %vm935_vm3, %v2244_v25  ;;  %v2372_v33 = vmul.f32 %v5387_v28, %v6243_v46  ;;  %v2590_v43 = vpop.xlane.xlu1 %2589 }
 0x8ba   : > { %4998 = vmatpush3.bf16.msra.mxu0 %v2380_v2  ;;  %4999 = vmatprep.mubr.msk.bf16.mxu0 %vm5473_vm1, %v5472_v47 }
 0x8bb   : > { %5009 = vmatprep.subr.bf16.mxu0 %v5472_v47  ;;  %v2373_v36 = vpack.c.bf16 %v2372_v33, %v2372_v33 }
 0x8bd   : > { %v2829_v9 = vpop.xlane.xlu1 %2828 }
 0x8c1   : > { %5000 = vmatmul.mubr.msk.bf16.vlgmr.msra.gmra.mrb[60].mxu0 %vm935_vm3, %v2373_v36 }
 0x8c2   : > { %5010 = vmatpush3.bf16.msra.mxu0 %v2490_v39  ;;  %5011 = vmatprep.mubr.msk.bf16.mxu0 %vm5473_vm1, %v5472_v47 }
 0x8c3   : > { %5021 = vmatprep.subr.bf16.mxu0 %v5472_v47 }
 0x8c5   : > { %v3049_v3 = vpop.xlane.xlu1 %3048 }
 0x8e2   : > { %v2480_v30 = vpop.xlane.xlu0 %2479 }
 0x8e3   : > { %5388 = vrcp.f32 %v2480_v30 }
 0x8e4   : > { %5390 = vrcp.f32 %v2590_v43 }
 0x8e6   : > { %v2700_v46 = vpop.xlane.xlu0 %2699 }
 0x8e7   : > { %5392 = vrcp.f32 %v2700_v46 }
 0x8e8   : > { %5394 = vrcp.f32 %v2829_v9 }
 0x8ea   : > { %v2939_v17 = vpop.xlane.xlu0 %2938 }
 0x8eb   : > { %5396 = vrcp.f32 %v2939_v17 }
 0x8ec   : > { %5398 = vrcp.f32 %v3049_v3 }
 0x8ed   : > { %v5389_v26 = vpop.eup %5388 }
 0x8ee   : > { %v2482_v38 = vmul.f32 %v5389_v26, %v6291_v62  ;;  %v5391_v22 = vpop.eup %5390  ;;  %v3159_v20 = vpop.xlane.xlu0 %3158 }
 0x8ef   : > { %v2592_v37 = vmul.f32 %v5391_v22, %v6248_v48  ;;  %5400 = vrcp.f32 %v3159_v20  ;;  %v5307_v20 = vld [vmem:[%s5576_s30 + $0x8] sm:$0xff]  }
 0x8f0   : > { %v2483_v5 = vpack.c.bf16 %v2482_v38, %v2482_v38 }
 0x8f1   : > { %v2593_v24 = vpack.c.bf16 %v2592_v37, %v2592_v37  ;;  %v5393_v62 = vpop.eup %5392 }
 0x8f2   : > { %5012 = vmatmul.mubr.msk.bf16.vlgmr.msra.gmra.mrb[64].mxu0 %vm935_vm3, %v2483_v5  ;;  %v2702_v29 = vmul.f32 %v5393_v62, %v6296_v35  ;;  %v5395_v54 = vpop.eup %5394 }
 0x8f3   : > { %5022 = vmatpush3.bf16.msra.mxu0 %v2600_v7  ;;  %5023 = vmatprep.mubr.msk.bf16.mxu0 %vm5473_vm1, %v5472_v47  ;;  %v2831_v23 = vmul.f32 %v5395_v54, %v6253_v57  ;;  %v3293_v57 = vpop.permute.xlu1 %3292 }
 0x8f4   : > { %5033 = vmatprep.subr.bf16.mxu0 %v5472_v47  ;;  %v2703_v48 = vpack.c.bf16 %v2702_v29, %v2702_v29  ;;  %v3298_v25 = vsel %vm999_vm4, %v3293_v57, 0  ;;  %v5306_v29 = vld [vmem:[%s5576_s30] sm:$0xff]   ;;  %s5488_s30 = smov 24  }
 0x8f5   : > { %v2832_v35 = vpack.c.bf16 %v2831_v23, %v2831_v23  ;;  %v5397_v31 = vpop.eup %5396  ;;  %5136 = vmatpush3.bf16.msra.mxu1 %v5306_v29 }
 0x8f6   : > { %v2941_v18 = vmul.f32 %v5397_v31, %v6308_v60  ;;  %v5399_v21 = vpop.eup %5398  ;;  %v3164_v60 = vpop.permute.xlu0 %3163  ;;  %5137 = vmatprep.subr.bf16.mxu1 %v5472_v47 }
 0x8f7   : > { %v3051_v19 = vmul.f32 %v5399_v21, %v6259_v14  ;;  %v3169_v40 = vsel %vm999_vm4, %v3164_v60, 0 }
 0x8f8   : > { %v2942_v8 = vpack.c.bf16 %v2941_v18, %v2941_v18 }
 0x8f9   : > { %v3052_v10 = vpack.c.bf16 %v3051_v19, %v3051_v19  ;;  %v5401_v53 = vpop.eup %5400  ;;  %5138 = vmatpush3.bf16.msra.mxu1 %v5307_v20 }
 0x8fa   : > { %5024 = vmatmul.mubr.msk.bf16.vlgmr.msra.gmra.mrb[68].mxu0 %vm935_vm3, %v2593_v24  ;;  %v3288_v4 = vpop.xlane.xlu1 %3287  ;;  %v3161_v14 = vmul.f32 %v5401_v53, %v6313_v55  ;;  %5167 = vmatprep.subr.bf16.mxu1 %v5472_v47 }
 0x8fb   : > { %5034 = vmatpush3.bf16.msra.mxu0 %v2710_v49  ;;  %5035 = vmatprep.mubr.msk.bf16.mxu0 %vm5473_vm1, %v5472_v47  ;;  %5402 = vrcp.f32 %v3288_v4 }
 0x8fc   : > { %5045 = vmatprep.subr.bf16.mxu0 %v5472_v47  ;;  %v3162_v61 = vpack.c.bf16 %v3161_v14, %v3161_v14 }
 0x8fe   : > { %v3403_v36 = vpop.permute.xlu1 %3402 }
 0x8ff   : > { %v3408_v30 = vsel %vm999_vm4, %v3403_v36, 0 }
 0x902   : > { %5036 = vmatmul.mubr.msk.bf16.vlgmr.msra.gmra.mrb[72].mxu0 %vm935_vm3, %v2703_v48 }
 0x903   : > { %5046 = vmatpush3.bf16.msra.mxu0 %v2839_v34  ;;  %5047 = vmatprep.mubr.msk.bf16.mxu0 %vm5473_vm1, %v5472_v47 }
 0x904   : > { %5057 = vmatprep.subr.bf16.mxu0 %v5472_v47 }
 0x905   : > { %v5403_v52 = vpop.eup %5402 }
 0x906   : > { %v3290_v55 = vmul.f32 %v5403_v52, %v6331_v27 }
 0x908   : > { %v3291_v15 = vpack.c.bf16 %v3290_v55, %v3290_v55 }
 0x90a   : > { %5048 = vmatmul.mubr.msk.bf16.vlgmr.msra.gmra.mrb[76].mxu0 %vm935_vm3, %v2832_v35 }
 0x90b   : > { %5058 = vmatpush3.bf16.msra.mxu0 %v2949_v56  ;;  %5059 = vmatprep.mubr.msk.bf16.mxu0 %vm5473_vm1, %v5472_v47 }
 0x90c   : > { %5069 = vmatprep.subr.bf16.mxu0 %v5472_v47 }
 0x912   : > { %5060 = vmatmul.mubr.msk.bf16.vlgmr.msra.gmra.mrb[80].mxu0 %vm935_vm3, %v2942_v8 }
 0x913   : > { %5070 = vmatpush3.bf16.msra.mxu0 %v3059_v51  ;;  %5071 = vmatprep.mubr.msk.bf16.mxu0 %vm5473_vm1, %v5472_v47 }
 0x914   : > { %5081 = vmatprep.subr.bf16.mxu0 %v5472_v47 }
 0x917   : > { %v6443_v32 = vpop.f32.mrb[16].mxu0 }
 0x918   : > { %v4869_v0 = vpop.f32.mrb[17].mxu0 }
 0x919   : > { %v1150_v12 = vpop.f32.mrb[18].mxu0 }
 0x91a   : > { %v4870_v45 = vpop.f32.mrb[19].mxu0  ;;  %5072 = vmatmul.mubr.msk.bf16.vlgmr.msra.gmra.mrb[84].mxu0 %vm935_vm3, %v3052_v10 }
 0x91b   : > { %5082 = vmatpush3.bf16.msra.mxu0 %v3169_v40  ;;  %5083 = vmatprep.mubr.msk.bf16.mxu0 %vm5473_vm1, %v5472_v47 }
 0x91c   : > { %5093 = vmatprep.subr.bf16.mxu0 %v5472_v47 }
 0x91f   : > { %v6451_v13 = vpop.f32.mrb[20].mxu0 }
 0x920   : > { %v4881_v50 = vpop.f32.mrb[21].mxu0 }
 0x921   : > { %v1260_v28 = vpop.f32.mrb[22].mxu0 }
 0x922   : > { %5084 = vmatmul.mubr.msk.bf16.vlgmr.msra.gmra.mrb[88].mxu0 %vm935_vm3, %v3162_v61  ;;  %v4882_v2 = vpop.f32.mrb[23].mxu0 }
 0x923   : > { %5094 = vmatpush3.bf16.msra.mxu0 %v3298_v25  ;;  %v3398_v33 = vpop.xlane.xlu0 %3397  ;;  %5095 = vmatprep.mubr.msk.bf16.mxu0 %vm5473_vm1, %v5472_v47 }
 0x924   : > { %5404 = vrcp.f32 %v3398_v33  ;;  %5105 = vmatprep.subr.bf16.mxu0 %v5472_v47 }
 0x927   : > { %v6459_v39 = vpop.f32.mrb[24].mxu0  ;;  %v3618_v43 = vpop.xlane.xlu0 %3617 }
 0x928   : > { %v4893_v6 = vpop.f32.mrb[25].mxu0 }
 0x929   : > { %v1370_v46 = vpop.f32.mrb[26].mxu0 }
 0x92a   : > { %5096 = vmatmul.mubr.msk.bf16.vlgmr.msra.gmra.mrb[92].mxu0 %vm935_vm3, %v3291_v15  ;;  %v4894_v26 = vpop.f32.mrb[27].mxu0 }
 0x92b   : > { %5106 = vmatpush3.bf16.msra.mxu0 %v3408_v30  ;;  %5107 = vmatprep.mubr.msk.bf16.mxu0 %vm5473_vm1, %v5472_v47  ;;  %v3513_v22 = vpop.permute.xlu0 %3512 }
 0x92c   : > { %5117 = vmatprep.subr.bf16.mxu0 %v5472_v47  ;;  %v3518_v62 = vsel %vm999_vm4, %v3513_v22, 0 }
 0x92e   : > { %v5405_v27 = vpop.eup %5404 }
 0x92f   : > { %v3400_v38 = vmul.f32 %v5405_v27, %v6372_v42  ;;  %v3508_v5 = vpop.xlane.xlu1 %3507  ;;  %v6467_v7 = vpop.f32.mrb[28].mxu0 }
 0x930   : > { %5406 = vrcp.f32 %v3508_v5  ;;  %v4905_v37 = vpop.f32.mrb[29].mxu0 }
 0x931   : > { %v3401_v9 = vpack.c.bf16 %v3400_v38, %v3400_v38  ;;  %v1501_v24 = vpop.f32.mrb[30].mxu0  ;;  %5408 = vrcp.f32 %v3618_v43 }
 0x932   : > { %v4906_v49 = vpop.f32.mrb[31].mxu0 }
 0x933   : > { %5108 = vmatmul.mubr.msk.bf16.vlgmr.msra.gmra.mrb[96].mxu0 %vm935_vm3, %v3401_v9  ;;  %v3623_v35 = vpop.permute.xlu1 %3622 }
 0x934   : > { %5118 = vmatpush3.bf16.msra.mxu0 %v3518_v62  ;;  %5119 = vmatprep.mubr.msk.bf16.mxu0 %vm5473_vm1, %v5472_v47  ;;  %v3628_v18 = vsel %vm999_vm4, %v3623_v35, 0 }
 0x935   : > { %5129 = vmatprep.subr.bf16.mxu0 %v5472_v47 }
 0x937   : > { %v1608_v42 = vpop.f32.mrb[32].mxu0 }
 0x938   : > { %v5259_v17 = vpack.i.bf16 %v1608_v42, %v6443_v32  ;;  %v4917_v48 = vpop.f32.mrb[33].mxu0 }
 0x939   : > { %v1611_v34 = vpop.f32.mrb[34].mxu0 }
 0x93a   : > { %v5407_v54 = vpop.eup %5406  ;;  %5260 = vrot.lane.b32.xlu1 %v5259_v17, %s5486_s27  ;;  %v4918_v3 = vpop.f32.mrb[35].mxu0 }
 0x93b   : > { %v3510_v23 = vmul.f32 %v5407_v54, %v6380_v11  ;;  %v5409_v56 = vpop.eup %5408 }
 0x93c   : > { %v3620_v11 = vmul.f32 %v5409_v56, %v6376_v41 }
 0x93d   : > { %v3511_v31 = vpack.c.bf16 %v3510_v23, %v3510_v23 }
 0x93e   : > { %v3621_v4 = vpack.c.bf16 %v3620_v11, %v3620_v11 }
 0x93f   : > { %5120 = vmatmul.mubr.msk.bf16.vlgmr.msra.gmra.mrb[100].mxu0 %vm935_vm3, %v3511_v31  ;;  %v1718_v57 = vpop.f32.mrb[36].mxu0 }
 0x940   : > { %5130 = vmatpush3.bf16.msra.mxu0 %v3628_v18  ;;  %5131 = vmatprep.mubr.msk.bf16.mxu0 %vm5473_vm1, %v5472_v47  ;;  %v5264_v8 = vpack.i.bf16 %v1718_v57, %v6451_v13  ;;  %v4929_v21 = vpop.f32.mrb[37].mxu0 }
 0x941   : > { %5151 = vmatprep.subr.bf16.mxu0 %v5472_v47  ;;  %v1721_v51 = vpop.f32.mrb[38].mxu0 }
 0x942   : > { %5265 = vrot.lane.b32.xlu1 %v5264_v8, %s5487_s26  ;;  %v4930_v19 = vpop.f32.mrb[39].mxu0 }
 0x947   : > { %5132 = vmatmul.mubr.msk.bf16.vlgmr.msra.gmra.mrb[104].mxu0 %vm935_vm3, %v3621_v4  ;;  %v1828_v60 = vpop.f32.mrb[40].mxu0 }
 0x948   : > { %5155 = vmatprep.mubr.msk.bf16.mxu0 %vm5473_vm1, %v5472_v47  ;;  %v5269_v41 = vpack.i.bf16 %v1828_v60, %v6459_v39  ;;  %v4941_v32 = vpop.f32.mrb[41].mxu0 }
 0x949   : > { %v1831_v0 = vpop.f32.mrb[42].mxu0 }
 0x94a   : > { %5270 = vrot.lane.b32.xlu1 %v5269_v41, %s5488_s30  ;;  %v4942_v10 = vpop.f32.mrb[43].mxu0 }
 0x94f   : > { %v6494_v53 = vpop.f32.mrb[44].mxu0 }
 0x950   : > { %v4953_v12 = vpop.f32.mrb[45].mxu0 }
 0x951   : > { %v1960_v40 = vpop.f32.mrb[46].mxu0 }
 0x952   : > { %v4954_v45 = vpop.f32.mrb[47].mxu0 }
 0x957   : > { %v2067_v14 = vpop.f32.mrb[48].mxu0 }
 0x958   : > { %v4965_v13 = vpop.f32.mrb[49].mxu0 }
 0x959   : > { %v2070_v61 = vpop.f32.mrb[50].mxu0 }
 0x95a   : > { %v4966_v52 = vpop.f32.mrb[51].mxu0 }
 0x984   : > { %v2177_v50 = vpop.f32.mrb[52].mxu0 }
 0x985   : > { %v4977_v25 = vpop.f32.mrb[53].mxu0 }
 0x986   : > { %v2180_v28 = vpop.f32.mrb[54].mxu0 }
 0x987   : > { %v4978_v2 = vpop.f32.mrb[55].mxu0 }
 0x98c   : > { %v2287_v33 = vpop.f32.mrb[56].mxu0 }
 0x98d   : > { %v4989_v55 = vpop.f32.mrb[57].mxu0 }
 0x98e   : > { %v2290_v36 = vpop.f32.mrb[58].mxu0 }
 0x98f   : > { %v4990_v39 = vpop.f32.mrb[59].mxu0 }
 0x994   : > { %v6496_v15 = vpop.f32.mrb[60].mxu0 }
 0x995   : > { %v5001_v6 = vpop.f32.mrb[61].mxu0 }
 0x996   : > { %v2419_v30 = vpop.f32.mrb[62].mxu0 }
 0x997   : > { %v5002_v43 = vpop.f32.mrb[63].mxu0 }
 0x9ac   : > { %v5261_v46 = vpop.permute.xlu1 %5260 }
 0x9ad   : > { %v5263_v27 = vunpack.i.h.bf16 %v5261_v46  ;;  %v5262_v38 = vunpack.i.l.bf16 %v5261_v46 }
 0x9af   : > { %v1846_v9 = vsel %vm935_vm3, %v6467_v7, %v5263_v27  ;;  %v1385_v24 = vsel %vm935_vm3, %v6032_v58, %v5262_v38 }
 0x9b4   : > { %v5266_v26 = vpop.permute.xlu1 %5265 }
 0x9b5   : > { %v5268_v5 = vunpack.i.h.bf16 %v5266_v26  ;;  %v5267_v22 = vunpack.i.l.bf16 %v5266_v26 }
 0x9b7   : > { %v1847_v42 = vsel %vm1386_vm6, %v1846_v9, %v5268_v5  ;;  %v1387_v29 = vsel %vm1386_vm6, %v1385_v24, %v5267_v22 }
 0x9bc   : > { %v5271_v37 = vpop.permute.xlu1 %5270 }
 0x9bd   : > { %v5273_v62 = vunpack.i.h.bf16 %v5271_v37  ;;  %v5272_v49 = vunpack.i.l.bf16 %v5271_v37 }
 0x9bf   : > { %v1848_v17 = vsel %vm1388_vm7, %v1847_v42, %v5273_v62  ;;  %v1389_v48 = vsel %vm1388_vm7, %v1387_v29, %v5272_v49 }
 0x9c0   : > { %v3685_v54 = vpack.c.bf16 %v1848_v17, %v1389_v48 }
 0x9c2   : > { %5140 = vmatmul.mubr.msk.bf16.vlgmr.msra.gmra.mrb[96].mxu1 %vm857_vm2, %v3685_v54 }
 0x9c3   : > { %5143 = vmatprep.mubr.msk.bf16.mxu1 %vm5473_vm1, %v5472_v47 }
 0x9c5   : > { %v2526_v7 = vpop.f32.mrb[64].mxu0 }
 0x9c6   : > { %v5274_v34 = vpack.i.bf16 %v2526_v7, %v2067_v14  ;;  %v5013_v23 = vpop.f32.mrb[65].mxu0 }
 0x9c7   : > { %v2529_v58 = vpop.f32.mrb[66].mxu0 }
 0x9c8   : > { %5275 = vrot.lane.b32.xlu1 %v5274_v34, %s5486_s27  ;;  %v5014_v3 = vpop.f32.mrb[67].mxu0 }
 0x9cd   : > { %v2636_v35 = vpop.f32.mrb[68].mxu0 }
 0x9ce   : > { %v5279_v31 = vpack.i.bf16 %v2636_v35, %v2177_v50  ;;  %v5025_v56 = vpop.f32.mrb[69].mxu0 }
 0x9cf   : > { %v2639_v18 = vpop.f32.mrb[70].mxu0 }
 0x9d0   : > { %5280 = vrot.lane.b32.xlu0 %v5279_v31, %s5487_s26  ;;  %v5026_v20 = vpop.f32.mrb[71].mxu0 }
 0x9d5   : > { %v2746_v57 = vpop.f32.mrb[72].mxu0 }
 0x9d6   : > { %v5284_v11 = vpack.i.bf16 %v2746_v57, %v2287_v33  ;;  %v5037_v8 = vpop.f32.mrb[73].mxu0 }
 0x9d7   : > { %v2749_v21 = vpop.f32.mrb[74].mxu0 }
 0x9d8   : > { %5285 = vrot.lane.b32.xlu1 %v5284_v11, %s5488_s30  ;;  %v5038_v51 = vpop.f32.mrb[75].mxu0 }
 0x9dd   : > { %v6512_v19 = vpop.f32.mrb[76].mxu0 }
 0x9de   : > { %v5049_v4 = vpop.f32.mrb[77].mxu0 }
 0x9df   : > { %v2878_v60 = vpop.f32.mrb[78].mxu0 }
 0x9e0   : > { %v5050_v41 = vpop.f32.mrb[79].mxu0 }
 0x9e5   : > { %v2985_v32 = vpop.f32.mrb[80].mxu0 }
 0x9e6   : > { %v5061_v0 = vpop.f32.mrb[81].mxu0 }
 0x9e7   : > { %v2988_v10 = vpop.f32.mrb[82].mxu0 }
 0x9e8   : > { %v5062_v12 = vpop.f32.mrb[83].mxu0 }
 0x9ed   : > { %v3095_v40 = vpop.f32.mrb[84].mxu0 }
 0x9ee   : > { %v5073_v45 = vpop.f32.mrb[85].mxu0 }
 0x9ef   : > { %v3098_v14 = vpop.f32.mrb[86].mxu0  ;;  %v6536_v45 = vld [vmem:[%s5566_s24] sm:$0xff] }
 0x9f0   : > { %v5074_v13 = vpop.f32.mrb[87].mxu0  ;;  %v3695_v14 = vrot.slane %v6536_v45, %v1393_v16 }
 0x9f5   : > { %v3205_v61 = vpop.f32.mrb[88].mxu0 }
 0x9f6   : > { %v5085_v52 = vpop.f32.mrb[89].mxu0 }
 0x9f7   : > { %v3208_v50 = vpop.f32.mrb[90].mxu0 }
 0x9f8   : > { %v5086_v25 = vpop.f32.mrb[91].mxu0 }
 0x9f9   : > { %v5447_v25 = vld [vmem:[#allocation2] sm:$0xff] }
 0x9fd   : > { %v3334_v28 = vpop.f32.mrb[92].mxu0 }
 0x9fe   : > { %v5097_v2 = vpop.f32.mrb[93].mxu0 }
 0x9ff   : > { %v3337_v33 = vpop.f32.mrb[94].mxu0 }
 0xa00   : > { %v5098_v55 = vpop.f32.mrb[95].mxu0 }
 0xa01   : > { %v5448_v55 = vld [vmem:[#allocation2 + $0x8] sm:$0xff] }
 0xa06   : > { %v3444_v36 = vpop.f32.mrb[96].mxu0 }
 0xa07   : > { %v5289_v39 = vpack.i.bf16 %v3444_v36, %v2985_v32  ;;  %v5109_v6 = vpop.f32.mrb[97].mxu0 }
 0xa08   : > { %v3447_v30 = vpop.f32.mrb[98].mxu0 }
 0xa09   : > { %5290 = vrot.lane.b32.xlu0 %v5289_v39, %s5486_s27  ;;  %v5110_v43 = vpop.f32.mrb[99].mxu0 }
 0xa12   : > { %v3554_v46 = vpop.f32.mrb[100].mxu0 }
 0xa13   : > { %v5294_v26 = vpack.i.bf16 %v3554_v46, %v3095_v40  ;;  %v5121_v27 = vpop.f32.mrb[101].mxu0 }
 0xa14   : > { %v3557_v38 = vpop.f32.mrb[102].mxu0 }
 0xa15   : > { %5295 = vrot.lane.b32.xlu1 %v5294_v26, %s5487_s26  ;;  %v5122_v5 = vpop.f32.mrb[103].mxu0  ;;  %v5449_v26 = vld [vmem:[#allocation2 + $0x10] sm:$0xff] }
 0xa1a   : > { %v3664_v22 = vpop.f32.mrb[104].mxu0 }
 0xa1b   : > { %v5299_v37 = vpack.i.bf16 %v3664_v22, %v3205_v61  ;;  %v5133_v9 = vpop.f32.mrb[105].mxu0  ;;  %v5450_v22 = vld [vmem:[#allocation2 + $0x18] sm:$0xff] }
 0xa1c   : > { %v3667_v24 = vpop.f32.mrb[106].mxu0 }
 0xa1d   : > { %5300 = vrot.lane.b32.xlu0 %v5299_v37, %s5488_s30  ;;  %v5134_v62 = vpop.f32.mrb[107].mxu0 }
 0xa3a   : > { %v5276_v49 = vpop.permute.xlu1 %5275 }
 0xa3b   : > { %v5278_v29 = vunpack.i.h.bf16 %v5276_v49  ;;  %v5277_v17 = vunpack.i.l.bf16 %v5276_v49 }
 0xa3d   : > { %v2764_v34 = vsel %vm935_vm3, %v6496_v15, %v5278_v29  ;;  %v2305_v23 = vsel %vm935_vm3, %v6494_v53, %v5277_v17 }
 0xa42   : > { %v5281_v42 = vpop.permute.xlu0 %5280 }
 0xa43   : > { %v5283_v48 = vunpack.i.h.bf16 %v5281_v42  ;;  %v5282_v54 = vunpack.i.l.bf16 %v5281_v42 }
 0xa45   : > { %v2765_v35 = vsel %vm1386_vm6, %v2764_v34, %v5283_v48  ;;  %v2306_v31 = vsel %vm1386_vm6, %v2305_v23, %v5282_v54 }
 0xa4a   : > { %v5286_v7 = vpop.permute.xlu1 %5285 }
 0xa4b   : > { %v5288_v58 = vunpack.i.h.bf16 %v5286_v7  ;;  %v5287_v3 = vunpack.i.l.bf16 %v5286_v7 }
 0xa4d   : > { %v2766_v56 = vsel %vm1388_vm7, %v2765_v35, %v5288_v58  ;;  %v2307_v18 = vsel %vm1388_vm7, %v2306_v31, %v5287_v3  ;;  %v5451_v58 = vld [vmem:[#allocation2 + $0x20] sm:$0xff] }
 0xa4e   : > { %v3686_v20 = vpack.c.bf16 %v2766_v56, %v2307_v18  ;;  %v5452_v56 = vld [vmem:[#allocation2 + $0x28] sm:$0xff] }
 0xa50   : > { %5144 = vmatmul.mubr.msk.bf16.gmra.mrb[100].mxu1 %vm857_vm2, %v3686_v20 }
 0xa51   : > { %5147 = vmatprep.mubr.msk.bf16.mxu1 %vm5473_vm1, %v5472_v47 }
 0xa7b   : > { %v5291_v15 = vpop.permute.xlu0 %5290 }
 0xa7c   : > { %v5293_v53 = vunpack.i.h.bf16 %v5291_v15  ;;  %v5292_v11 = vunpack.i.l.bf16 %v5291_v15 }
 0xa7e   : > { %v3682_v4 = vsel %vm935_vm3, %v3334_v28, %v5293_v53  ;;  %v3223_v60 = vsel %vm935_vm3, %v6512_v19, %v5292_v11 }
 0xa87   : > { %v5296_v57 = vpop.permute.xlu1 %5295 }
 0xa88   : > { %v5298_v8 = vunpack.i.h.bf16 %v5296_v57  ;;  %v5297_v21 = vunpack.i.l.bf16 %v5296_v57 }
 0xa8a   : > { %v3683_v0 = vsel %vm1386_vm6, %v3682_v4, %v5298_v8  ;;  %v3224_v10 = vsel %vm1386_vm6, %v3223_v60, %v5297_v21  ;;  %v5308_v21 = vld [vmem:[%s5581_s14] sm:$0xff]  }
 0xa8b   : > { %5152 = vmatpush3.bf16.msra.mxu0 %v5308_v21 }
 0xa8c   : > { %5153 = vmatprep.subr.bf16.mxu0 %v5472_v47 }
 0xa8f   : > { %v5301_v51 = vpop.permute.xlu0 %5300 }
 0xa90   : > { %v5303_v41 = vunpack.i.h.bf16 %v5301_v51  ;;  %v5302_v32 = vunpack.i.l.bf16 %v5301_v51  ;;  %v5309_v51 = vld [vmem:[%s5581_s14 + $0x8] sm:$0xff]  }
 0xa91   : > { %5154 = vmatpush3.bf16.msra.mxu0 %v5309_v51 }
 0xa92   : > { %v3684_v12 = vsel %vm1388_vm7, %v3683_v0, %v5303_v41  ;;  %v3225_v40 = vsel %vm1388_vm7, %v3224_v10, %v5302_v32 }
 0xa93   : > { %v3687_v13 = vpack.c.bf16 %v3684_v12, %v3225_v40 }
 0xa95   : > { %5148 = vmatmul.mubr.msk.bf16.gmra.mrb[104].mxu1 %vm857_vm2, %v3687_v13  ;;  %v3751_v19 = vpop.f32.mrb[96].mxu1 }
 0xa96   : > { %5175 = vmatprep.mubr.msk.bf16.mxu1 %vm5473_vm1, %v5472_v47  ;;  %v3752_v61 = vadd.f32 %v3751_v19, %v3695_v14  ;;  %v5141_v52 = vpop.f32.mrb[97].mxu1 }
 0xa97   : > { %v3754_v50 = vpop.f32.mrb[98].mxu1 }
 0xa98   : > { %v3774_v28 = vadd.f32 %v5447_v25, %v3752_v61  ;;  %v3755_v2 = vadd.f32 %v3754_v50, %v3695_v14  ;;  %v5142_v33 = vpop.f32.mrb[99].mxu1 }
 0xa9a   : > { %v3775_v36 = vadd.f32 %v5448_v55, %v3755_v2  ;;  %v3780_v39 = vsel %vm857_vm2, %v3774_v28, 0.0 }
 0xa9b   : > { %3781 = vadd.xlane.f32.xlu1 %v3780_v39 }
 0xa9c   : > { %v3783_v16 = vsel %vm857_vm2, %v3775_v36, 0.0 }
 0xa9d   : > { %3784 = vadd.xlane.f32.xlu0 %v3783_v16 }
 0xb23   : > { %v3759_v6 = vpop.f32.mrb[100].mxu1 }
 0xb24   : > { %v3760_v30 = vadd.f32 %v3759_v6, %v3695_v14  ;;  %v5145_v43 = vpop.f32.mrb[101].mxu1 }
 0xb25   : > { %v3762_v46 = vpop.f32.mrb[102].mxu1 }
 0xb26   : > { %v3776_v27 = vadd.f32 %v5449_v26, %v3760_v30  ;;  %v3763_v38 = vadd.f32 %v3762_v46, %v3695_v14  ;;  %v5146_v5 = vpop.f32.mrb[103].mxu1  ;;  %v3862_v26 = vrot.slane %v6536_v45, %v6068_v44 }
 0xb28   : > { %v3777_v37 = vadd.f32 %v5450_v22, %v3763_v38  ;;  %v3786_v9 = vsel %vm857_vm2, %v3776_v27, 0.0  ;;  %v3782_v62 = vpop.xlane.xlu1 %3781  ;;  %v3872_v22 = vrot.slane %v6536_v45, %v2311_v1 }
 0xb29   : > { %3787 = vadd.xlane.f32.xlu0 %v3786_v9  ;;  %v3799_v42 = vmul.f32 0.03125, %v3782_v62 }
 0xb2a   : > { %v3789_v24 = vsel %vm857_vm2, %v3777_v37, 0.0  ;;  %v3785_v49 = vpop.xlane.xlu0 %3784 }
 0xb2b   : > { %3790 = vadd.xlane.f32.xlu1 %v3789_v24  ;;  %v3800_v29 = vmul.f32 0.03125, %v3785_v49  ;;  %v3805_v48 = vsub.f32 %v3774_v28, %v3799_v42 }
 0xb2d   : > { %v3806_v23 = vsub.f32 %v3775_v36, %v3800_v29  ;;  %v3811_v15 = vmul.f32 %v3805_v48, %v3805_v48 }
 0xb2f   : > { %v3812_v53 = vmul.f32 %v3806_v23, %v3806_v23  ;;  %v3817_v11 = vsel %vm857_vm2, %v3811_v15, 0.0  ;;  %v5310_v15 = vld [vmem:[%s5586_s20] sm:$0xff]  }
 0xb30   : > { %5168 = vmatpush3.bf16.msra.mxu1 %v5310_v15 }
 0xb31   : > { %v3820_v8 = vsel %vm857_vm2, %v3812_v53, 0.0  ;;  %5169 = vmatprep.subr.bf16.mxu1 %v5472_v47  ;;  %v5312_v53 = vld [vmem:[%s5586_s20 + $0x10] sm:$0xff]  }
 0xb68   : > { %v3767_v17 = vpop.f32.mrb[104].mxu1 }
 0xb69   : > { %v3768_v54 = vadd.f32 %v3767_v17, %v3695_v14  ;;  %v5149_v7 = vpop.f32.mrb[105].mxu1 }
 0xb6a   : > { %v3770_v34 = vpop.f32.mrb[106].mxu1 }
 0xb6b   : > { %v3778_v3 = vadd.f32 %v5451_v58, %v3768_v54  ;;  %v3771_v35 = vadd.f32 %v3770_v34, %v3695_v14  ;;  %v5150_v31 = vpop.f32.mrb[107].mxu1 }
 0xb6d   : > { %v3779_v18 = vadd.f32 %v5452_v56, %v3771_v35  ;;  %v3792_v20 = vsel %vm857_vm2, %v3778_v3, 0.0 }
 0xb6e   : > { %3793 = vadd.xlane.f32.xlu0 %v3792_v20 }
 0xb6f   : > { %v3795_v57 = vsel %vm857_vm2, %v3779_v18, 0.0 }
 0xb70   : > { %3796 = vadd.xlane.f32.xlu1 %v3795_v57  ;;  %v5311_v57 = vld [vmem:[%s5586_s20 + $0x8] sm:$0xff]  }
 0xb71   : > { %5170 = vmatpush3.bf16.msra.mxu1 %v5311_v57 }
 0xb72   : > { %3818 = vadd.xlane.f32.xlu0 %v3817_v11  ;;  %5171 = vmatprep.subr.bf16.mxu1 %v5472_v47  ;;  %v5313_v11 = vld [vmem:[%s5586_s20 + $0x18] sm:$0xff]  }
 0xb74   : > { %3821 = vadd.xlane.f32.xlu1 %v3820_v8 }
 0xb75   : > { %5172 = vmatpush3.bf16.msra.mxu1 %v5312_v53 }
 0xb76   : > { %5173 = vmatprep.subr.bf16.mxu1 %v5472_v47 }
 0xb79   : > { %5174 = vmatpush3.bf16.msra.mxu1 %v5313_v11 }
 0xbb6   : > { %v3788_v4 = vpop.xlane.xlu0 %3787 }
 0xbb7   : > { %v3801_v60 = vmul.f32 0.03125, %v3788_v4 }
 0xbb8   : > { %v3791_v41 = vpop.xlane.xlu1 %3790 }
 0xbb9   : > { %v3807_v32 = vsub.f32 %v3776_v27, %v3801_v60  ;;  %v3802_v0 = vmul.f32 0.03125, %v3791_v41 }
 0xbbb   : > { %v3808_v10 = vsub.f32 %v3777_v37, %v3802_v0  ;;  %v3813_v12 = vmul.f32 %v3807_v32, %v3807_v32 }
 0xbbd   : > { %v3823_v40 = vsel %vm857_vm2, %v3813_v12, 0.0  ;;  %v3814_v14 = vmul.f32 %v3808_v10, %v3808_v10 }
 0xbbe   : > { %3824 = vadd.xlane.f32.xlu0 %v3823_v40 }
 0xbbf   : > { %v3826_v13 = vsel %vm857_vm2, %v3814_v14, 0.0 }
 0xbc0   : > { %3827 = vadd.xlane.f32.xlu1 %v3826_v13 }
 0xbfb   : > { %v3794_v19 = vpop.xlane.xlu0 %3793 }
 0xbfc   : > { %v3803_v61 = vmul.f32 0.03125, %v3794_v19 }
 0xbfd   : > { %v3797_v52 = vpop.xlane.xlu1 %3796 }
 0xbfe   : > { %v6557_v50 = vsub.f32 %v3778_v3, %v3803_v61  ;;  %v3804_v25 = vmul.f32 0.03125, %v3797_v52  ;;  %v6609_v52 = vrot.slane %v6536_v45, %v2770_v63 }
 0xbff   : > { %v3819_v28 = vpop.xlane.xlu0 %3818 }
 0xc00   : > { %v6559_v2 = vsub.f32 %v3779_v18, %v3804_v25  ;;  %v3835_v33 = vmul.f32 0.03125, %v3819_v28  ;;  %v3815_v55 = vmul.f32 %v6557_v50, %v6557_v50 }
 0xc01   : > { %v3822_v36 = vpop.xlane.xlu1 %3821 }
 0xc02   : > { %v3841_v39 = vadd.f32 1e-12, %v3835_v33  ;;  %v3836_v16 = vmul.f32 0.03125, %v3822_v36  ;;  %v3829_v6 = vsel %vm857_vm2, %v3815_v55, 0.0  ;;  %v3816_v30 = vmul.f32 %v6559_v2, %v6559_v2 }
 0xc03   : > { %3830 = vadd.xlane.f32.xlu0 %v3829_v6 }
 0xc04   : > { %5410 = vrsqrt.f32 %v3841_v39  ;;  %v3842_v43 = vadd.f32 1e-12, %v3836_v16  ;;  %v3832_v46 = vsel %vm857_vm2, %v3816_v30, 0.0 }
 0xc05   : > { %3833 = vadd.xlane.f32.xlu1 %v3832_v46 }
 0xc06   : > { %5412 = vrsqrt.f32 %v3842_v43 }
 0xc0e   : > { %v5411_v27 = vpop.eup %5410 }
 0xc0f   : > { %v3853_v38 = vmul.f32 %v5411_v27, %v3805_v48 }
 0xc10   : > { %v5413_v5 = vpop.eup %5412 }
 0xc11   : > { %v3863_v37 = vmul.f32 %v3862_v26, %v3853_v38  ;;  %v3854_v9 = vmul.f32 %v5413_v5, %v3806_v23 }
 0xc13   : > { %v3864_v24 = vmul.f32 %v3862_v26, %v3854_v9  ;;  %v6572_v62 = vadd.f32 %v3872_v22, %v3863_v37 }
 0xc15   : > { %v6574_v49 = vadd.f32 %v3872_v22, %v3864_v24 }
 0xc17   : > { %v3879_v42 = vpack.c.bf16 %v6574_v49, %v6572_v62 }
 0xc19   : > { %5156 = vmatmul.mubr.msk.bf16.vlgmr.msra.gmra.mrb[108].mxu0 %vm857_vm2, %v3879_v42 }
 0xc1a   : > { %5159 = vmatprep.mubr.msk.bf16.mxu0 %vm5473_vm1, %v5472_v47 }
 0xc4b   : > { %v3825_v29 = vpop.xlane.xlu0 %3824 }
 0xc4c   : > { %v3837_v17 = vmul.f32 0.03125, %v3825_v29 }
 0xc4d   : > { %v3828_v48 = vpop.xlane.xlu1 %3827 }
 0xc4e   : > { %v3843_v54 = vadd.f32 1e-12, %v3837_v17  ;;  %v3838_v1 = vmul.f32 0.03125, %v3828_v48 }
 0xc50   : > { %5414 = vrsqrt.f32 %v3843_v54  ;;  %v3844_v7 = vadd.f32 1e-12, %v3838_v1 }
 0xc52   : > { %5416 = vrsqrt.f32 %v3844_v7 }
 0xc5a   : > { %v5415_v34 = vpop.eup %5414 }
 0xc5b   : > { %v3855_v23 = vmul.f32 %v5415_v34, %v3807_v32 }
 0xc5c   : > { %v5417_v58 = vpop.eup %5416 }
 0xc5d   : > { %v3856_v3 = vmul.f32 %v5417_v58, %v3808_v10  ;;  %v3865_v35 = vmul.f32 %v3862_v26, %v3855_v23 }
 0xc5f   : > { %v3866_v31 = vmul.f32 %v3862_v26, %v3856_v3  ;;  %v6581_v56 = vadd.f32 %v3872_v22, %v3865_v35 }
 0xc61   : > { %v6583_v18 = vadd.f32 %v3872_v22, %v3866_v31 }
 0xc63   : > { %v3880_v20 = vpack.c.bf16 %v6583_v18, %v6581_v56 }
 0xc65   : > { %5160 = vmatmul.mubr.msk.bf16.gmra.mrb[112].mxu0 %vm857_vm2, %v3880_v20 }
 0xc66   : > { %5163 = vmatprep.mubr.msk.bf16.mxu0 %vm5473_vm1, %v5472_v47 }
 0xc90   : > { %v3831_v8 = vpop.xlane.xlu0 %3830 }
 0xc91   : > { %v3839_v21 = vmul.f32 0.03125, %v3831_v8 }
 0xc92   : > { %v3834_v51 = vpop.xlane.xlu1 %3833 }
 0xc93   : > { %v3845_v4 = vadd.f32 1e-12, %v3839_v21  ;;  %v3840_v60 = vmul.f32 0.03125, %v3834_v51 }
 0xc95   : > { %5418 = vrsqrt.f32 %v3845_v4  ;;  %v3846_v41 = vadd.f32 1e-12, %v3840_v60 }
 0xc97   : > { %5420 = vrsqrt.f32 %v3846_v41 }
 0xc9f   : > { %v5419_v32 = vpop.eup %5418 }
 0xca0   : > { %v3857_v0 = vmul.f32 %v5419_v32, %v6557_v50 }
 0xca1   : > { %v5421_v10 = vpop.eup %5420 }
 0xca2   : > { %v3858_v12 = vmul.f32 %v5421_v10, %v6559_v2  ;;  %v3867_v40 = vmul.f32 %v3862_v26, %v3857_v0 }
 0xca4   : > { %v3868_v14 = vmul.f32 %v3862_v26, %v3858_v12  ;;  %v6599_v13 = vadd.f32 %v3872_v22, %v3867_v40 }
 0xca6   : > { %v6601_v19 = vadd.f32 %v3872_v22, %v3868_v14 }
 0xca8   : > { %v3881_v61 = vpack.c.bf16 %v6601_v19, %v6599_v13 }
 0xcaa   : > { %5164 = vmatmul.mubr.msk.bf16.gmra.mrb[116].mxu0 %vm857_vm2, %v3881_v61 }
 0xcec   : > { %v3945_v50 = vpop.f32.mrb[108].mxu0 }
 0xced   : > { %v3946_v25 = vadd.f32 %v3945_v50, %v6609_v52  ;;  %v5157_v28 = vpop.f32.mrb[109].mxu0 }
 0xcee   : > { %v3948_v2 = vpop.f32.mrb[110].mxu0 }
 0xcef   : > { %v3968_v33 = vmul.f32 %v3946_v25, %v3946_v25  ;;  %v3949_v55 = vadd.f32 %v3948_v2, %v6609_v52  ;;  %v5158_v36 = vpop.f32.mrb[111].mxu0 }
 0xcf1   : > { %v3974_v39 = vmul.f32 %v3968_v33, %v3946_v25  ;;  %v3969_v16 = vmul.f32 %v3949_v55, %v3949_v55 }
 0xcf3   : > { %v3980_v6 = vmul.f32 0.044715, %v3974_v39  ;;  %v3975_v30 = vmul.f32 %v3969_v16, %v3949_v55 }
 0xcf5   : > { %v3986_v43 = vadd.f32 %v3980_v6, %v3946_v25  ;;  %v3981_v46 = vmul.f32 0.044715, %v3975_v30 }
 0xcf7   : > { %v3992_v26 = vmul.f32 0.7978846, %v3986_v43  ;;  %v3987_v27 = vadd.f32 %v3981_v46, %v3949_v55 }
 0xcf9   : > { %5422 = vtanh.f32 %v3992_v26  ;;  %v3993_v63 = vmul.f32 0.7978846, %v3987_v27 }
 0xcfb   : > { %5424 = vtanh.f32 %v3993_v63 }
 0xd03   : > { %v5423_v38 = vpop.eup %5422 }
 0xd04   : > { %v4004_v5 = vadd.f32 1.0, %v5423_v38 }
 0xd05   : > { %v5425_v22 = vpop.eup %5424 }
 0xd06   : > { %v4010_v37 = vmul.f32 0.5, %v4004_v5  ;;  %v4005_v9 = vadd.f32 1.0, %v5425_v22 }
 0xd08   : > { %v4011_v24 = vmul.f32 0.5, %v4005_v9  ;;  %v4016_v42 = vmul.f32 %v4010_v37, %v3946_v25  ;;  %v6696_v9 = vsub.s32 5, %v5729_v59 }
 0xd0a   : > { %v4017_v29 = vmul.f32 %v4011_v24, %v3949_v55  ;;  %v4036_v24 = vrot.slane %v6536_v45, %v6696_v9 }
 0xd0c   : > { %v4022_v17 = vpack.c.bf16 %v4017_v29, %v4016_v42 }
 0xd0e   : > { %5176 = vmatmul.mubr.msk.bf16.vlgmr.msra.gmra.mrb[108].mxu1 %vm4061_vm8, %v4022_v17 }
 0xd0f   : > { %5179 = vmatprep.mubr.msk.bf16.mxu1 %vm5473_vm1, %v5472_v47 }
 0xd38   : > { %v3953_v48 = vpop.f32.mrb[112].mxu0 }
 0xd39   : > { %v3954_v54 = vadd.f32 %v3953_v48, %v6609_v52  ;;  %v5161_v1 = vpop.f32.mrb[113].mxu0 }
 0xd3a   : > { %v3956_v7 = vpop.f32.mrb[114].mxu0 }
 0xd3b   : > { %v3970_v34 = vmul.f32 %v3954_v54, %v3954_v54  ;;  %v3957_v23 = vadd.f32 %v3956_v7, %v6609_v52  ;;  %v5162_v58 = vpop.f32.mrb[115].mxu0 }
 0xd3d   : > { %v3976_v3 = vmul.f32 %v3970_v34, %v3954_v54  ;;  %v3971_v35 = vmul.f32 %v3957_v23, %v3957_v23 }
 0xd3f   : > { %v3982_v31 = vmul.f32 0.044715, %v3976_v3  ;;  %v3977_v20 = vmul.f32 %v3971_v35, %v3957_v23 }
 0xd41   : > { %v3988_v15 = vadd.f32 %v3982_v31, %v3954_v54  ;;  %v3983_v57 = vmul.f32 0.044715, %v3977_v20 }
 0xd43   : > { %v3994_v53 = vmul.f32 0.7978846, %v3988_v15  ;;  %v3989_v11 = vadd.f32 %v3983_v57, %v3957_v23 }
 0xd45   : > { %5426 = vtanh.f32 %v3994_v53  ;;  %v3995_v8 = vmul.f32 0.7978846, %v3989_v11 }
 0xd47   : > { %5428 = vtanh.f32 %v3995_v8 }
 0xd4f   : > { %v5427_v21 = vpop.eup %5426 }
 0xd50   : > { %v4006_v51 = vadd.f32 1.0, %v5427_v21 }
 0xd51   : > { %v5429_v4 = vpop.eup %5428 }
 0xd52   : > { %v4012_v60 = vmul.f32 0.5, %v4006_v51  ;;  %v4007_v41 = vadd.f32 1.0, %v5429_v4 }
 0xd54   : > { %v4013_v32 = vmul.f32 0.5, %v4007_v41  ;;  %v4018_v0 = vmul.f32 %v4012_v60, %v3954_v54 }
 0xd56   : > { %v4019_v10 = vmul.f32 %v4013_v32, %v3957_v23 }
 0xd58   : > { %v4023_v12 = vpack.c.bf16 %v4019_v10, %v4018_v0 }
 0xd5a   : > { %5180 = vmatmul.mubr.msk.bf16.gmra.mrb[112].mxu1 %vm4061_vm8, %v4023_v12 }
 0xd5b   : > { %5183 = vmatprep.mubr.msk.bf16.mxu1 %vm5473_vm1, %v5472_v47  ;;  %vm4459_vm1 = vcmask (!%p4645_p5), 1041408  }
 0xd7d   : > { %v3961_v40 = vpop.f32.mrb[116].mxu0 }
 0xd7e   : > { %v3962_v14 = vadd.f32 %v3961_v40, %v6609_v52  ;;  %v5165_v61 = vpop.f32.mrb[117].mxu0 }
 0xd7f   : > { %v3964_v50 = vpop.f32.mrb[118].mxu0 }
 0xd80   : > { %v3972_v25 = vmul.f32 %v3962_v14, %v3962_v14  ;;  %v3965_v28 = vadd.f32 %v3964_v50, %v6609_v52  ;;  %v5166_v2 = vpop.f32.mrb[119].mxu0 }
 0xd82   : > { %v3978_v33 = vmul.f32 %v3972_v25, %v3962_v14  ;;  %v3973_v55 = vmul.f32 %v3965_v28, %v3965_v28 }
 0xd84   : > { %v3984_v36 = vmul.f32 0.044715, %v3978_v33  ;;  %v3979_v39 = vmul.f32 %v3973_v55, %v3965_v28 }
 0xd86   : > { %v3990_v16 = vadd.f32 %v3984_v36, %v3962_v14  ;;  %v3985_v6 = vmul.f32 0.044715, %v3979_v39 }
 0xd88   : > { %v3996_v30 = vmul.f32 0.7978846, %v3990_v16  ;;  %v3991_v43 = vadd.f32 %v3985_v6, %v3965_v28 }
 0xd8a   : > { %5430 = vtanh.f32 %v3996_v30  ;;  %v3997_v46 = vmul.f32 0.7978846, %v3991_v43 }
 0xd8c   : > { %5432 = vtanh.f32 %v3997_v46 }
 0xd94   : > { %v5431_v47 = vpop.eup %5430 }
 0xd95   : > { %v4008_v26 = vadd.f32 1.0, %v5431_v47 }
 0xd96   : > { %v5433_v27 = vpop.eup %5432 }
 0xd97   : > { %v4014_v63 = vmul.f32 0.5, %v4008_v26  ;;  %v4009_v38 = vadd.f32 1.0, %v5433_v27 }
 0xd99   : > { %v4015_v5 = vmul.f32 0.5, %v4009_v38  ;;  %v4020_v22 = vmul.f32 %v4014_v63, %v3962_v14 }
 0xd9b   : > { %v4021_v52 = vmul.f32 %v4015_v5, %v3965_v28 }
 0xd9d   : > { %v4024_v37 = vpack.c.bf16 %v4021_v52, %v4020_v22 }
 0xd9f   : > { %5184 = vmatmul.mubr.msk.bf16.gmra.mrb[116].mxu1 %vm4061_vm8, %v4024_v37 }
 0xde1   : > { %v4105_v42 = vpop.f32.mrb[108].mxu1 }
 0xde2   : > { %v4106_v29 = vadd.f32 %v4105_v42, %v4036_v24  ;;  %v5177_v17 = vpop.f32.mrb[109].mxu1 }
 0xde3   : > { %v4108_v48 = vpop.f32.mrb[110].mxu1 }
 0xde4   : > { %v4128_v54 = vadd.f32 %v4106_v29, %v6572_v62  ;;  %v4109_v1 = vadd.f32 %v4108_v48, %v4036_v24  ;;  %v5178_v7 = vpop.f32.mrb[111].mxu1 }
 0xde5   : > { %v4224_v7 = vsub.s32 7, %v5729_v59 }
 0xde6   : > { %v4129_v34 = vadd.f32 %v4109_v1, %v6574_v49  ;;  %v4134_v23 = vsel %vm857_vm2, %v4128_v54, 0.0  ;;  %v4214_v1 = vsub.s32 6, %v5729_v59 }
 0xde7   : > { %4135 = vadd.xlane.f32.xlu0 %v4134_v23 }
 0xde8   : > { %v4137_v58 = vsel %vm857_vm2, %v4129_v34, 0.0 }
 0xde9   : > { %4138 = vadd.xlane.f32.xlu1 %v4137_v58  ;;  %v4225_v58 = vrot.slane %v6536_v45, %v4224_v7 }
 0xe2d   : > { %v4113_v3 = vpop.f32.mrb[112].mxu1 }
 0xe2e   : > { %v4114_v35 = vadd.f32 %v4113_v3, %v4036_v24  ;;  %v5181_v31 = vpop.f32.mrb[113].mxu1 }
 0xe2f   : > { %v4116_v20 = vpop.f32.mrb[114].mxu1 }
 0xe30   : > { %v4130_v15 = vadd.f32 %v4114_v35, %v6581_v56  ;;  %v4117_v57 = vadd.f32 %v4116_v20, %v4036_v24  ;;  %v5182_v53 = vpop.f32.mrb[115].mxu1 }
 0xe32   : > { %v4131_v62 = vadd.f32 %v4117_v57, %v6583_v18  ;;  %v4140_v11 = vsel %vm857_vm2, %v4130_v15, 0.0 }
 0xe33   : > { %4141 = vadd.xlane.f32.xlu0 %v4140_v11 }
 0xe34   : > { %v4143_v49 = vsel %vm857_vm2, %v4131_v62, 0.0 }
 0xe35   : > { %4144 = vadd.xlane.f32.xlu1 %v4143_v49 }
 0xe72   : > { %v4121_v8 = vpop.f32.mrb[116].mxu1 }
 0xe73   : > { %v4122_v21 = vadd.f32 %v4121_v8, %v4036_v24  ;;  %v5185_v51 = vpop.f32.mrb[117].mxu1 }
 0xe74   : > { %v4136_v4 = vpop.xlane.xlu0 %4135  ;;  %v4124_v60 = vpop.f32.mrb[118].mxu1 }
 0xe75   : > { %v4132_v41 = vadd.f32 %v4122_v21, %v6599_v13  ;;  %v4152_v32 = vmul.f32 0.03125, %v4136_v4  ;;  %v4125_v0 = vadd.f32 %v4124_v60, %v4036_v24  ;;  %v5186_v56 = vpop.f32.mrb[119].mxu1 }
 0xe76   : > { %v4139_v10 = vpop.xlane.xlu1 %4138 }
 0xe77   : > { %v4158_v12 = vsub.f32 %v4128_v54, %v4152_v32  ;;  %v4133_v18 = vadd.f32 %v4125_v0, %v6601_v19  ;;  %v4153_v40 = vmul.f32 0.03125, %v4139_v10  ;;  %v4146_v14 = vsel %vm857_vm2, %v4132_v41, 0.0 }
 0xe78   : > { %4147 = vadd.xlane.f32.xlu0 %v4146_v14 }
 0xe79   : > { %v4159_v61 = vsub.f32 %v4129_v34, %v4153_v40  ;;  %v4149_v50 = vsel %vm857_vm2, %v4133_v18, 0.0  ;;  %v4164_v25 = vmul.f32 %v4158_v12, %v4158_v12  ;;  %v4215_v34 = vrot.slane %v6536_v45, %v4214_v1 }
 0xe7a   : > { %4150 = vadd.xlane.f32.xlu1 %v4149_v50 }
 0xe7b   : > { %v4170_v28 = vsel %vm857_vm2, %v4164_v25, 0.0  ;;  %v4165_v2 = vmul.f32 %v4159_v61, %v4159_v61 }
 0xe7c   : > { %4171 = vadd.xlane.f32.xlu0 %v4170_v28 }
 0xe7d   : > { %v4173_v13 = vsel %vm857_vm2, %v4165_v2, 0.0 }
 0xe7e   : > { %4174 = vadd.xlane.f32.xlu1 %v4173_v13 }
 0xec0   : > { %v4142_v33 = vpop.xlane.xlu0 %4141 }
 0xec1   : > { %v4154_v55 = vmul.f32 0.03125, %v4142_v33 }
 0xec2   : > { %v4145_v36 = vpop.xlane.xlu1 %4144 }
 0xec3   : > { %v4160_v19 = vsub.f32 %v4130_v15, %v4154_v55  ;;  %v4155_v39 = vmul.f32 0.03125, %v4145_v36 }
 0xec5   : > { %v4161_v16 = vsub.f32 %v4131_v62, %v4155_v39  ;;  %v4166_v6 = vmul.f32 %v4160_v19, %v4160_v19 }
 0xec7   : > { %v4176_v30 = vsel %vm857_vm2, %v4166_v6, 0.0  ;;  %v4167_v43 = vmul.f32 %v4161_v16, %v4161_v16  ;;  %v5489_v6 = vmov (!%p4645_p5), 0.0  }
 0xec8   : > { %4177 = vadd.xlane.f32.xlu0 %v4176_v30  ;;  %5187 = vmatprep.subr.bf16.mxu0 (!%p4645_p5), %v5489_v6  ;;  %v6697_v30 = vlaneseq (!%p4645_p5) }
 0xec9   : > { %v4179_v46 = vsel %vm857_vm2, %v4167_v43, 0.0  ;;  %5197 = vmatprep.subr.bf16.mxu1 (!%p4645_p5), %v5489_v6  ;;  %5193 = vmatprep.mubr.msk.bf16.mxu0 (!%p4645_p5), %vm5490_vm10, %v5489_v6 }
 0xeca   : > { %4180 = vadd.xlane.f32.xlu1 %v4179_v46  ;;  %v4249_v43 = vand.u32 (!%p4645_p5), 127, %v6697_v30  ;;  %v4250_v46 = vmul.u32 (!%p4645_p5), 8, %v5729_v59  ;;  %5201 = vmatprep.mubr.msk.bf16.mxu1 (!%p4645_p5), %vm5490_vm10, %v5489_v6  ;;  %v5454_v59 = vld [vmem:[%s6687_s5 + $0x8] sm:$0xff] (!%p4645_p5)  }
 0xecc   : > { %vm4251_vm11 = vcmp.eq.s32.totalorder (!%p4645_p5), %v4249_v43, %v4250_v46 }
 0xecd   : > { %vm4253_vm12 = vmand (!%p4645_p5), %vm4251_vm11, %vm4252_vm9 }
 0xf05   : > { %v4148_v47 = vpop.xlane.xlu0 %4147 }
 0xf06   : > { %v4156_v26 = vmul.f32 0.03125, %v4148_v47 }
 0xf07   : > { %v4151_v27 = vpop.xlane.xlu1 %4150 }
 0xf08   : > { %v4162_v63 = vsub.f32 %v4132_v41, %v4156_v26  ;;  %v4157_v38 = vmul.f32 0.03125, %v4151_v27  ;;  %v4646_v27 = vsel (!%p4645_p5), %vm4253_vm12, 1.0, %v5489_v6 }
 0xf09   : > { %v4172_v5 = vpop.xlane.xlu0 %4171 }
 0xf0a   : > { %v4163_v22 = vsub.f32 %v4133_v18, %v4157_v38  ;;  %v4188_v52 = vmul.f32 0.03125, %v4172_v5  ;;  %v4168_v37 = vmul.f32 %v4162_v63, %v4162_v63 }
 0xf0b   : > { %v4175_v9 = vpop.xlane.xlu1 %4174 }
 0xf0c   : > { %v4194_v24 = vadd.f32 1e-12, %v4188_v52  ;;  %v4189_v42 = vmul.f32 0.03125, %v4175_v9  ;;  %v4182_v29 = vsel %vm857_vm2, %v4168_v37, 0.0  ;;  %v4169_v17 = vmul.f32 %v4163_v22, %v4163_v22  ;;  %v4242_v9 = vld [vmem:[%s6684_s2] sm:$0xff] (!%p4645_p5) }
 0xf0d   : > { %4183 = vadd.xlane.f32.xlu0 %v4182_v29 }
 0xf0e   : > { %5434 = vrsqrt.f32 %v4194_v24  ;;  %v4195_v48 = vadd.f32 1e-12, %v4189_v42  ;;  %v4185_v54 = vsel %vm857_vm2, %v4169_v17, 0.0  ;;  %v4309_v24 = vrot.slane (!%p4645_p5), %v4242_v9, %v6068_v44 }
 0xf0f   : > { %4186 = vadd.xlane.f32.xlu1 %v4185_v54 }
 0xf10   : > { %5436 = vrsqrt.f32 %v4195_v48 }
 0xf18   : > { %v5435_v23 = vpop.eup %5434 }
 0xf19   : > { %v4206_v3 = vmul.f32 %v5435_v23, %v4158_v12 }
 0xf1a   : > { %v5437_v35 = vpop.eup %5436 }
 0xf1b   : > { %v4216_v31 = vmul.f32 %v4215_v34, %v4206_v3  ;;  %v4207_v20 = vmul.f32 %v5437_v35, %v4159_v61 }
 0xf1d   : > { %v4226_v15 = vadd.f32 %v4225_v58, %v4216_v31  ;;  %v4217_v57 = vmul.f32 %v4215_v34, %v4207_v20 }
 0xf1f   : > { %4232 = vst.msk [vmem:[#allocation2] sm:$0xff] %vm857_vm2, %v4226_v15  ;;  %v4227_v53 = vadd.f32 %v4225_v58, %v4217_v57 }
 0xf21   : > { %4233 = vst.msk [vmem:[#allocation2 + $0x8] sm:$0xff] %vm857_vm2, %v4227_v53  ;;  %v4243_v39 = vpack.c.bf16 (!%p4645_p5), %v4227_v53, %v4226_v15 }
 0xf23   : > { %5188 = vmatpush3.bf16.msra.mxu0 (!%p4645_p5), %v4243_v39 }
 0xf24   : > { %5189 = vmatprep.subr.bf16.mxu0 (!%p4645_p5), %v5489_v6 }
 0xf55   : > { %v4178_v62 = vpop.xlane.xlu0 %4177 }
 0xf56   : > { %v4190_v11 = vmul.f32 0.03125, %v4178_v62 }
 0xf57   : > { %v4181_v49 = vpop.xlane.xlu1 %4180 }
 0xf58   : > { %v4196_v8 = vadd.f32 1e-12, %v4190_v11  ;;  %v4191_v21 = vmul.f32 0.03125, %v4181_v49 }
 0xf5a   : > { %5438 = vrsqrt.f32 %v4196_v8  ;;  %v4197_v51 = vadd.f32 1e-12, %v4191_v21 }
 0xf5c   : > { %5440 = vrsqrt.f32 %v4197_v51 }
 0xf64   : > { %v5439_v45 = vpop.eup %5438 }
 0xf65   : > { %v4208_v4 = vmul.f32 %v5439_v45, %v4160_v19 }
 0xf66   : > { %v5441_v60 = vpop.eup %5440 }
 0xf67   : > { %v4218_v41 = vmul.f32 %v4215_v34, %v4208_v4  ;;  %v4209_v32 = vmul.f32 %v5441_v60, %v4161_v16  ;;  %v5453_v16 = vld [vmem:[%s6687_s5] sm:$0xff] (!%p4645_p5)  }
 0xf68   : > { %5198 = vmatpush3.bf16.msra.mxu1 (!%p4645_p5), %v5453_v16 }
 0xf69   : > { %v4228_v0 = vadd.f32 %v4225_v58, %v4218_v41  ;;  %v4219_v56 = vmul.f32 %v4215_v34, %v4209_v32  ;;  %5199 = vmatprep.subr.bf16.mxu1 (!%p4645_p5), %v5489_v6 }
 0xf6b   : > { %4234 = vst.msk [vmem:[#allocation2 + $0x10] sm:$0xff] %vm857_vm2, %v4228_v0  ;;  %v4229_v10 = vadd.f32 %v4225_v58, %v4219_v56 }
 0xf6c   : > { %5200 = vmatpush3.bf16.msra.mxu1 (!%p4645_p5), %v5454_v59 }
 0xf6d   : > { %4235 = vst.msk [vmem:[#allocation2 + $0x18] sm:$0xff] %vm857_vm2, %v4229_v10  ;;  %v4244_v47 = vpack.c.bf16 (!%p4645_p5), %v4229_v10, %v4228_v0  ;;  %5205 = vmatprep.subr.mxu1 (!%p4645_p5), %v5489_v6 }
 0xf6f   : > { %5190 = vmatpush3.bf16.msra.mxu0 (!%p4645_p5), %v4244_v47 }
 0xf70   : > { %5191 = vmatprep.subr.bf16.mxu0 (!%p4645_p5), %v5489_v6 }
 0xf9a   : > { %v4184_v12 = vpop.xlane.xlu0 %4183 }
 0xf9b   : > { %v4192_v18 = vmul.f32 0.03125, %v4184_v12 }
 0xf9c   : > { %v4187_v40 = vpop.xlane.xlu1 %4186 }
 0xf9d   : > { %v4198_v14 = vadd.f32 1e-12, %v4192_v18  ;;  %v4193_v61 = vmul.f32 0.03125, %v4187_v40 }
 0xf9f   : > { %5442 = vrsqrt.f32 %v4198_v14  ;;  %v4199_v50 = vadd.f32 1e-12, %v4193_v61 }
 0xfa1   : > { %5444 = vrsqrt.f32 %v4199_v50 }
 0xfa9   : > { %v5443_v25 = vpop.eup %5442 }
 0xfaa   : > { %v4210_v28 = vmul.f32 %v5443_v25, %v4162_v63  ;;  %v4256_v63 = vpack.c.bf16 (!%p4645_p5), %v4646_v27, %v4646_v27 }
 0xfab   : > { %v5445_v2 = vpop.eup %5444 }
 0xfac   : > { %v4220_v13 = vmul.f32 %v4215_v34, %v4210_v28  ;;  %v4211_v33 = vmul.f32 %v5445_v2, %v4163_v22  ;;  %4241 = sbr.rel (%p4645_p5) target bundleno = 4859 (0x12fb), region = 72 }
 0xfae   : > { %v4230_v55 = vadd.f32 %v4225_v58, %v4220_v13  ;;  %v4221_v36 = vmul.f32 %v4215_v34, %v4211_v33 }
 0xfb0   : > { %4236 = vst.msk [vmem:[#allocation2 + $0x20] sm:$0xff] %vm857_vm2, %v4230_v55  ;;  %v4231_v19 = vadd.f32 %v4225_v58, %v4221_v36 }
 0xfb2   : > { %4237 = vst.msk [vmem:[#allocation2 + $0x28] sm:$0xff] %vm857_vm2, %v4231_v19  ;;  %v4245_v26 = vpack.c.bf16 (!%p4645_p5), %v4231_v19, %v4230_v55 }
 0xfb4   : > { %5192 = vmatpush3.bf16.msra.mxu0 %v4245_v26 }
 0xfb7   : > { %5194 = vmatmul.mubr.msk.bf16.vlgmr.msra.gmra.mrb[0].mxu0 %vm4257_vm13, %v4256_v63 }
0x108a   : > { %v4295_v38 = vpop.f32.mrb[0].mxu0 }
0x108b   : > { %v4301_v5 = vpack.c.bf16 %v4295_v38, %v4295_v38  ;;  %v5195_v22 = vpop.f32.mrb[1].mxu0 }
0x108c   : > { %v4298_v52 = vpop.f32.mrb[2].mxu0 }
0x108d   : > { %v5196_v37 = vpop.f32.mrb[3].mxu0  ;;  %5202 = vmatmul.mubr.msk.bf16.vlgmr.msra.gmra.mrb[0].mxu1 %vm857_vm2, %v4301_v5 }
0x108e   : > { %5207 = vmatprep.mubr.msk.f32.mxu1 %vm5490_vm10, %v5489_v6 }
0x1160   : > { %v4359_v42 = vpop.f32.mrb[0].mxu1 }
0x1161   : > { %v4360_v29 = vadd.f32 %v4359_v42, %v4309_v24  ;;  %v5203_v17 = vpop.f32.mrb[1].mxu1 }
0x1162   : > { %v4362_v48 = vpop.f32.mrb[2].mxu1 }
0x1163   : > { %5455 = vtanh.f32 %v4360_v29  ;;  %v5204_v54 = vpop.f32.mrb[3].mxu1 }
0x116d   : > { %v5456_v1 = vpop.eup %5455 }
0x116e   : > { %v4366_v7 = vmul.f32 %v5456_v1, %v5456_v1 }
0x1170   : > { %v4367_v34 = vsel %vm857_vm2, %v4366_v7, 0.0 }
0x1171   : > { %4368 = vadd.xlane.f32.xlu0 %v4367_v34 }
0x11fe   : > { %v4369_v23 = vpop.xlane.xlu0 %4368 }
0x11ff   : > { %5457 = vrsqrt.f32 %v4369_v23  ;;  %vm4372_vm14 = vcmp.eq.f32.partialorder %v4369_v23, inf  ;;  %v4375_v35 = vand.u32 2147483648, %v4369_v23  ;;  %vm4374_vm15 = vcmp.eq.f32.partialorder %v4369_v23, 0.0 }
0x1209   : > { %v5458_v58 = vpop.eup %5457 }
0x120a   : > { %v4371_v3 = vmul.f32 %v5458_v58, %v4369_v23 }
0x120c   : > { %v4373_v31 = vsel %vm4372_vm14, %v4369_v23, %v4371_v3 }
0x120d   : > { %v4376_v44 = vsel %vm4374_vm15, %v4375_v35, %v4373_v31 }
0x120e   : > { %v4377_v20 = vmax.f32 %v4376_v44, 1e-12 }
0x1210   : > { %5459 = vrcp.f32 %v4377_v20 }
0x121a   : > { %v5460_v15 = vpop.eup %5459 }
0x121b   : > { %v4379_v57 = vmul.f32 %v5460_v15, %v5456_v1 }
0x121d   : > { %v4381_v53 = vrot.slane %v4379_v57, 2 }
0x121f   : > { %5206 = vmatpush3.xpose.msk.msra.mxu1 %vm857_vm2, %v4381_v53 }
0x1222   : > { %5208 = vmatmul.mubr.msk.f32.vlgmr.msra.gmra.mrb[4].mxu1 %vm857_vm2, %v4379_v57 }
0x12f5   : > { %v4452_v62 = vpop.f32.mrb[4].mxu1 }
0x12f6   : > { %v4456_v11 = vmul.f32 20.0, %v4452_v62  ;;  %v5209_v49 = vpop.f32.mrb[5].mxu1 }
0x12f8   : > { %v4458_v8 = vsel %vm4457_vm0, %v4456_v11, 0.0 }
0x12f9   : > { %v4460_v21 = vsel %vm4459_vm1, %v4458_v8, 0.0 }
0x12fa   : > { %4461 = vst [vmem:[%s6693_s11] sm:$0xff] %v4460_v21 }
0x12fb PF: > { %s21_s17 = sadd.s32 1, %s5467_s17  }
0x12fc   : > { %p18_p6 = scmp.ge.s32.totalorder %s21_s17, 4  }
0x12fe   :  { %20 = sbr.rel (!%p18_p6) target bundleno = 1 (0x1), region = 110 }

</bundles_post_ra>
